<compile_context>
chip_gen: v7x
topology: tpu7x:2x2x1
jax: 0.10.0
libtpu: 0.0.40
codegen_flags: <defaults>
</compile_context>

<pallas_src>
import jax
import jax.numpy as jnp
from jax import lax
from jax.experimental import pallas as pl
from jax.experimental.pallas import tpu as pltpu

EPS = 1e-5  # PyTorch BatchNorm2d default eps


# ----------------------------- kernels -------------------------------------

def _bn_stats_kernel(x_ref, sum_ref, sumsq_ref):
    """Per-channel sum / sum-of-squares accumulated across the reduction grid."""
    @pl.when(pl.program_id(0) == 0)
    def _init():
        sum_ref[...] = jnp.zeros_like(sum_ref)
        sumsq_ref[...] = jnp.zeros_like(sumsq_ref)

    x = x_ref[...].astype(jnp.float32)
    sum_ref[...] += jnp.sum(x, axis=0, keepdims=True)
    sumsq_ref[...] += jnp.sum(x * x, axis=0, keepdims=True)


def _act_tile(x_ref, m_ref, s_ref, b_ref):
    """relu(x * scale + shift), with the 1-px padding ring forced back to zero
    (the conv pads with zeros AFTER BN+ReLU in the reference)."""
    return jnp.maximum(x_ref[0] * s_ref[...] + b_ref[...], 0.0) * m_ref[...]


def _conv_taps(act, w_ref):
    """3x3 'SAME' conv of a zero-bordered activation tile (bf16 MXU, f32 acc).

    act   : (H+2, W+2, Cin) f32, border already zeroed.
    w_ref : (9*Cin, Cout) bf16 -> single matmul, K = 9*Cin (lane-aligned Cin)
            (9, Cin, Cout) bf16 -> 9 accumulated dots (narrow / unaligned Cin)
    Returns (H*W, Cout) f32.
    """
    hp, wp, cin = act.shape
    h, w = hp - 2, wp - 2
    taps = [act[dh:dh + h, dw:dw + w, :] for dh in range(3) for dw in range(3)]
    if len(w_ref.shape) == 2:
        # Single MXU matmul with a 9x larger K dimension.
        patches = jnp.concatenate(taps, axis=-1)                 # (H, W, 9*Cin)
        patches = patches.reshape(h * w, 9 * cin).astype(jnp.bfloat16)
        return jnp.dot(patches, w_ref[...], preferred_element_type=jnp.float32)
    acc = jnp.dot(taps[0].reshape(h * w, cin).astype(jnp.bfloat16), w_ref[0],
                  preferred_element_type=jnp.float32)
    for t in range(1, 9):
        acc = acc + jnp.dot(taps[t].reshape(h * w, cin).astype(jnp.bfloat16),
                            w_ref[t], preferred_element_type=jnp.float32)
    return acc


def _bnrelu_conv_kernel(x_ref, m_ref, s_ref, b_ref, w_ref, o_ref):
    # out = conv3x3(relu(bn(x)))
    o_ref[0] = _conv_taps(_act_tile(x_ref, m_ref, s_ref, b_ref), w_ref)


def _bnrelu_conv_add_kernel(x_ref, m_ref, s_ref, b_ref, w_ref, r_ref, o_ref):
    # out = conv3x3(relu(bn2(y1))) + x          (equalInOut case)
    o_ref[0] = _conv_taps(_act_tile(x_ref, m_ref, s_ref, b_ref), w_ref) + r_ref[0]


def _bnrelu_conv_shortcut_kernel(x_ref, m_ref, s_ref, b_ref, w_ref,
                                 rx_ref, s1_ref, b1_ref, wsc_ref, o_ref):
    # out = conv3x3(relu(bn2(y1))) + relu(bn1(x)) @ Wsc   (1x1 conv shortcut case)
    y = _conv_taps(_act_tile(x_ref, m_ref, s_ref, b_ref), w_ref)
    ract = jnp.maximum(rx_ref[0] * s1_ref[...] + b1_ref[...], 0.0)
    y = y + jnp.dot(ract.astype(jnp.bfloat16), wsc_ref[...],
                    preferred_element_type=jnp.float32)
    o_ref[0] = y


# ----------------------------- wrappers ------------------------------------

def bn_scale_shift(x2d, gamma, beta, *, tile_m=1024):
    """Training-mode BatchNorm folded into per-channel (scale, shift).

    Tiled Pallas reduction over M ("arbitrary" axis, resident (1, C) accumulators).
    The zero-padded tail rows are exact for sum / sumsq; we divide by the true M.
    """
    M, C = x2d.shape
    tm = min(tile_m, M)
    Mp = pl.cdiv(M, tm) * tm
    if Mp != M:
        x2d = jnp.pad(x2d, ((0, Mp - M), (0, 0)))
    s, ss = pl.pallas_call(
        _bn_stats_kernel,
        out_shape=(jax.ShapeDtypeStruct((1, C), jnp.float32),
                   jax.ShapeDtypeStruct((1, C), jnp.float32)),
        grid=(Mp // tm,),
        in_specs=[pl.BlockSpec((tm, C), lambda i: (i, 0))],
        out_specs=(pl.BlockSpec((1, C), lambda i: (0, 0)),
                   pl.BlockSpec((1, C), lambda i: (0, 0))),
        compiler_params=pltpu.CompilerParams(dimension_semantics=("arbitrary",)),
    )(x2d)
    mean = s[0] / M
    # f32 accumulators; clamp protects against tiny negative E[x^2] - mean^2.
    # TODO(synk): two-pass centered variance if |mean| >> std ever matters.
    var = jnp.maximum(ss[0] / M - mean * mean, 0.0)
    scale = gamma * lax.rsqrt(var + EPS)
    shift = beta - mean * scale
    return scale.reshape(1, C), shift.reshape(1, C)


def _conv_in_specs(Hp, Wp, Cin, w_shape):
    return [
        pl.BlockSpec((1, Hp, Wp, Cin), lambda n: (n, 0, 0, 0)),  # padded input tile
        pl.BlockSpec((Hp, Wp, 1), lambda n: (0, 0, 0)),          # border mask
        pl.BlockSpec((1, Cin), lambda n: (0, 0)),                # fused BN scale
        pl.BlockSpec((1, Cin), lambda n: (0, 0)),                # fused BN shift
        # Constant index map -> the weight block is fetched once and stays resident.
        pl.BlockSpec(w_shape, lambda n: (0,) * len(w_shape)),
    ]


def _conv_call(kernel, xp, mask, scale, shift, w, extra, extra_specs, cout):
    N, Hp, Wp, Cin = xp.shape
    H, W = Hp - 2, Wp - 2
    return pl.pallas_call(
        kernel,
        out_shape=jax.ShapeDtypeStruct((N, H * W, cout), jnp.float32),
        grid=(N,),  # one image (H*W rows) per grid step; parallel -> megacore
        in_specs=_conv_in_specs(Hp, Wp, Cin, w.shape) + list(extra_specs),
        out_specs=pl.BlockSpec((1, H * W, cout), lambda n: (n, 0, 0)),
        compiler_params=pltpu.CompilerParams(dimension_semantics=("parallel",)),
    )(xp, mask, scale, shift, w, *extra)


def bnrelu_conv3x3(xp, mask, scale, shift, w, cout):
    return _conv_call(_bnrelu_conv_kernel, xp, mask, scale, shift, w, (), (), cout)


def bnrelu_conv3x3_add(xp, mask, scale, shift, w, res_flat, cout):
    rspec = pl.BlockSpec((1,) + res_flat.shape[1:], lambda n: (n, 0, 0))
    return _conv_call(_bnrelu_conv_add_kernel, xp, mask, scale, shift, w,
                      (res_flat,), (rspec,), cout)


def bnrelu_conv3x3_shortcut(xp, mask, scale, shift, w,
                            x_flat, scale1, shift1, wsc, cout):
    cin0 = x_flat.shape[-1]
    extra_specs = (
        pl.BlockSpec((1,) + x_flat.shape[1:], lambda n: (n, 0, 0)),  # raw x (flat)
        pl.BlockSpec((1, cin0), lambda n: (0, 0)),                   # BN1 scale
        pl.BlockSpec((1, cin0), lambda n: (0, 0)),                   # BN1 shift
        pl.BlockSpec(wsc.shape, lambda n: (0, 0)),                   # 1x1 shortcut W
    )
    return _conv_call(_bnrelu_conv_shortcut_kernel, xp, mask, scale, shift, w,
                      (x_flat, scale1, shift1, wsc), extra_specs, cout)


# ----------------------------- glue ----------------------------------------

def _prep_conv_weight(w_hwio):
    """(3, 3, Cin, Cout) -> bf16 MXU operand (layout picks the in-kernel path)."""
    kh, kw, cin, cout = w_hwio.shape
    w = w_hwio.astype(jnp.bfloat16)
    if cin % 128 == 0:
        return w.reshape(kh * kw * cin, cout)   # single-matmul path (K = 9*Cin)
    return w.reshape(kh * kw, cin, cout)        # per-tap accumulate path


def _border_mask(H, W):
    return jnp.pad(jnp.ones((H, W, 1), jnp.float32), ((1, 1), (1, 1), (0, 0)))


def basic_block_forward(x_nchw, params, *, in_planes, out_planes, stride=1,
                        drop_rate=0.0):
    # TODO(synk): stride > 1 (downsampling conv / shortcut) not implemented.
    assert stride == 1
    # drop_rate == 0.0 -> F.dropout is a no-op.
    # TODO(synk): dropout for drop_rate > 0 not implemented.
    assert drop_rate == 0.0
    equal = in_planes == out_planes

    N, C, H, W = x_nchw.shape
    assert C == in_planes

    x = jnp.transpose(x_nchw, (0, 2, 3, 1)).astype(jnp.float32)   # NHWC
    x_flat = x.reshape(N, H * W, C)                               # free reshape
    mask = _border_mask(H, W)
    w1 = _prep_conv_weight(params["w1"])
    w2 = _prep_conv_weight(params["w2"])

    # BN1 (training-mode batch stats) folded into a per-channel scale / shift.
    s1, b1 = bn_scale_shift(x.reshape(N * H * W, C), params["g1"], params["b1"])

    # conv1 fused with BN1-normalize + ReLU (zero border == 'SAME' padding of the
    # post-activation tensor).
    xp = jnp.pad(x, ((0, 0), (1, 1), (1, 1), (0, 0)))
    y1 = bnrelu_conv3x3(xp, mask, s1, b1, w1, out_planes)         # (N, H*W, Cout)

    # BN2 stats on conv1's output.
    s2, b2 = bn_scale_shift(y1.reshape(N * H * W, out_planes),
                            params["g2"], params["b2"])

    # conv2 fused with BN2 + ReLU + residual / 1x1-conv-shortcut add.
    y1p = jnp.pad(y1.reshape(N, H, W, out_planes),
                  ((0, 0), (1, 1), (1, 1), (0, 0)))
    if equal:
        out = bnrelu_conv3x3_add(y1p, mask, s2, b2, w2, x_flat, out_planes)
    else:
        wsc = params["wsc"].astype(jnp.bfloat16)
        out = bnrelu_conv3x3_shortcut(y1p, mask, s2, b2, w2,
                                      x_flat, s1, b1, wsc, out_planes)

    return jnp.transpose(out.reshape(N, H, W, out_planes), (0, 3, 1, 2))  # NCHW


# ----------------------------- reference -----------------------------------

def ref_forward(x_nchw, params, in_planes, out_planes):
    x = jnp.transpose(x_nchw, (0, 2, 3, 1))

    def bn_relu_ref(v, g, b):
        mean = v.mean(axis=(0, 1, 2), keepdims=True)
        var = ((v - mean) ** 2).mean(axis=(0, 1, 2), keepdims=True)
        return jnp.maximum((v - mean) / jnp.sqrt(var + EPS) * g + b, 0.0)

    def conv_ref(v, w):
        return lax.conv_general_dilated(
            v, w, (1, 1), "SAME",
            dimension_numbers=("NHWC", "HWIO", "NHWC"),
            precision=lax.Precision.HIGHEST)

    a1 = bn_relu_ref(x, params["g1"], params["b1"])
    o = conv_ref(a1, params["w1"])
    o = bn_relu_ref(o, params["g2"], params["b2"])
    o = conv_ref(o, params["w2"])
    if in_planes == out_planes:
        res = x + o
    else:
        res = conv_ref(a1, params["wsc"].reshape(1, 1, in_planes, out_planes)) + o
    return jnp.transpose(res, (0, 3, 1, 2))


# ------------------------------- main ---------------------------------------

if __name__ == "__main__":
    fwd = jax.jit(basic_block_forward,
                  static_argnames=("in_planes", "out_planes", "stride", "drop_rate"))

    key = jax.random.PRNGKey(0)
    N, H, W = 2, 16, 16
    # (4, 8): convShortcut path;  (8, 8): identity-residual path.
    for (cin, cout) in [(4, 8), (8, 8)]:
        key, kp, kx = jax.random.split(key, 3)
        ks = jax.random.split(kp, 7)
        params = {
            "g1": 1.0 + 0.1 * jax.random.normal(ks[0], (cin,), jnp.float32),
            "b1": 0.1 * jax.random.normal(ks[1], (cin,), jnp.float32),
            "w1": 0.2 * jax.random.normal(ks[2], (3, 3, cin, cout), jnp.float32),
            "g2": 1.0 + 0.1 * jax.random.normal(ks[3], (cout,), jnp.float32),
            "b2": 0.1 * jax.random.normal(ks[4], (cout,), jnp.float32),
            "w2": 0.2 * jax.random.normal(ks[5], (3, 3, cout, cout), jnp.float32),
        }
        if cin != cout:
            params["wsc"] = 0.2 * jax.random.normal(ks[6], (cin, cout), jnp.float32)
        x = jax.random.normal(kx, (N, cin, H, W), jnp.float32)

        y = jax.block_until_ready(fwd(x, params, in_planes=cin, out_planes=cout))
        y_ref = ref_forward(x, params, cin, cout)

        assert y.shape == (N, cout, H, W), y.shape
        err = float(jnp.max(jnp.abs(y - y_ref)))
        # bf16 matmul operands (f32 accumulate) vs an f32 HIGHEST-precision ref.
        assert jnp.allclose(y, y_ref, atol=5e-2, rtol=5e-2), f"max abs err {err}"
    print("KERNEL_OK")
</pallas_src>

<mosaic_0001>
module attributes {stable_mosaic.version = 11 : i64} {
  func.func @_bn_stats_kernel(%arg0: i32, %arg1: memref<512x4xf32, #tpu.memory_space<vmem>>, %arg2: memref<1x4xf32, #tpu.memory_space<vmem>>, %arg3: memref<1x4xf32, #tpu.memory_space<vmem>>) attributes {dimension_semantics = [#tpu.dimension_semantics<arbitrary>], iteration_bounds = array<i64: 1>, scalar_prefetch = 0 : i64, scratch_operands = 0 : i64, tpu.core_type = #tpu.core_type<tc>, window_params = [{transform_indices = @transform_0, window_bounds = array<i64: 512, 4>}, {pipeline_mode = #tpu.pipeline_mode<synchronous>, transform_indices = @transform_1, window_bounds = array<i64: 1, 4>}, {pipeline_mode = #tpu.pipeline_mode<synchronous>, transform_indices = @transform_2, window_bounds = array<i64: 1, 4>}]} {
    %c0_i32 = arith.constant 0 : i32
    %0 = arith.cmpi eq, %arg0, %c0_i32 : i32
    %1 = arith.extui %0 : i1 to i32
    %c0_i32_0 = arith.constant 0 : i32
    %2 = arith.cmpi ne, %1, %c0_i32_0 : i32
    scf.if %2 {
      %cst_11 = arith.constant 0.000000e+00 : f32
      %15 = vector.broadcast %cst_11 : f32 to vector<1x4xf32>
      %c0_12 = arith.constant 0 : index
      %c0_13 = arith.constant 0 : index
      %16 = vector.load %arg2[%c0_12, %c0_13] : memref<1x4xf32, #tpu.memory_space<vmem>>, vector<1x4xf32>
      tpu.vector_store %arg2[%c0_12, %c0_13], %15 {strides = array<i32>} : memref<1x4xf32, #tpu.memory_space<vmem>>, vector<1x4xf32>,
      %cst_14 = arith.constant 0.000000e+00 : f32
      %17 = vector.broadcast %cst_14 : f32 to vector<1x4xf32>
      %c0_15 = arith.constant 0 : index
      %c0_16 = arith.constant 0 : index
      %18 = vector.load %arg3[%c0_15, %c0_16] : memref<1x4xf32, #tpu.memory_space<vmem>>, vector<1x4xf32>
      tpu.vector_store %arg3[%c0_15, %c0_16], %17 {strides = array<i32>} : memref<1x4xf32, #tpu.memory_space<vmem>>, vector<1x4xf32>,
    } else {
    }
    %c0 = arith.constant 0 : index
    %c0_1 = arith.constant 0 : index
    %3 = vector.load %arg1[%c0, %c0_1] : memref<512x4xf32, #tpu.memory_space<vmem>>, vector<512x4xf32>
    %c0_2 = arith.constant 0 : index
    %c0_3 = arith.constant 0 : index
    %4 = vector.load %arg2[%c0_2, %c0_3] : memref<1x4xf32, #tpu.memory_space<vmem>>, vector<1x4xf32>
    %cst = arith.constant dense<0.000000e+00> : vector<4xf32>
    %5 = vector.multi_reduction <add>, %3, %cst [0] : vector<512x4xf32> to vector<4xf32>
    %6 = vector.shape_cast %5 : vector<4xf32> to vector<1x4xf32>
    %7 = arith.addf %4, %6 : vector<1x4xf32>
    %c0_4 = arith.constant 0 : index
    %c0_5 = arith.constant 0 : index
    %8 = vector.load %arg2[%c0_4, %c0_5] : memref<1x4xf32, #tpu.memory_space<vmem>>, vector<1x4xf32>
    tpu.vector_store %arg2[%c0_4, %c0_5], %7 {strides = array<i32>} : memref<1x4xf32, #tpu.memory_space<vmem>>, vector<1x4xf32>,
    %c0_6 = arith.constant 0 : index
    %c0_7 = arith.constant 0 : index
    %9 = vector.load %arg3[%c0_6, %c0_7] : memref<1x4xf32, #tpu.memory_space<vmem>>, vector<1x4xf32>
    %10 = arith.mulf %3, %3 : vector<512x4xf32>
    %cst_8 = arith.constant dense<0.000000e+00> : vector<4xf32>
    %11 = vector.multi_reduction <add>, %10, %cst_8 [0] : vector<512x4xf32> to vector<4xf32>
    %12 = vector.shape_cast %11 : vector<4xf32> to vector<1x4xf32>
    %13 = arith.addf %9, %12 : vector<1x4xf32>
    %c0_9 = arith.constant 0 : index
    %c0_10 = arith.constant 0 : index
    %14 = vector.load %arg3[%c0_9, %c0_10] : memref<1x4xf32, #tpu.memory_space<vmem>>, vector<1x4xf32>
    tpu.vector_store %arg3[%c0_9, %c0_10], %13 {strides = array<i32>} : memref<1x4xf32, #tpu.memory_space<vmem>>, vector<1x4xf32>,
    return
  }
  func.func @transform_0(%arg0: i32) -> (i32, i32) {
    %c0_i32 = arith.constant 0 : i32
    %c0_i32_0 = arith.constant 0 : i32
    return %arg0, %c0_i32 : i32, i32
  }
  func.func @transform_1(%arg0: i32) -> (i32, i32) {
    %c0_i32 = arith.constant 0 : i32
    %c0_i32_0 = arith.constant 0 : i32
    %c0_i32_1 = arith.constant 0 : i32
    return %c0_i32, %c0_i32_0 : i32, i32
  }
  func.func @transform_2(%arg0: i32) -> (i32, i32) {
    %c0_i32 = arith.constant 0 : i32
    %c0_i32_0 = arith.constant 0 : i32
    %c0_i32_1 = arith.constant 0 : i32
    return %c0_i32, %c0_i32_0 : i32, i32
  }
}

module attributes {stable_mosaic.version = 11 : i64} {
  func.func @_bnrelu_conv_kernel(%arg0: i32, %arg1: memref<1x18x18x4xf32, #tpu.memory_space<vmem>>, %arg2: memref<18x18x1xf32, #tpu.memory_space<vmem>>, %arg3: memref<1x4xf32, #tpu.memory_space<vmem>>, %arg4: memref<1x4xf32, #tpu.memory_space<vmem>>, %arg5: memref<9x4x8xbf16, #tpu.memory_space<vmem>>, %arg6: memref<1x256x8xf32, #tpu.memory_space<vmem>>) attributes {dimension_semantics = [#tpu.dimension_semantics<parallel>], iteration_bounds = array<i64: 2>, scalar_prefetch = 0 : i64, scratch_operands = 0 : i64, tpu.core_type = #tpu.core_type<tc>, window_params = [{transform_indices = @transform_0, window_bounds = array<i64: 1, 18, 18, 4>}, {pipeline_mode = #tpu.pipeline_mode<synchronous>, transform_indices = @transform_1, window_bounds = array<i64: 18, 18, 1>}, {pipeline_mode = #tpu.pipeline_mode<synchronous>, transform_indices = @transform_2, window_bounds = array<i64: 1, 4>}, {pipeline_mode = #tpu.pipeline_mode<synchronous>, transform_indices = @transform_3, window_bounds = array<i64: 1, 4>}, {pipeline_mode = #tpu.pipeline_mode<synchronous>, transform_indices = @transform_4, window_bounds = array<i64: 9, 4, 8>}, {transform_indices = @transform_5, window_bounds = array<i64: 1, 256, 8>}]} {
    %c0 = arith.constant 0 : index
    %c0_0 = arith.constant 0 : index
    %c0_1 = arith.constant 0 : index
    %c0_2 = arith.constant 0 : index
    %0 = vector.load %arg1[%c0, %c0_0, %c0_1, %c0_2] : memref<1x18x18x4xf32, #tpu.memory_space<vmem>>, vector<1x18x18x4xf32>
    %1 = vector.shape_cast %0 : vector<1x18x18x4xf32> to vector<18x18x4xf32>
    %c0_3 = arith.constant 0 : index
    %c0_4 = arith.constant 0 : index
    %2 = vector.load %arg3[%c0_3, %c0_4] : memref<1x4xf32, #tpu.memory_space<vmem>>, vector<1x4xf32>
    %3 = vector.shape_cast %2 : vector<1x4xf32> to vector<1x1x4xf32>
    %4 = vector.broadcast %3 : vector<1x1x4xf32> to vector<18x18x4xf32>
    %5 = arith.mulf %1, %4 : vector<18x18x4xf32>
    %c0_5 = arith.constant 0 : index
    %c0_6 = arith.constant 0 : index
    %6 = vector.load %arg4[%c0_5, %c0_6] : memref<1x4xf32, #tpu.memory_space<vmem>>, vector<1x4xf32>
    %7 = vector.shape_cast %6 : vector<1x4xf32> to vector<1x1x4xf32>
    %8 = vector.broadcast %7 : vector<1x1x4xf32> to vector<18x18x4xf32>
    %9 = arith.addf %5, %8 : vector<18x18x4xf32>
    %cst = arith.constant 0.000000e+00 : f32
    %10 = vector.broadcast %cst : f32 to vector<18x18x4xf32>
    %11 = arith.maximumf %9, %10 : vector<18x18x4xf32>
    %c0_7 = arith.constant 0 : index
    %c0_8 = arith.constant 0 : index
    %c0_9 = arith.constant 0 : index
    %12 = vector.load %arg2[%c0_7, %c0_8, %c0_9] : memref<18x18x1xf32, #tpu.memory_space<vmem>>, vector<18x18x1xf32>
    %13 = vector.broadcast %12 : vector<18x18x1xf32> to vector<18x18x4xf32>
    %14 = arith.mulf %11, %13 : vector<18x18x4xf32>
    %15 = vector.extract_strided_slice %14 {offsets = [0, 0, 0], sizes = [16, 16, 4], strides = [1, 1, 1]} : vector<18x18x4xf32> to vector<16x16x4xf32>
    %16 = vector.extract_strided_slice %14 {offsets = [0, 1, 0], sizes = [16, 16, 4], strides = [1, 1, 1]} : vector<18x18x4xf32> to vector<16x16x4xf32>
    %17 = vector.extract_strided_slice %14 {offsets = [0, 2, 0], sizes = [16, 16, 4], strides = [1, 1, 1]} : vector<18x18x4xf32> to vector<16x16x4xf32>
    %18 = vector.extract_strided_slice %14 {offsets = [1, 0, 0], sizes = [16, 16, 4], strides = [1, 1, 1]} : vector<18x18x4xf32> to vector<16x16x4xf32>
    %19 = vector.extract_strided_slice %14 {offsets = [1, 1, 0], sizes = [16, 16, 4], strides = [1, 1, 1]} : vector<18x18x4xf32> to vector<16x16x4xf32>
    %20 = vector.extract_strided_slice %14 {offsets = [1, 2, 0], sizes = [16, 16, 4], strides = [1, 1, 1]} : vector<18x18x4xf32> to vector<16x16x4xf32>
    %21 = vector.extract_strided_slice %14 {offsets = [2, 0, 0], sizes = [16, 16, 4], strides = [1, 1, 1]} : vector<18x18x4xf32> to vector<16x16x4xf32>
    %22 = vector.extract_strided_slice %14 {offsets = [2, 1, 0], sizes = [16, 16, 4], strides = [1, 1, 1]} : vector<18x18x4xf32> to vector<16x16x4xf32>
    %23 = vector.extract_strided_slice %14 {offsets = [2, 2, 0], sizes = [16, 16, 4], strides = [1, 1, 1]} : vector<18x18x4xf32> to vector<16x16x4xf32>
    %24 = vector.shape_cast %15 : vector<16x16x4xf32> to vector<256x4xf32>
    %25 = arith.truncf %24 : vector<256x4xf32> to vector<256x4xbf16>
    %c0_10 = arith.constant 0 : index
    %c0_11 = arith.constant 0 : index
    %c0_12 = arith.constant 0 : index
    %26 = vector.load %arg5[%c0_10, %c0_11, %c0_12] : memref<9x4x8xbf16, #tpu.memory_space<vmem>>, vector<1x4x8xbf16>
    %27 = vector.shape_cast %26 : vector<1x4x8xbf16> to vector<4x8xbf16>
    %cst_13 = arith.constant dense<0.000000e+00> : vector<256x8xf32>
    %28 = tpu.matmul %25, %27, %cst_13 {dimension_numbers = #tpu.dot_dimension_numbers<[1], [0], [0], [1], [0, 0, 1, 1], [], []>} : vector<256x4xbf16>, vector<4x8xbf16>, vector<256x8xf32> -> vector<256x8xf32>
    %29 = vector.shape_cast %16 : vector<16x16x4xf32> to vector<256x4xf32>
    %30 = arith.truncf %29 : vector<256x4xf32> to vector<256x4xbf16>
    %c1 = arith.constant 1 : index
    %c0_14 = arith.constant 0 : index
    %c0_15 = arith.constant 0 : index
    %31 = vector.load %arg5[%c1, %c0_14, %c0_15] : memref<9x4x8xbf16, #tpu.memory_space<vmem>>, vector<1x4x8xbf16>
    %32 = vector.shape_cast %31 : vector<1x4x8xbf16> to vector<4x8xbf16>
    %cst_16 = arith.constant dense<0.000000e+00> : vector<256x8xf32>
    %33 = tpu.matmul %30, %32, %cst_16 {dimension_numbers = #tpu.dot_dimension_numbers<[1], [0], [0], [1], [0, 0, 1, 1], [], []>} : vector<256x4xbf16>, vector<4x8xbf16>, vector<256x8xf32> -> vector<256x8xf32>
    %34 = arith.addf %28, %33 : vector<256x8xf32>
    %35 = vector.shape_cast %17 : vector<16x16x4xf32> to vector<256x4xf32>
    %36 = arith.truncf %35 : vector<256x4xf32> to vector<256x4xbf16>
    %c2 = arith.constant 2 : index
    %c0_17 = arith.constant 0 : index
    %c0_18 = arith.constant 0 : index
    %37 = vector.load %arg5[%c2, %c0_17, %c0_18] : memref<9x4x8xbf16, #tpu.memory_space<vmem>>, vector<1x4x8xbf16>
    %38 = vector.shape_cast %37 : vector<1x4x8xbf16> to vector<4x8xbf16>
    %cst_19 = arith.constant dense<0.000000e+00> : vector<256x8xf32>
    %39 = tpu.matmul %36, %38, %cst_19 {dimension_numbers = #tpu.dot_dimension_numbers<[1], [0], [0], [1], [0, 0, 1, 1], [], []>} : vector<256x4xbf16>, vector<4x8xbf16>, vector<256x8xf32> -> vector<256x8xf32>
    %40 = arith.addf %34, %39 : vector<256x8xf32>
    %41 = vector.shape_cast %18 : vector<16x16x4xf32> to vector<256x4xf32>
    %42 = arith.truncf %41 : vector<256x4xf32> to vector<256x4xbf16>
    %c3 = arith.constant 3 : index
    %c0_20 = arith.constant 0 : index
    %c0_21 = arith.constant 0 : index
    %43 = vector.load %arg5[%c3, %c0_20, %c0_21] : memref<9x4x8xbf16, #tpu.memory_space<vmem>>, vector<1x4x8xbf16>
    %44 = vector.shape_cast %43 : vector<1x4x8xbf16> to vector<4x8xbf16>
    %cst_22 = arith.constant dense<0.000000e+00> : vector<256x8xf32>
    %45 = tpu.matmul %42, %44, %cst_22 {dimension_numbers = #tpu.dot_dimension_numbers<[1], [0], [0], [1], [0, 0, 1, 1], [], []>} : vector<256x4xbf16>, vector<4x8xbf16>, vector<256x8xf32> -> vector<256x8xf32>
    %46 = arith.addf %40, %45 : vector<256x8xf32>
    %47 = vector.shape_cast %19 : vector<16x16x4xf32> to vector<256x4xf32>
    %48 = arith.truncf %47 : vector<256x4xf32> to vector<256x4xbf16>
    %c4 = arith.constant 4 : index
    %c0_23 = arith.constant 0 : index
    %c0_24 = arith.constant 0 : index
    %49 = vector.load %arg5[%c4, %c0_23, %c0_24] : memref<9x4x8xbf16, #tpu.memory_space<vmem>>, vector<1x4x8xbf16>
    %50 = vector.shape_cast %49 : vector<1x4x8xbf16> to vector<4x8xbf16>
    %cst_25 = arith.constant dense<0.000000e+00> : vector<256x8xf32>
    %51 = tpu.matmul %48, %50, %cst_25 {dimension_numbers = #tpu.dot_dimension_numbers<[1], [0], [0], [1], [0, 0, 1, 1], [], []>} : vector<256x4xbf16>, vector<4x8xbf16>, vector<256x8xf32> -> vector<256x8xf32>
    %52 = arith.addf %46, %51 : vector<256x8xf32>
    %53 = vector.shape_cast %20 : vector<16x16x4xf32> to vector<256x4xf32>
    %54 = arith.truncf %53 : vector<256x4xf32> to vector<256x4xbf16>
    %c5 = arith.constant 5 : index
    %c0_26 = arith.constant 0 : index
    %c0_27 = arith.constant 0 : index
    %55 = vector.load %arg5[%c5, %c0_26, %c0_27] : memref<9x4x8xbf16, #tpu.memory_space<vmem>>, vector<1x4x8xbf16>
    %56 = vector.shape_cast %55 : vector<1x4x8xbf16> to vector<4x8xbf16>
    %cst_28 = arith.constant dense<0.000000e+00> : vector<256x8xf32>
    %57 = tpu.matmul %54, %56, %cst_28 {dimension_numbers = #tpu.dot_dimension_numbers<[1], [0], [0], [1], [0, 0, 1, 1], [], []>} : vector<256x4xbf16>, vector<4x8xbf16>, vector<256x8xf32> -> vector<256x8xf32>
    %58 = arith.addf %52, %57 : vector<256x8xf32>
    %59 = vector.shape_cast %21 : vector<16x16x4xf32> to vector<256x4xf32>
    %60 = arith.truncf %59 : vector<256x4xf32> to vector<256x4xbf16>
    %c6 = arith.constant 6 : index
    %c0_29 = arith.constant 0 : index
    %c0_30 = arith.constant 0 : index
    %61 = vector.load %arg5[%c6, %c0_29, %c0_30] : memref<9x4x8xbf16, #tpu.memory_space<vmem>>, vector<1x4x8xbf16>
    %62 = vector.shape_cast %61 : vector<1x4x8xbf16> to vector<4x8xbf16>
    %cst_31 = arith.constant dense<0.000000e+00> : vector<256x8xf32>
    %63 = tpu.matmul %60, %62, %cst_31 {dimension_numbers = #tpu.dot_dimension_numbers<[1], [0], [0], [1], [0, 0, 1, 1], [], []>} : vector<256x4xbf16>, vector<4x8xbf16>, vector<256x8xf32> -> vector<256x8xf32>
    %64 = arith.addf %58, %63 : vector<256x8xf32>
    %65 = vector.shape_cast %22 : vector<16x16x4xf32> to vector<256x4xf32>
    %66 = arith.truncf %65 : vector<256x4xf32> to vector<256x4xbf16>
    %c7 = arith.constant 7 : index
    %c0_32 = arith.constant 0 : index
    %c0_33 = arith.constant 0 : index
    %67 = vector.load %arg5[%c7, %c0_32, %c0_33] : memref<9x4x8xbf16, #tpu.memory_space<vmem>>, vector<1x4x8xbf16>
    %68 = vector.shape_cast %67 : vector<1x4x8xbf16> to vector<4x8xbf16>
    %cst_34 = arith.constant dense<0.000000e+00> : vector<256x8xf32>
    %69 = tpu.matmul %66, %68, %cst_34 {dimension_numbers = #tpu.dot_dimension_numbers<[1], [0], [0], [1], [0, 0, 1, 1], [], []>} : vector<256x4xbf16>, vector<4x8xbf16>, vector<256x8xf32> -> vector<256x8xf32>
    %70 = arith.addf %64, %69 : vector<256x8xf32>
    %71 = vector.shape_cast %23 : vector<16x16x4xf32> to vector<256x4xf32>
    %72 = arith.truncf %71 : vector<256x4xf32> to vector<256x4xbf16>
    %c8 = arith.constant 8 : index
    %c0_35 = arith.constant 0 : index
    %c0_36 = arith.constant 0 : index
    %73 = vector.load %arg5[%c8, %c0_35, %c0_36] : memref<9x4x8xbf16, #tpu.memory_space<vmem>>, vector<1x4x8xbf16>
    %74 = vector.shape_cast %73 : vector<1x4x8xbf16> to vector<4x8xbf16>
    %cst_37 = arith.constant dense<0.000000e+00> : vector<256x8xf32>
    %75 = tpu.matmul %72, %74, %cst_37 {dimension_numbers = #tpu.dot_dimension_numbers<[1], [0], [0], [1], [0, 0, 1, 1], [], []>} : vector<256x4xbf16>, vector<4x8xbf16>, vector<256x8xf32> -> vector<256x8xf32>
    %76 = arith.addf %70, %75 : vector<256x8xf32>
    %c0_38 = arith.constant 0 : index
    %c0_39 = arith.constant 0 : index
    %c0_40 = arith.constant 0 : index
    %77 = vector.load %arg6[%c0_38, %c0_39, %c0_40] : memref<1x256x8xf32, #tpu.memory_space<vmem>>, vector<1x256x8xf32>
    %78 = vector.shape_cast %77 : vector<1x256x8xf32> to vector<256x8xf32>
    %79 = vector.shape_cast %76 : vector<256x8xf32> to vector<1x256x8xf32>
    tpu.vector_store %arg6[%c0_38, %c0_39, %c0_40], %79 {strides = array<i32>} : memref<1x256x8xf32, #tpu.memory_space<vmem>>, vector<1x256x8xf32>,
    return
  }
  func.func @transform_0(%arg0: i32) -> (i32, i32, i32, i32) {
    %c0_i32 = arith.constant 0 : i32
    %c0_i32_0 = arith.constant 0 : i32
    %c0_i32_1 = arith.constant 0 : i32
    %c0_i32_2 = arith.constant 0 : i32
    return %arg0, %c0_i32, %c0_i32_0, %c0_i32_1 : i32, i32, i32, i32
  }
  func.func @transform_1(%arg0: i32) -> (i32, i32, i32) {
    %c0_i32 = arith.constant 0 : i32
    %c0_i32_0 = arith.constant 0 : i32
    %c0_i32_1 = arith.constant 0 : i32
    %c0_i32_2 = arith.constant 0 : i32
    return %c0_i32, %c0_i32_0, %c0_i32_1 : i32, i32, i32
  }
  func.func @transform_2(%arg0: i32) -> (i32, i32) {
    %c0_i32 = arith.constant 0 : i32
    %c0_i32_0 = arith.constant 0 : i32
    %c0_i32_1 = arith.constant 0 : i32
    return %c0_i32, %c0_i32_0 : i32, i32
  }
  func.func @transform_3(%arg0: i32) -> (i32, i32) {
    %c0_i32 = arith.constant 0 : i32
    %c0_i32_0 = arith.constant 0 : i32
    %c0_i32_1 = arith.constant 0 : i32
    return %c0_i32, %c0_i32_0 : i32, i32
  }
  func.func @transform_4(%arg0: i32) -> (i32, i32, i32) {
    %c0_i32 = arith.constant 0 : i32
    %c0_i32_0 = arith.constant 0 : i32
    %c0_i32_1 = arith.constant 0 : i32
    %c0_i32_2 = arith.constant 0 : i32
    return %c0_i32, %c0_i32_0, %c0_i32_1 : i32, i32, i32
  }
  func.func @transform_5(%arg0: i32) -> (i32, i32, i32) {
    %c0_i32 = arith.constant 0 : i32
    %c0_i32_0 = arith.constant 0 : i32
    %c0_i32_1 = arith.constant 0 : i32
    return %arg0, %c0_i32, %c0_i32_0 : i32, i32, i32
  }
}

module attributes {stable_mosaic.version = 11 : i64} {
  func.func @_bn_stats_kernel(%arg0: i32, %arg1: memref<512x8xf32, #tpu.memory_space<vmem>>, %arg2: memref<1x8xf32, #tpu.memory_space<vmem>>, %arg3: memref<1x8xf32, #tpu.memory_space<vmem>>) attributes {dimension_semantics = [#tpu.dimension_semantics<arbitrary>], iteration_bounds = array<i64: 1>, scalar_prefetch = 0 : i64, scratch_operands = 0 : i64, tpu.core_type = #tpu.core_type<tc>, window_params = [{transform_indices = @transform_0, window_bounds = array<i64: 512, 8>}, {pipeline_mode = #tpu.pipeline_mode<synchronous>, transform_indices = @transform_1, window_bounds = array<i64: 1, 8>}, {pipeline_mode = #tpu.pipeline_mode<synchronous>, transform_indices = @transform_2, window_bounds = array<i64: 1, 8>}]} {
    %c0_i32 = arith.constant 0 : i32
    %0 = arith.cmpi eq, %arg0, %c0_i32 : i32
    %1 = arith.extui %0 : i1 to i32
    %c0_i32_0 = arith.constant 0 : i32
    %2 = arith.cmpi ne, %1, %c0_i32_0 : i32
    scf.if %2 {
      %cst_11 = arith.constant 0.000000e+00 : f32
      %15 = vector.broadcast %cst_11 : f32 to vector<1x8xf32>
      %c0_12 = arith.constant 0 : index
      %c0_13 = arith.constant 0 : index
      %16 = vector.load %arg2[%c0_12, %c0_13] : memref<1x8xf32, #tpu.memory_space<vmem>>, vector<1x8xf32>
      tpu.vector_store %arg2[%c0_12, %c0_13], %15 {strides = array<i32>} : memref<1x8xf32, #tpu.memory_space<vmem>>, vector<1x8xf32>,
      %cst_14 = arith.constant 0.000000e+00 : f32
      %17 = vector.broadcast %cst_14 : f32 to vector<1x8xf32>
      %c0_15 = arith.constant 0 : index
      %c0_16 = arith.constant 0 : index
      %18 = vector.load %arg3[%c0_15, %c0_16] : memref<1x8xf32, #tpu.memory_space<vmem>>, vector<1x8xf32>
      tpu.vector_store %arg3[%c0_15, %c0_16], %17 {strides = array<i32>} : memref<1x8xf32, #tpu.memory_space<vmem>>, vector<1x8xf32>,
    } else {
    }
    %c0 = arith.constant 0 : index
    %c0_1 = arith.constant 0 : index
    %3 = vector.load %arg1[%c0, %c0_1] : memref<512x8xf32, #tpu.memory_space<vmem>>, vector<512x8xf32>
    %c0_2 = arith.constant 0 : index
    %c0_3 = arith.constant 0 : index
    %4 = vector.load %arg2[%c0_2, %c0_3] : memref<1x8xf32, #tpu.memory_space<vmem>>, vector<1x8xf32>
    %cst = arith.constant dense<0.000000e+00> : vector<8xf32>
    %5 = vector.multi_reduction <add>, %3, %cst [0] : vector<512x8xf32> to vector<8xf32>
    %6 = vector.shape_cast %5 : vector<8xf32> to vector<1x8xf32>
    %7 = arith.addf %4, %6 : vector<1x8xf32>
    %c0_4 = arith.constant 0 : index
    %c0_5 = arith.constant 0 : index
    %8 = vector.load %arg2[%c0_4, %c0_5] : memref<1x8xf32, #tpu.memory_space<vmem>>, vector<1x8xf32>
    tpu.vector_store %arg2[%c0_4, %c0_5], %7 {strides = array<i32>} : memref<1x8xf32, #tpu.memory_space<vmem>>, vector<1x8xf32>,
    %c0_6 = arith.constant 0 : index
    %c0_7 = arith.constant 0 : index
    %9 = vector.load %arg3[%c0_6, %c0_7] : memref<1x8xf32, #tpu.memory_space<vmem>>, vector<1x8xf32>
    %10 = arith.mulf %3, %3 : vector<512x8xf32>
    %cst_8 = arith.constant dense<0.000000e+00> : vector<8xf32>
    %11 = vector.multi_reduction <add>, %10, %cst_8 [0] : vector<512x8xf32> to vector<8xf32>
    %12 = vector.shape_cast %11 : vector<8xf32> to vector<1x8xf32>
    %13 = arith.addf %9, %12 : vector<1x8xf32>
    %c0_9 = arith.constant 0 : index
    %c0_10 = arith.constant 0 : index
    %14 = vector.load %arg3[%c0_9, %c0_10] : memref<1x8xf32, #tpu.memory_space<vmem>>, vector<1x8xf32>
    tpu.vector_store %arg3[%c0_9, %c0_10], %13 {strides = array<i32>} : memref<1x8xf32, #tpu.memory_space<vmem>>, vector<1x8xf32>,
    return
  }
  func.func @transform_0(%arg0: i32) -> (i32, i32) {
    %c0_i32 = arith.constant 0 : i32
    %c0_i32_0 = arith.constant 0 : i32
    return %arg0, %c0_i32 : i32, i32
  }
  func.func @transform_1(%arg0: i32) -> (i32, i32) {
    %c0_i32 = arith.constant 0 : i32
    %c0_i32_0 = arith.constant 0 : i32
    %c0_i32_1 = arith.constant 0 : i32
    return %c0_i32, %c0_i32_0 : i32, i32
  }
  func.func @transform_2(%arg0: i32) -> (i32, i32) {
    %c0_i32 = arith.constant 0 : i32
    %c0_i32_0 = arith.constant 0 : i32
    %c0_i32_1 = arith.constant 0 : i32
    return %c0_i32, %c0_i32_0 : i32, i32
  }
}

module attributes {stable_mosaic.version = 11 : i64} {
  func.func @_bnrelu_conv_shortcut_kernel(%arg0: i32, %arg1: memref<1x18x18x8xf32, #tpu.memory_space<vmem>>, %arg2: memref<18x18x1xf32, #tpu.memory_space<vmem>>, %arg3: memref<1x8xf32, #tpu.memory_space<vmem>>, %arg4: memref<1x8xf32, #tpu.memory_space<vmem>>, %arg5: memref<9x8x8xbf16, #tpu.memory_space<vmem>>, %arg6: memref<1x256x4xf32, #tpu.memory_space<vmem>>, %arg7: memref<1x4xf32, #tpu.memory_space<vmem>>, %arg8: memref<1x4xf32, #tpu.memory_space<vmem>>, %arg9: memref<4x8xbf16, #tpu.memory_space<vmem>>, %arg10: memref<1x256x8xf32, #tpu.memory_space<vmem>>) attributes {dimension_semantics = [#tpu.dimension_semantics<parallel>], iteration_bounds = array<i64: 2>, scalar_prefetch = 0 : i64, scratch_operands = 0 : i64, tpu.core_type = #tpu.core_type<tc>, window_params = [{transform_indices = @transform_0, window_bounds = array<i64: 1, 18, 18, 8>}, {pipeline_mode = #tpu.pipeline_mode<synchronous>, transform_indices = @transform_1, window_bounds = array<i64: 18, 18, 1>}, {pipeline_mode = #tpu.pipeline_mode<synchronous>, transform_indices = @transform_2, window_bounds = array<i64: 1, 8>}, {pipeline_mode = #tpu.pipeline_mode<synchronous>, transform_indices = @transform_3, window_bounds = array<i64: 1, 8>}, {pipeline_mode = #tpu.pipeline_mode<synchronous>, transform_indices = @transform_4, window_bounds = array<i64: 9, 8, 8>}, {transform_indices = @transform_5, window_bounds = array<i64: 1, 256, 4>}, {pipeline_mode = #tpu.pipeline_mode<synchronous>, transform_indices = @transform_6, window_bounds = array<i64: 1, 4>}, {pipeline_mode = #tpu.pipeline_mode<synchronous>, transform_indices = @transform_7, window_bounds = array<i64: 1, 4>}, {pipeline_mode = #tpu.pipeline_mode<synchronous>, transform_indices = @transform_8, window_bounds = array<i64: 4, 8>}, {transform_indices = @transform_9, window_bounds = array<i64: 1, 256, 8>}]} {
    %c0 = arith.constant 0 : index
    %c0_0 = arith.constant 0 : index
    %c0_1 = arith.constant 0 : index
    %c0_2 = arith.constant 0 : index
    %0 = vector.load %arg1[%c0, %c0_0, %c0_1, %c0_2] : memref<1x18x18x8xf32, #tpu.memory_space<vmem>>, vector<1x18x18x8xf32>
    %1 = vector.shape_cast %0 : vector<1x18x18x8xf32> to vector<18x18x8xf32>
    %c0_3 = arith.constant 0 : index
    %c0_4 = arith.constant 0 : index
    %2 = vector.load %arg3[%c0_3, %c0_4] : memref<1x8xf32, #tpu.memory_space<vmem>>, vector<1x8xf32>
    %3 = vector.shape_cast %2 : vector<1x8xf32> to vector<1x1x8xf32>
    %4 = vector.broadcast %3 : vector<1x1x8xf32> to vector<18x18x8xf32>
    %5 = arith.mulf %1, %4 : vector<18x18x8xf32>
    %c0_5 = arith.constant 0 : index
    %c0_6 = arith.constant 0 : index
    %6 = vector.load %arg4[%c0_5, %c0_6] : memref<1x8xf32, #tpu.memory_space<vmem>>, vector<1x8xf32>
    %7 = vector.shape_cast %6 : vector<1x8xf32> to vector<1x1x8xf32>
    %8 = vector.broadcast %7 : vector<1x1x8xf32> to vector<18x18x8xf32>
    %9 = arith.addf %5, %8 : vector<18x18x8xf32>
    %cst = arith.constant 0.000000e+00 : f32
    %10 = vector.broadcast %cst : f32 to vector<18x18x8xf32>
    %11 = arith.maximumf %9, %10 : vector<18x18x8xf32>
    %c0_7 = arith.constant 0 : index
    %c0_8 = arith.constant 0 : index
    %c0_9 = arith.constant 0 : index
    %12 = vector.load %arg2[%c0_7, %c0_8, %c0_9] : memref<18x18x1xf32, #tpu.memory_space<vmem>>, vector<18x18x1xf32>
    %13 = vector.broadcast %12 : vector<18x18x1xf32> to vector<18x18x8xf32>
    %14 = arith.mulf %11, %13 : vector<18x18x8xf32>
    %15 = vector.extract_strided_slice %14 {offsets = [0, 0, 0], sizes = [16, 16, 8], strides = [1, 1, 1]} : vector<18x18x8xf32> to vector<16x16x8xf32>
    %16 = vector.extract_strided_slice %14 {offsets = [0, 1, 0], sizes = [16, 16, 8], strides = [1, 1, 1]} : vector<18x18x8xf32> to vector<16x16x8xf32>
    %17 = vector.extract_strided_slice %14 {offsets = [0, 2, 0], sizes = [16, 16, 8], strides = [1, 1, 1]} : vector<18x18x8xf32> to vector<16x16x8xf32>
    %18 = vector.extract_strided_slice %14 {offsets = [1, 0, 0], sizes = [16, 16, 8], strides = [1, 1, 1]} : vector<18x18x8xf32> to vector<16x16x8xf32>
    %19 = vector.extract_strided_slice %14 {offsets = [1, 1, 0], sizes = [16, 16, 8], strides = [1, 1, 1]} : vector<18x18x8xf32> to vector<16x16x8xf32>
    %20 = vector.extract_strided_slice %14 {offsets = [1, 2, 0], sizes = [16, 16, 8], strides = [1, 1, 1]} : vector<18x18x8xf32> to vector<16x16x8xf32>
    %21 = vector.extract_strided_slice %14 {offsets = [2, 0, 0], sizes = [16, 16, 8], strides = [1, 1, 1]} : vector<18x18x8xf32> to vector<16x16x8xf32>
    %22 = vector.extract_strided_slice %14 {offsets = [2, 1, 0], sizes = [16, 16, 8], strides = [1, 1, 1]} : vector<18x18x8xf32> to vector<16x16x8xf32>
    %23 = vector.extract_strided_slice %14 {offsets = [2, 2, 0], sizes = [16, 16, 8], strides = [1, 1, 1]} : vector<18x18x8xf32> to vector<16x16x8xf32>
    %24 = vector.shape_cast %15 : vector<16x16x8xf32> to vector<256x8xf32>
    %25 = arith.truncf %24 : vector<256x8xf32> to vector<256x8xbf16>
    %c0_10 = arith.constant 0 : index
    %c0_11 = arith.constant 0 : index
    %c0_12 = arith.constant 0 : index
    %26 = vector.load %arg5[%c0_10, %c0_11, %c0_12] : memref<9x8x8xbf16, #tpu.memory_space<vmem>>, vector<1x8x8xbf16>
    %27 = vector.shape_cast %26 : vector<1x8x8xbf16> to vector<8x8xbf16>
    %cst_13 = arith.constant dense<0.000000e+00> : vector<256x8xf32>
    %28 = tpu.matmul %25, %27, %cst_13 {dimension_numbers = #tpu.dot_dimension_numbers<[1], [0], [0], [1], [0, 0, 1, 1], [], []>} : vector<256x8xbf16>, vector<8x8xbf16>, vector<256x8xf32> -> vector<256x8xf32>
    %29 = vector.shape_cast %16 : vector<16x16x8xf32> to vector<256x8xf32>
    %30 = arith.truncf %29 : vector<256x8xf32> to vector<256x8xbf16>
    %c1 = arith.constant 1 : index
    %c0_14 = arith.constant 0 : index
    %c0_15 = arith.constant 0 : index
    %31 = vector.load %arg5[%c1, %c0_14, %c0_15] : memref<9x8x8xbf16, #tpu.memory_space<vmem>>, vector<1x8x8xbf16>
    %32 = vector.shape_cast %31 : vector<1x8x8xbf16> to vector<8x8xbf16>
    %cst_16 = arith.constant dense<0.000000e+00> : vector<256x8xf32>
    %33 = tpu.matmul %30, %32, %cst_16 {dimension_numbers = #tpu.dot_dimension_numbers<[1], [0], [0], [1], [0, 0, 1, 1], [], []>} : vector<256x8xbf16>, vector<8x8xbf16>, vector<256x8xf32> -> vector<256x8xf32>
    %34 = arith.addf %28, %33 : vector<256x8xf32>
    %35 = vector.shape_cast %17 : vector<16x16x8xf32> to vector<256x8xf32>
    %36 = arith.truncf %35 : vector<256x8xf32> to vector<256x8xbf16>
    %c2 = arith.constant 2 : index
    %c0_17 = arith.constant 0 : index
    %c0_18 = arith.constant 0 : index
    %37 = vector.load %arg5[%c2, %c0_17, %c0_18] : memref<9x8x8xbf16, #tpu.memory_space<vmem>>, vector<1x8x8xbf16>
    %38 = vector.shape_cast %37 : vector<1x8x8xbf16> to vector<8x8xbf16>
    %cst_19 = arith.constant dense<0.000000e+00> : vector<256x8xf32>
    %39 = tpu.matmul %36, %38, %cst_19 {dimension_numbers = #tpu.dot_dimension_numbers<[1], [0], [0], [1], [0, 0, 1, 1], [], []>} : vector<256x8xbf16>, vector<8x8xbf16>, vector<256x8xf32> -> vector<256x8xf32>
    %40 = arith.addf %34, %39 : vector<256x8xf32>
    %41 = vector.shape_cast %18 : vector<16x16x8xf32> to vector<256x8xf32>
    %42 = arith.truncf %41 : vector<256x8xf32> to vector<256x8xbf16>
    %c3 = arith.constant 3 : index
    %c0_20 = arith.constant 0 : index
    %c0_21 = arith.constant 0 : index
    %43 = vector.load %arg5[%c3, %c0_20, %c0_21] : memref<9x8x8xbf16, #tpu.memory_space<vmem>>, vector<1x8x8xbf16>
    %44 = vector.shape_cast %43 : vector<1x8x8xbf16> to vector<8x8xbf16>
    %cst_22 = arith.constant dense<0.000000e+00> : vector<256x8xf32>
    %45 = tpu.matmul %42, %44, %cst_22 {dimension_numbers = #tpu.dot_dimension_numbers<[1], [0], [0], [1], [0, 0, 1, 1], [], []>} : vector<256x8xbf16>, vector<8x8xbf16>, vector<256x8xf32> -> vector<256x8xf32>
    %46 = arith.addf %40, %45 : vector<256x8xf32>
    %47 = vector.shape_cast %19 : vector<16x16x8xf32> to vector<256x8xf32>
    %48 = arith.truncf %47 : vector<256x8xf32> to vector<256x8xbf16>
    %c4 = arith.constant 4 : index
    %c0_23 = arith.constant 0 : index
    %c0_24 = arith.constant 0 : index
    %49 = vector.load %arg5[%c4, %c0_23, %c0_24] : memref<9x8x8xbf16, #tpu.memory_space<vmem>>, vector<1x8x8xbf16>
    %50 = vector.shape_cast %49 : vector<1x8x8xbf16> to vector<8x8xbf16>
    %cst_25 = arith.constant dense<0.000000e+00> : vector<256x8xf32>
    %51 = tpu.matmul %48, %50, %cst_25 {dimension_numbers = #tpu.dot_dimension_numbers<[1], [0], [0], [1], [0, 0, 1, 1], [], []>} : vector<256x8xbf16>, vector<8x8xbf16>, vector<256x8xf32> -> vector<256x8xf32>
    %52 = arith.addf %46, %51 : vector<256x8xf32>
    %53 = vector.shape_cast %20 : vector<16x16x8xf32> to vector<256x8xf32>
    %54 = arith.truncf %53 : vector<256x8xf32> to vector<256x8xbf16>
    %c5 = arith.constant 5 : index
    %c0_26 = arith.constant 0 : index
    %c0_27 = arith.constant 0 : index
    %55 = vector.load %arg5[%c5, %c0_26, %c0_27] : memref<9x8x8xbf16, #tpu.memory_space<vmem>>, vector<1x8x8xbf16>
    %56 = vector.shape_cast %55 : vector<1x8x8xbf16> to vector<8x8xbf16>
    %cst_28 = arith.constant dense<0.000000e+00> : vector<256x8xf32>
    %57 = tpu.matmul %54, %56, %cst_28 {dimension_numbers = #tpu.dot_dimension_numbers<[1], [0], [0], [1], [0, 0, 1, 1], [], []>} : vector<256x8xbf16>, vector<8x8xbf16>, vector<256x8xf32> -> vector<256x8xf32>
    %58 = arith.addf %52, %57 : vector<256x8xf32>
    %59 = vector.shape_cast %21 : vector<16x16x8xf32> to vector<256x8xf32>
    %60 = arith.truncf %59 : vector<256x8xf32> to vector<256x8xbf16>
    %c6 = arith.constant 6 : index
    %c0_29 = arith.constant 0 : index
    %c0_30 = arith.constant 0 : index
    %61 = vector.load %arg5[%c6, %c0_29, %c0_30] : memref<9x8x8xbf16, #tpu.memory_space<vmem>>, vector<1x8x8xbf16>
    %62 = vector.shape_cast %61 : vector<1x8x8xbf16> to vector<8x8xbf16>
    %cst_31 = arith.constant dense<0.000000e+00> : vector<256x8xf32>
    %63 = tpu.matmul %60, %62, %cst_31 {dimension_numbers = #tpu.dot_dimension_numbers<[1], [0], [0], [1], [0, 0, 1, 1], [], []>} : vector<256x8xbf16>, vector<8x8xbf16>, vector<256x8xf32> -> vector<256x8xf32>
    %64 = arith.addf %58, %63 : vector<256x8xf32>
    %65 = vector.shape_cast %22 : vector<16x16x8xf32> to vector<256x8xf32>
    %66 = arith.truncf %65 : vector<256x8xf32> to vector<256x8xbf16>
    %c7 = arith.constant 7 : index
    %c0_32 = arith.constant 0 : index
    %c0_33 = arith.constant 0 : index
    %67 = vector.load %arg5[%c7, %c0_32, %c0_33] : memref<9x8x8xbf16, #tpu.memory_space<vmem>>, vector<1x8x8xbf16>
    %68 = vector.shape_cast %67 : vector<1x8x8xbf16> to vector<8x8xbf16>
    %cst_34 = arith.constant dense<0.000000e+00> : vector<256x8xf32>
    %69 = tpu.matmul %66, %68, %cst_34 {dimension_numbers = #tpu.dot_dimension_numbers<[1], [0], [0], [1], [0, 0, 1, 1], [], []>} : vector<256x8xbf16>, vector<8x8xbf16>, vector<256x8xf32> -> vector<256x8xf32>
    %70 = arith.addf %64, %69 : vector<256x8xf32>
    %71 = vector.shape_cast %23 : vector<16x16x8xf32> to vector<256x8xf32>
    %72 = arith.truncf %71 : vector<256x8xf32> to vector<256x8xbf16>
    %c8 = arith.constant 8 : index
    %c0_35 = arith.constant 0 : index
    %c0_36 = arith.constant 0 : index
    %73 = vector.load %arg5[%c8, %c0_35, %c0_36] : memref<9x8x8xbf16, #tpu.memory_space<vmem>>, vector<1x8x8xbf16>
    %74 = vector.shape_cast %73 : vector<1x8x8xbf16> to vector<8x8xbf16>
    %cst_37 = arith.constant dense<0.000000e+00> : vector<256x8xf32>
    %75 = tpu.matmul %72, %74, %cst_37 {dimension_numbers = #tpu.dot_dimension_numbers<[1], [0], [0], [1], [0, 0, 1, 1], [], []>} : vector<256x8xbf16>, vector<8x8xbf16>, vector<256x8xf32> -> vector<256x8xf32>
    %76 = arith.addf %70, %75 : vector<256x8xf32>
    %c0_38 = arith.constant 0 : index
    %c0_39 = arith.constant 0 : index
    %c0_40 = arith.constant 0 : index
    %77 = vector.load %arg6[%c0_38, %c0_39, %c0_40] : memref<1x256x4xf32, #tpu.memory_space<vmem>>, vector<1x256x4xf32>
    %78 = vector.shape_cast %77 : vector<1x256x4xf32> to vector<256x4xf32>
    %c0_41 = arith.constant 0 : index
    %c0_42 = arith.constant 0 : index
    %79 = vector.load %arg7[%c0_41, %c0_42] : memref<1x4xf32, #tpu.memory_space<vmem>>, vector<1x4xf32>
    %80 = vector.broadcast %79 : vector<1x4xf32> to vector<256x4xf32>
    %81 = arith.mulf %78, %80 : vector<256x4xf32>
    %c0_43 = arith.constant 0 : index
    %c0_44 = arith.constant 0 : index
    %82 = vector.load %arg8[%c0_43, %c0_44] : memref<1x4xf32, #tpu.memory_space<vmem>>, vector<1x4xf32>
    %83 = vector.broadcast %82 : vector<1x4xf32> to vector<256x4xf32>
    %84 = arith.addf %81, %83 : vector<256x4xf32>
    %cst_45 = arith.constant 0.000000e+00 : f32
    %85 = vector.broadcast %cst_45 : f32 to vector<256x4xf32>
    %86 = arith.maximumf %84, %85 : vector<256x4xf32>
    %87 = arith.truncf %86 : vector<256x4xf32> to vector<256x4xbf16>
    %c0_46 = arith.constant 0 : index
    %c0_47 = arith.constant 0 : index
    %88 = vector.load %arg9[%c0_46, %c0_47] : memref<4x8xbf16, #tpu.memory_space<vmem>>, vector<4x8xbf16>
    %cst_48 = arith.constant dense<0.000000e+00> : vector<256x8xf32>
    %89 = tpu.matmul %87, %88, %cst_48 {dimension_numbers = #tpu.dot_dimension_numbers<[1], [0], [0], [1], [0, 0, 1, 1], [], []>} : vector<256x4xbf16>, vector<4x8xbf16>, vector<256x8xf32> -> vector<256x8xf32>
    %90 = arith.addf %76, %89 : vector<256x8xf32>
    %c0_49 = arith.constant 0 : index
    %c0_50 = arith.constant 0 : index
    %c0_51 = arith.constant 0 : index
    %91 = vector.load %arg10[%c0_49, %c0_50, %c0_51] : memref<1x256x8xf32, #tpu.memory_space<vmem>>, vector<1x256x8xf32>
    %92 = vector.shape_cast %91 : vector<1x256x8xf32> to vector<256x8xf32>
    %93 = vector.shape_cast %90 : vector<256x8xf32> to vector<1x256x8xf32>
    tpu.vector_store %arg10[%c0_49, %c0_50, %c0_51], %93 {strides = array<i32>} : memref<1x256x8xf32, #tpu.memory_space<vmem>>, vector<1x256x8xf32>,
    return
  }
  func.func @transform_0(%arg0: i32) -> (i32, i32, i32, i32) {
    %c0_i32 = arith.constant 0 : i32
    %c0_i32_0 = arith.constant 0 : i32
    %c0_i32_1 = arith.constant 0 : i32
    %c0_i32_2 = arith.constant 0 : i32
    return %arg0, %c0_i32, %c0_i32_0, %c0_i32_1 : i32, i32, i32, i32
  }
  func.func @transform_1(%arg0: i32) -> (i32, i32, i32) {
    %c0_i32 = arith.constant 0 : i32
    %c0_i32_0 = arith.constant 0 : i32
    %c0_i32_1 = arith.constant 0 : i32
    %c0_i32_2 = arith.constant 0 : i32
    return %c0_i32, %c0_i32_0, %c0_i32_1 : i32, i32, i32
  }
  func.func @transform_2(%arg0: i32) -> (i32, i32) {
    %c0_i32 = arith.constant 0 : i32
    %c0_i32_0 = arith.constant 0 : i32
    %c0_i32_1 = arith.constant 0 : i32
    return %c0_i32, %c0_i32_0 : i32, i32
  }
  func.func @transform_3(%arg0: i32) -> (i32, i32) {
    %c0_i32 = arith.constant 0 : i32
    %c0_i32_0 = arith.constant 0 : i32
    %c0_i32_1 = arith.constant 0 : i32
    return %c0_i32, %c0_i32_0 : i32, i32
  }
  func.func @transform_4(%arg0: i32) -> (i32, i32, i32) {
    %c0_i32 = arith.constant 0 : i32
    %c0_i32_0 = arith.constant 0 : i32
    %c0_i32_1 = arith.constant 0 : i32
    %c0_i32_2 = arith.constant 0 : i32
    return %c0_i32, %c0_i32_0, %c0_i32_1 : i32, i32, i32
  }
  func.func @transform_5(%arg0: i32) -> (i32, i32, i32) {
    %c0_i32 = arith.constant 0 : i32
    %c0_i32_0 = arith.constant 0 : i32
    %c0_i32_1 = arith.constant 0 : i32
    return %arg0, %c0_i32, %c0_i32_0 : i32, i32, i32
  }
  func.func @transform_6(%arg0: i32) -> (i32, i32) {
    %c0_i32 = arith.constant 0 : i32
    %c0_i32_0 = arith.constant 0 : i32
    %c0_i32_1 = arith.constant 0 : i32
    return %c0_i32, %c0_i32_0 : i32, i32
  }
  func.func @transform_7(%arg0: i32) -> (i32, i32) {
    %c0_i32 = arith.constant 0 : i32
    %c0_i32_0 = arith.constant 0 : i32
    %c0_i32_1 = arith.constant 0 : i32
    return %c0_i32, %c0_i32_0 : i32, i32
  }
  func.func @transform_8(%arg0: i32) -> (i32, i32) {
    %c0_i32 = arith.constant 0 : i32
    %c0_i32_0 = arith.constant 0 : i32
    %c0_i32_1 = arith.constant 0 : i32
    return %c0_i32, %c0_i32_0 : i32, i32
  }
  func.func @transform_9(%arg0: i32) -> (i32, i32, i32) {
    %c0_i32 = arith.constant 0 : i32
    %c0_i32_0 = arith.constant 0 : i32
    %c0_i32_1 = arith.constant 0 : i32
    return %arg0, %c0_i32, %c0_i32_0 : i32, i32, i32
  }
}

</mosaic_0001>

<bundles_post_ra>
// kernel: basic_block_forward.4
= control target key start
LH: loop header
LB: loop body
LE: loop exit
PB: predicated region body
PF: predicated region fallthrough
CT: control target
= control target key end

     0   :  { %vm14_vm0 = vcmask 24576   ;;  %vm82_vm1 = vcmask 31744   ;;  %v428_v0 = vmov 0.0   ;;  %s1318_s0 = inlined_call_operand.vmem [shape: f32[512,4], index: 0, kind: input, shape index: {}]   ;;  %s1319_s1 = inlined_call_operand.vmem [shape: f32[1,4], index: 1, kind: output, shape index: {0}]   ;;  %s1320_s2 = inlined_call_operand.vmem [shape: f32[1,4], index: 2, kind: output, shape index: {1}]  }
   0x1   :  { %15 = vst.msk [vmem:[%s1319_s1] sm:$0x1] %vm14_vm0, %v428_v0  ;;  %16 = vst.msk [vmem:[%s1320_s2] sm:$0x1] %vm14_vm0, %v428_v0  ;;  %v455_v1 = vld [vmem:[%s1318_s0] sm:$0xff]  ;;  %v460_v2 = vld [vmem:[%s1318_s0 + $0x8] sm:$0xff] }
   0x2   :  { %v465_v3 = vld [vmem:[%s1318_s0 + $0x10] sm:$0xff]  ;;  %v83_v4 = vsel %vm82_vm1, %v455_v1, 0.0  ;;  %v84_v5 = vsel %vm82_vm1, %v460_v2, 0.0  ;;  %v476_v7 = vld [vmem:[%s1318_s0 + $0x18] sm:$0xff]  ;;  %v483_v10 = vld [vmem:[%s1318_s0 + $0x20] sm:$0xff] }
   0x3   :  { %v86_v6 = vsel %vm82_vm1, %v465_v3, 0.0  ;;  %v85_v8 = vadd.f32 %v84_v5, %v83_v4  ;;  %v88_v9 = vsel %vm82_vm1, %v476_v7, 0.0  ;;  %v90_v12 = vsel %vm82_vm1, %v483_v10, 0.0  ;;  %v490_v13 = vld [vmem:[%s1318_s0 + $0x28] sm:$0xff]  ;;  %v497_v16 = vld [vmem:[%s1318_s0 + $0x30] sm:$0xff]  ;;  %v502_v18 = vld [vmem:[%s1318_s0 + $0x38] sm:$0xff] }
   0x4   :  { %v92_v15 = vsel %vm82_vm1, %v490_v13, 0.0  ;;  %v507_v19 = vld [vmem:[%s1318_s0 + $0x40] sm:$0xff]  ;;  %v94_v20 = vsel %vm82_vm1, %v497_v16, 0.0  ;;  %v514_v21 = vld [vmem:[%s1318_s0 + $0x48] sm:$0xff]  ;;  %v519_v22 = vld [vmem:[%s1318_s0 + $0x50] sm:$0xff]  ;;  %v96_v25 = vsel %vm82_vm1, %v502_v18, 0.0 }
   0x5   :  { %v87_v11 = vadd.f32 %v86_v6, %v85_v8  ;;  %v524_v23 = vld [vmem:[%s1318_s0 + $0x58] sm:$0xff]  ;;  %v98_v26 = vsel %vm82_vm1, %v507_v19, 0.0  ;;  %v533_v27 = vld [vmem:[%s1318_s0 + $0x108] sm:$0xff]  ;;  %v538_v28 = vld [vmem:[%s1318_s0 + $0x110] sm:$0xff]  ;;  %v100_v30 = vsel %vm82_vm1, %v514_v21, 0.0  ;;  %v102_v31 = vsel %vm82_vm1, %v519_v22, 0.0 }
   0x6   :  { %v543_v29 = vld [vmem:[%s1318_s0 + $0x118] sm:$0xff]  ;;  %v551_v32 = vsel %vm82_vm1, %v524_v23, 0.0  ;;  %v556_v33 = vld [vmem:[%s1318_s0 + $0x120] sm:$0xff]  ;;  %v561_v34 = vld [vmem:[%s1318_s0 + $0x128] sm:$0xff]  ;;  %v570_v37 = vsel %vm82_vm1, %v533_v27, 0.0  ;;  %v574_v38 = vsel %vm82_vm1, %v538_v28, 0.0 }
   0x7   :  { %v89_v14 = vadd.f32 %v88_v9, %v87_v11  ;;  %v566_v35 = vld [vmem:[%s1318_s0 + $0x130] sm:$0xff]  ;;  %1339 = vst [vmem:[#allocation2_spill] sm:$0xff] %v570_v37  ;;  %1340 = vst [vmem:[#allocation3_spill] sm:$0xff] %v574_v38  ;;  %v578_v39 = vsel %vm82_vm1, %v543_v29, 0.0  ;;  %v583_v40 = vld [vmem:[%s1318_s0 + $0x138] sm:$0xff]  ;;  %v597_v43 = vsel %vm82_vm1, %v556_v33, 0.0  ;;  %v222_v37 = vmul.f32 %v465_v3, %v465_v3 }
   0x8   :  { %1341 = vst [vmem:[#allocation4_spill] sm:$0xff] %v578_v39  ;;  %v588_v41 = vld [vmem:[%s1318_s0 + $0x140] sm:$0xff]  ;;  %v593_v42 = vld [vmem:[%s1318_s0 + $0x148] sm:$0xff]  ;;  %1342 = vst [vmem:[#allocation5_spill] sm:$0xff] %v597_v43  ;;  %v601_v44 = vsel %vm82_vm1, %v561_v34, 0.0  ;;  %v605_v45 = vsel %vm82_vm1, %v566_v35, 0.0 }
   0x9   :  { %v91_v17 = vadd.f32 %v90_v12, %v89_v14  ;;  %1343 = vst [vmem:[#allocation6_spill] sm:$0xff] %v601_v44  ;;  %1344 = vst [vmem:[#allocation7_spill] sm:$0xff] %v605_v45  ;;  %v610_v46 = vld [vmem:[%s1318_s0 + $0x150] sm:$0xff]  ;;  %v615_v47 = vld [vmem:[%s1318_s0 + $0x158] sm:$0xff]  ;;  %v624_v50 = vsel %vm82_vm1, %v583_v40, 0.0  ;;  %v628_v51 = vsel %vm82_vm1, %v588_v41, 0.0 }
   0xa   :  { %v620_v48 = vld [vmem:[%s1318_s0 + $0x160] sm:$0xff]  ;;  %1345 = vst [vmem:[#allocation8_spill] sm:$0xff] %v624_v50  ;;  %1346 = vst [vmem:[#allocation9_spill] sm:$0xff] %v628_v51  ;;  %v632_v52 = vsel %vm82_vm1, %v593_v42, 0.0  ;;  %v637_v53 = vld [vmem:[%s1318_s0 + $0x168] sm:$0xff]  ;;  %v651_v56 = vsel %vm82_vm1, %v610_v46, 0.0 }
   0xb   :  { %v93_v24 = vadd.f32 %v92_v15, %v91_v17  ;;  %1347 = vst [vmem:[#allocation10_spill] sm:$0xff] %v632_v52  ;;  %v642_v54 = vld [vmem:[%s1318_s0 + $0x170] sm:$0xff]  ;;  %v647_v55 = vld [vmem:[%s1318_s0 + $0x178] sm:$0xff]  ;;  %1348 = vst [vmem:[#allocation11_spill] sm:$0xff] %v651_v56  ;;  %v655_v57 = vsel %vm82_vm1, %v615_v47, 0.0  ;;  %v659_v58 = vsel %vm82_vm1, %v620_v48, 0.0 }
   0xc   :  { %1349 = vst [vmem:[#allocation12_spill] sm:$0xff] %v655_v57  ;;  %1350 = vst [vmem:[#allocation13_spill] sm:$0xff] %v659_v58  ;;  %v664_v59 = vld [vmem:[%s1318_s0 + $0x180] sm:$0xff]  ;;  %v669_v60 = vld [vmem:[%s1318_s0 + $0x188] sm:$0xff]  ;;  %v678_v63 = vsel %vm82_vm1, %v637_v53, 0.0  ;;  %v682_v0 = vsel %vm82_vm1, %v642_v54, 0.0 }
   0xd   :  { %v95_v36 = vadd.f32 %v94_v20, %v93_v24  ;;  %v674_v61 = vld [vmem:[%s1318_s0 + $0x190] sm:$0xff]  ;;  %1351 = vst [vmem:[#allocation14_spill] sm:$0xff] %v678_v63  ;;  %1352 = vst [vmem:[#allocation15_spill] sm:$0xff] %v682_v0  ;;  %v686_v4 = vsel %vm82_vm1, %v647_v55, 0.0  ;;  %v691_v5 = vld [vmem:[%s1318_s0 + $0x198] sm:$0xff]  ;;  %v705_v9 = vsel %vm82_vm1, %v664_v59, 0.0 }
   0xe   :  { %1353 = vst [vmem:[#allocation16_spill] sm:$0xff] %v686_v4  ;;  %v696_v6 = vld [vmem:[%s1318_s0 + $0x1a0] sm:$0xff]  ;;  %v701_v8 = vld [vmem:[%s1318_s0 + $0x1a8] sm:$0xff]  ;;  %1354 = vst [vmem:[#allocation17_spill] sm:$0xff] %v705_v9  ;;  %v709_v11 = vsel %vm82_vm1, %v669_v60, 0.0  ;;  %v713_v12 = vsel %vm82_vm1, %v674_v61, 0.0 }
   0xf   :  { %v97_v49 = vadd.f32 %v96_v25, %v95_v36  ;;  %1355 = vst [vmem:[#allocation18_spill] sm:$0xff] %v709_v11  ;;  %1356 = vst [vmem:[#allocation19_spill] sm:$0xff] %v713_v12  ;;  %v718_v14 = vld [vmem:[%s1318_s0 + $0x60] sm:$0xff]  ;;  %v723_v15 = vld [vmem:[%s1318_s0 + $0x1b0] sm:$0xff]  ;;  %v737_v25 = vsel %vm82_vm1, %v691_v5, 0.0  ;;  %v745_v36 = vsel %vm82_vm1, %v701_v8, 0.0 }
  0x10   :  { %v728_v17 = vld [vmem:[%s1318_s0 + $0x1b8] sm:$0xff]  ;;  %v733_v20 = vld [vmem:[%s1318_s0 + $0x1c0] sm:$0xff]  ;;  %1357 = vst [vmem:[#allocation20_spill] sm:$0xff] %v737_v25  ;;  %1359 = vst [vmem:[#allocation22_spill] sm:$0xff] %v745_v36 }
  0x11   :  { %v99_v62 = vadd.f32 %v98_v26, %v97_v49  ;;  %v741_v26 = vsel %vm82_vm1, %v696_v6, 0.0  ;;  %v750_v49 = vld [vmem:[%s1318_s0 + $0x1c8] sm:$0xff]  ;;  %v768_v36 = vsel %vm82_vm1, %v728_v17, 0.0  ;;  %v772_v25 = vsel %vm82_vm1, %v733_v20, 0.0  ;;  %v777_v12 = vld [vmem:[%s1318_s0 + $0x1e0] sm:$0xff]  ;;  %v804_v0 = vld [vmem:[%s1318_s0 + $0x1f8] sm:$0xff] }
  0x12   :  { %1358 = vst [vmem:[#allocation21_spill] sm:$0xff] %v741_v26  ;;  %v764_v26 = vsel %vm82_vm1, %v723_v15, 0.0  ;;  %1361 = vst [vmem:[#allocation24_spill] sm:$0xff] %v768_v36  ;;  %v782_v11 = vld [vmem:[%s1318_s0 + $0x1e8] sm:$0xff]  ;;  %v791_v9 = vsel %vm82_vm1, %v750_v49, 0.0  ;;  %v826_v58 = vsel %vm82_vm1, %v804_v0, 0.0 }
  0x13   :  { %v101_v24 = vadd.f32 %v100_v30, %v99_v62  ;;  %v755_v30 = vld [vmem:[%s1318_s0 + $0x1d0] sm:$0xff]  ;;  %v760_v62 = vld [vmem:[%s1318_s0 + $0x1d8] sm:$0xff]  ;;  %1360 = vst [vmem:[#allocation23_spill] sm:$0xff] %v764_v26  ;;  %1362 = vst [vmem:[#allocation25_spill] sm:$0xff] %v772_v25 }
  0x14   :  { %v787_v26 = vld [vmem:[%s1318_s0 + $0x1f0] sm:$0xff]  ;;  %1364 = vst [vmem:[#allocation27_spill] sm:$0xff] %v791_v9  ;;  %v795_v25 = vsel %vm82_vm1, %v755_v30, 0.0  ;;  %v799_v4 = vsel %vm82_vm1, %v760_v62, 0.0  ;;  %1367 = vst [vmem:[#allocation30_spill] sm:$0xff] %v804_v0  ;;  %v814_v9 = vsel %vm82_vm1, %v782_v11, 0.0 }
  0x15   :  { %1363 = vst [vmem:[#allocation26_spill] sm:$0xff] %v787_v26  ;;  %v103_v36 = vadd.f32 %v102_v31, %v101_v24  ;;  %1365 = vst [vmem:[#allocation28_spill] sm:$0xff] %v795_v25  ;;  %v106_v31 = vsel %vm82_vm1, %v718_v14, 0.0  ;;  %v810_v24 = vsel %vm82_vm1, %v777_v12, 0.0  ;;  %v818_v25 = vsel %vm82_vm1, %v787_v26, 0.0  ;;  %v855_v56 = vld [vmem:[%s1318_s0 + $0x90] sm:$0xff] }
  0x16   :  { %1366 = vst [vmem:[#allocation29_spill] sm:$0xff] %v799_v4  ;;  %1368 = vst [vmem:[#allocation31_spill] sm:$0xff] %v810_v24  ;;  %v30_v4 = vld [vmem:[%s1318_s0 + $0x68] sm:$0xff]  ;;  %v860_v52 = vld [vmem:[%s1318_s0 + $0x98] sm:$0xff] }
  0x17   :  { %1369 = vst [vmem:[#allocation32_spill] sm:$0xff] %v814_v9  ;;  %1370 = vst [vmem:[#allocation33_spill] sm:$0xff] %v818_v25  ;;  %v105_v63 = vadd.f32 %v551_v32, %v103_v36  ;;  %v108_v24 = vsel %vm82_vm1, %v30_v4, 0.0  ;;  %v31_v9 = vld [vmem:[%s1318_s0 + $0x70] sm:$0xff]  ;;  %v835_v25 = vld [vmem:[%s1318_s0 + $0x78] sm:$0xff]  ;;  %v120_v39 = vsel %vm82_vm1, %v860_v52, 0.0 }
  0x18   :  { %1371 = vst [vmem:[#allocation34_spill] sm:$0xff] %v826_v58  ;;  %1372 = vst [vmem:[#allocation35_spill] sm:$0xff] %v835_v25  ;;  %v840_v32 = vld [vmem:[%s1318_s0 + $0x80] sm:$0xff]  ;;  %v845_v36 = vld [vmem:[%s1318_s0 + $0x88] sm:$0xff]  ;;  %v110_v58 = vsel %vm82_vm1, %v31_v9, 0.0 }
  0x19   :  { %v107_v57 = vadd.f32 %v106_v31, %v105_v63  ;;  %1373 = vst [vmem:[#allocation36_spill] sm:$0xff] %v840_v32  ;;  %1374 = vst [vmem:[#allocation37_spill] sm:$0xff] %v845_v36  ;;  %v220_v63 = vmul.f32 %v455_v1, %v455_v1  ;;  %v221_v31 = vmul.f32 %v460_v2, %v460_v2  ;;  %v865_v51 = vld [vmem:[%s1318_s0 + $0xa0] sm:$0xff]  ;;  %v112_v1 = vsel %vm82_vm1, %v835_v25, 0.0  ;;  %v876_v44 = vld [vmem:[%s1318_s0 + $0xa8] sm:$0xff] }
  0x1a   :  { %1375 = vst [vmem:[#allocation38_spill] sm:$0xff] %v855_v56  ;;  %1376 = vst [vmem:[#allocation39_spill] sm:$0xff] %v860_v52  ;;  %v114_v2 = vsel %vm82_vm1, %v840_v32, 0.0  ;;  %v116_v45 = vsel %vm82_vm1, %v845_v36, 0.0  ;;  %v881_v43 = vld [vmem:[%s1318_s0 + $0xb0] sm:$0xff]  ;;  %v122_v38 = vsel %vm82_vm1, %v865_v51, 0.0  ;;  %v223_v25 = vmul.f32 %v476_v7, %v476_v7 }
  0x1b   :  { %1377 = vst [vmem:[#allocation40_spill] sm:$0xff] %v865_v51  ;;  %v109_v50 = vadd.f32 %v108_v24, %v107_v57  ;;  %1378 = vst [vmem:[#allocation41_spill] sm:$0xff] %v876_v44  ;;  %v886_v57 = vld [vmem:[%s1318_s0 + $0xb8] sm:$0xff]  ;;  %v118_v24 = vsel %vm82_vm1, %v855_v56, 0.0  ;;  %v899_v36 = vld [vmem:[%s1318_s0 + $0xc0] sm:$0xff]  ;;  %v124_v51 = vsel %vm82_vm1, %v876_v44, 0.0 }
  0x1c   :  { %1379 = vst [vmem:[#allocation42_spill] sm:$0xff] %v881_v43  ;;  %1380 = vst [vmem:[#allocation43_spill] sm:$0xff] %v886_v57  ;;  %v904_v32 = vld [vmem:[%s1318_s0 + $0xc8] sm:$0xff]  ;;  %v909_v52 = vld [vmem:[%s1318_s0 + $0xd0] sm:$0xff]  ;;  %v915_v3 = vsel %vm82_vm1, %v881_v43, 0.0 }
  0x1d   :  { %1381 = vst [vmem:[#allocation44_spill] sm:$0xff] %v899_v36  ;;  %1382 = vst [vmem:[#allocation45_spill] sm:$0xff] %v904_v32  ;;  %v111_v56 = vadd.f32 %v110_v58, %v109_v50  ;;  %v922_v0 = vld [vmem:[%s1318_s0 + $0xd8] sm:$0xff]  ;;  %v927_v26 = vld [vmem:[%s1318_s0 + $0xe0] sm:$0xff]  ;;  %v931_v50 = vsel %vm82_vm1, %v886_v57, 0.0  ;;  %v935_v58 = vsel %vm82_vm1, %v899_v36, 0.0 }
  0x1e   :  { %1383 = vst [vmem:[#allocation46_spill] sm:$0xff] %v909_v52  ;;  %1384 = vst [vmem:[#allocation47_spill] sm:$0xff] %v922_v0  ;;  %v939_v7 = vsel %vm82_vm1, %v904_v32, 0.0  ;;  %v943_v43 = vsel %vm82_vm1, %v909_v52, 0.0  ;;  %v948_v44 = vld [vmem:[%s1318_s0 + $0xe8] sm:$0xff]  ;;  %v953_v57 = vld [vmem:[%s1318_s0 + $0xf0] sm:$0xff]  ;;  %v224_v52 = vmul.f32 %v483_v10, %v483_v10  ;;  %v228_v10 = vmul.f32 %v507_v19, %v507_v19 }
  0x1f   :  { %1385 = vst [vmem:[#allocation48_spill] sm:$0xff] %v927_v26  ;;  %1386 = vst [vmem:[#allocation49_spill] sm:$0xff] %v935_v58  ;;  %v113_v36 = vadd.f32 %v112_v1, %v111_v56  ;;  %v957_v58 = vsel %vm82_vm1, %v922_v0, 0.0  ;;  %v961_v32 = vsel %vm82_vm1, %v927_v26, 0.0  ;;  %v225_v56 = vmul.f32 %v490_v13, %v490_v13 }
  0x20   :  { %1387 = vst [vmem:[#allocation50_spill] sm:$0xff] %v939_v7  ;;  %1388 = vst [vmem:[#allocation51_spill] sm:$0xff] %v943_v43  ;;  %v967_v43 = vsel %vm82_vm1, %v948_v44, 0.0  ;;  %v971_v7 = vsel %vm82_vm1, %v953_v57, 0.0  ;;  %v226_v1 = vmul.f32 %v497_v16, %v497_v16  ;;  %v227_v26 = vmul.f32 %v502_v18, %v502_v18 }
  0x21   :  { %1389 = vst [vmem:[#allocation52_spill] sm:$0xff] %v948_v44  ;;  %1390 = vst [vmem:[#allocation53_spill] sm:$0xff] %v953_v57  ;;  %v115_v0 = vadd.f32 %v114_v2, %v113_v36  ;;  %v229_v44 = vmul.f32 %v514_v21, %v514_v21  ;;  %v230_v57 = vmul.f32 %v519_v22, %v519_v22 }
  0x22   :  { %1391 = vst [vmem:[#allocation54_spill] sm:$0xff] %v971_v7  ;;  %v231_v7 = vmul.f32 %v524_v23, %v524_v23  ;;  %v232_v13 = vmul.f32 %v718_v14, %v718_v14  ;;  %v989_v16 = vmul.f32 %v30_v4, %v30_v4  ;;  %v991_v2 = vmul.f32 %v31_v9, %v31_v9 }
  0x23   :  { %v117_v36 = vadd.f32 %v116_v45, %v115_v0  ;;  %v253_v18 = vmul.f32 %v533_v27, %v533_v27  ;;  %v254_v19 = vmul.f32 %v538_v28, %v538_v28  ;;  %v255_v21 = vmul.f32 %v543_v29, %v543_v29 }
  0x24   :  { %v256_v22 = vmul.f32 %v556_v33, %v556_v33  ;;  %v257_v23 = vmul.f32 %v561_v34, %v561_v34  ;;  %v258_v45 = vmul.f32 %v566_v35, %v566_v35  ;;  %v259_v4 = vmul.f32 %v583_v40, %v583_v40 }
  0x25   :  { %v119_v0 = vadd.f32 %v118_v24, %v117_v36  ;;  %v260_v27 = vmul.f32 %v588_v41, %v588_v41  ;;  %v261_v28 = vmul.f32 %v593_v42, %v593_v42  ;;  %v262_v29 = vmul.f32 %v610_v46, %v610_v46 }
  0x26   :  { %v263_v33 = vmul.f32 %v615_v47, %v615_v47  ;;  %v284_v34 = vsel %vm82_vm1, %v220_v63, 0.0  ;;  %v285_v35 = vsel %vm82_vm1, %v221_v31, 0.0  ;;  %v264_v40 = vmul.f32 %v620_v48, %v620_v48 }
  0x27   :  { %v121_v9 = vadd.f32 %v120_v39, %v119_v0  ;;  %v286_v14 = vadd.f32 %v285_v35, %v284_v34  ;;  %v287_v41 = vsel %vm82_vm1, %v222_v37, 0.0  ;;  %v265_v42 = vmul.f32 %v637_v53, %v637_v53  ;;  %v1392_v0 = vld [vmem:[#allocation26_spill] sm:$0xff] }
  0x28   :  { %v266_v46 = vmul.f32 %v642_v54, %v642_v54  ;;  %v267_v47 = vmul.f32 %v647_v55, %v647_v55  ;;  %v289_v63 = vsel %vm82_vm1, %v223_v25, 0.0  ;;  %v268_v39 = vmul.f32 %v664_v59, %v664_v59  ;;  %v1393_v34 = vld [vmem:[#allocation30_spill] sm:$0xff] }
  0x29   :  { %v123_v24 = vadd.f32 %v122_v38, %v121_v9  ;;  %v269_v48 = vmul.f32 %v669_v60, %v669_v60  ;;  %v288_v31 = vadd.f32 %v287_v41, %v286_v14  ;;  %v270_v37 = vmul.f32 %v674_v61, %v674_v61  ;;  %v1394_v41 = vld [vmem:[#allocation49_spill] sm:$0xff] }
  0x2a   :  { %v271_v53 = vmul.f32 %v691_v5, %v691_v5  ;;  %v272_v54 = vmul.f32 %v696_v6, %v696_v6  ;;  %v291_v55 = vsel %vm82_vm1, %v224_v52, 0.0  ;;  %v273_v38 = vmul.f32 %v701_v8, %v701_v8 }
  0x2b   :  { %v125_v25 = vadd.f32 %v124_v51, %v123_v24  ;;  %v274_v59 = vmul.f32 %v723_v15, %v723_v15  ;;  %v290_v60 = vadd.f32 %v289_v63, %v288_v31  ;;  %v275_v36 = vmul.f32 %v728_v17, %v728_v17 }
  0x2c   :  { %v276_v61 = vmul.f32 %v733_v20, %v733_v20  ;;  %v277_v5 = vmul.f32 %v750_v49, %v750_v49  ;;  %v293_v6 = vsel %vm82_vm1, %v225_v56, 0.0  ;;  %v278_v52 = vmul.f32 %v755_v30, %v755_v30 }
  0x2d   :  { %v127_v51 = vadd.f32 %v915_v3, %v125_v25  ;;  %v279_v8 = vmul.f32 %v760_v62, %v760_v62  ;;  %v292_v15 = vadd.f32 %v291_v55, %v290_v60  ;;  %v280_v17 = vmul.f32 %v777_v12, %v777_v12  ;;  %v1396_v25 = vld [vmem:[#allocation51_spill] sm:$0xff] }
  0x2e   :  { %v281_v20 = vmul.f32 %v782_v11, %v782_v11  ;;  %v282_v49 = vmul.f32 %v1392_v0, %v1392_v0  ;;  %v295_v56 = vsel %vm82_vm1, %v226_v1, 0.0  ;;  %v283_v30 = vmul.f32 %v1393_v34, %v1393_v34  ;;  %v1398_v34 = vld [vmem:[#allocation54_spill] sm:$0xff] }
  0x2f   :  { %v129_v3 = vadd.f32 %v931_v50, %v127_v51  ;;  %v294_v35 = vadd.f32 %v293_v6, %v292_v15  ;;  %v297_v62 = vsel %vm82_vm1, %v227_v26, 0.0  ;;  %v299_v9 = vsel %vm82_vm1, %v228_v10, 0.0 }
  0x30   :  { %v301_v12 = vsel %vm82_vm1, %v229_v44, 0.0  ;;  %v303_v14 = vsel %vm82_vm1, %v230_v57, 0.0  ;;  %v305_v11 = vsel %vm82_vm1, %v231_v7, 0.0  ;;  %v307_v1 = vsel %vm82_vm1, %v232_v13, 0.0  ;;  %v1395_v7 = vld [vmem:[#allocation50_spill] sm:$0xff] }
  0x31   :  { %v131_v63 = vadd.f32 %v1394_v41, %v129_v3  ;;  %v296_v24 = vadd.f32 %v295_v56, %v294_v35  ;;  %v1072_v50 = vsel %vm82_vm1, %v253_v18, 0.0  ;;  %v1075_v31 = vsel %vm82_vm1, %v254_v19, 0.0  ;;  %v1397_v56 = vld [vmem:[#allocation35_spill] sm:$0xff] }
  0x32   :  { %v1078_v26 = vsel %vm82_vm1, %v255_v21, 0.0  ;;  %v1081_v44 = vsel %vm82_vm1, %v256_v22, 0.0  ;;  %v1084_v57 = vsel %vm82_vm1, %v257_v23, 0.0  ;;  %v1088_v13 = vsel %vm82_vm1, %v258_v45, 0.0 }
  0x33   :  { %v133_v10 = vadd.f32 %v1395_v7, %v131_v63  ;;  %v298_v55 = vadd.f32 %v297_v62, %v296_v24  ;;  %v1091_v18 = vsel %vm82_vm1, %v259_v4, 0.0  ;;  %v1094_v19 = vsel %vm82_vm1, %v260_v27, 0.0  ;;  %v1399_v62 = vld [vmem:[#allocation36_spill] sm:$0xff] }
  0x34   :  { %v1097_v21 = vsel %vm82_vm1, %v261_v28, 0.0  ;;  %v1100_v22 = vsel %vm82_vm1, %v262_v29, 0.0  ;;  %v1103_v23 = vsel %vm82_vm1, %v263_v33, 0.0  ;;  %v1107_v45 = vsel %vm82_vm1, %v264_v40, 0.0 }
  0x35   :  { %v135_v60 = vadd.f32 %v1396_v25, %v133_v10  ;;  %v300_v6 = vadd.f32 %v299_v9, %v298_v55  ;;  %v1110_v4 = vsel %vm82_vm1, %v265_v42, 0.0  ;;  %v1113_v27 = vsel %vm82_vm1, %v266_v46, 0.0  ;;  %v1401_v10 = vld [vmem:[#allocation38_spill] sm:$0xff] }
  0x36   :  { %v1116_v28 = vsel %vm82_vm1, %v267_v47, 0.0  ;;  %v1119_v29 = vsel %vm82_vm1, %v268_v39, 0.0  ;;  %v1122_v33 = vsel %vm82_vm1, %v269_v48, 0.0  ;;  %v1126_v40 = vsel %vm82_vm1, %v270_v37, 0.0  ;;  %v1402_v25 = vld [vmem:[#allocation2_spill] sm:$0xff] }
  0x37   :  { %v137_v51 = vadd.f32 %v957_v58, %v135_v60  ;;  %v302_v15 = vadd.f32 %v301_v12, %v300_v6  ;;  %v1129_v42 = vsel %vm82_vm1, %v271_v53, 0.0  ;;  %v1132_v46 = vsel %vm82_vm1, %v272_v54, 0.0 }
  0x38   :  { %v1135_v47 = vsel %vm82_vm1, %v273_v38, 0.0  ;;  %v1138_v39 = vsel %vm82_vm1, %v274_v59, 0.0  ;;  %v1141_v48 = vsel %vm82_vm1, %v275_v36, 0.0  ;;  %v1145_v37 = vsel %vm82_vm1, %v276_v61, 0.0 }
  0x39   :  { %v139_v58 = vadd.f32 %v961_v32, %v137_v51  ;;  %v304_v0 = vadd.f32 %v303_v14, %v302_v15  ;;  %v1148_v53 = vsel %vm82_vm1, %v277_v5, 0.0  ;;  %v1151_v54 = vsel %vm82_vm1, %v278_v52, 0.0  ;;  %v1165_v32 = vld [vmem:[%s1318_s0 + $0xf8] sm:$0xff]  ;;  %v1403_v51 = vld [vmem:[#allocation39_spill] sm:$0xff] }
  0x3a   :  { %v1154_v38 = vsel %vm82_vm1, %v279_v8, 0.0  ;;  %v1157_v59 = vsel %vm82_vm1, %v280_v17, 0.0  ;;  %v1160_v36 = vsel %vm82_vm1, %v281_v20, 0.0  ;;  %v1169_v52 = vsel %vm82_vm1, %v282_v49, 0.0 }
  0x3b   :  { %v141_v61 = vadd.f32 %v967_v43, %v139_v58  ;;  %v306_v5 = vadd.f32 %v305_v11, %v304_v0  ;;  %v1172_v8 = vsel %vm82_vm1, %v283_v30, 0.0  ;;  %v144_v17 = vsel %vm82_vm1, %v1165_v32, 0.0  ;;  %v1183_v43 = vld [vmem:[%s1318_s0 + $0x100] sm:$0xff]  ;;  %v1404_v58 = vld [vmem:[#allocation3_spill] sm:$0xff] }
  0x3c   :  { %v235_v20 = vmul.f32 %v1397_v56, %v1397_v56  ;;  %v309_v3 = vsel %vm82_vm1, %v989_v16, 0.0  ;;  %v146_v30 = vsel %vm82_vm1, %v1183_v43, 0.0  ;;  %v236_v9 = vmul.f32 %v1399_v62, %v1399_v62  ;;  %v1400_v16 = vld [vmem:[#allocation37_spill] sm:$0xff] }
  0x3d   :  { %v143_v49 = vadd.f32 %v1398_v34, %v141_v61  ;;  %v308_v35 = vadd.f32 %v307_v1, %v306_v5  ;;  %v311_v12 = vsel %vm82_vm1, %v991_v2, 0.0  ;;  %v237_v41 = vmul.f32 %v1400_v16, %v1400_v16  ;;  %v1405_v5 = vld [vmem:[#allocation40_spill] sm:$0xff]  ;;  %v1408_v62 = vld [vmem:[#allocation5_spill] sm:$0xff] }
  0x3e   :  { %v313_v63 = vsel %vm82_vm1, %v235_v20, 0.0  ;;  %v238_v1 = vmul.f32 %v1401_v10, %v1401_v10  ;;  %v315_v55 = vsel %vm82_vm1, %v236_v9, 0.0  ;;  %v239_v2 = vmul.f32 %v1403_v51, %v1403_v51  ;;  %v1406_v20 = vld [vmem:[#allocation4_spill] sm:$0xff] }
  0x3f   :  { %v145_v14 = vadd.f32 %v144_v17, %v143_v49  ;;  %v310_v11 = vadd.f32 %v309_v3, %v308_v35  ;;  %v317_v15 = vsel %vm82_vm1, %v237_v41, 0.0  ;;  %v240_v17 = vmul.f32 %v1405_v5, %v1405_v5  ;;  %v1407_v49 = vld [vmem:[#allocation41_spill] sm:$0xff]  ;;  %v1410_v41 = vld [vmem:[#allocation6_spill] sm:$0xff] }
  0x40   :  { %v319_v56 = vsel %vm82_vm1, %v238_v1, 0.0  ;;  %v241_v35 = vmul.f32 %v1407_v49, %v1407_v49 }
  0x41   :  { %v147_v24 = vadd.f32 %v146_v30, %v145_v14  ;;  %v312_v7 = vadd.f32 %v311_v12, %v310_v11  ;;  %v321_v30 = vsel %vm82_vm1, %v239_v2, 0.0  ;;  %v1409_v14 = vld [vmem:[#allocation42_spill] sm:$0xff]  ;;  %v323_v16 = vsel %vm82_vm1, %v240_v17, 0.0 }
  0x42   :  { %v242_v11 = vmul.f32 %v1409_v14, %v1409_v14  ;;  %v325_v1 = vsel %vm82_vm1, %v241_v35, 0.0 }
  0x43   :  { %v149_v60 = vadd.f32 %v1402_v25, %v147_v24  ;;  %v314_v6 = vadd.f32 %v313_v63, %v312_v7  ;;  %v1411_v7 = vld [vmem:[#allocation43_spill] sm:$0xff] }
  0x44   :  { %v243_v10 = vmul.f32 %v1411_v7, %v1411_v7  ;;  %v327_v2 = vsel %vm82_vm1, %v242_v11, 0.0 }
  0x45   :  { %v151_v0 = vadd.f32 %v1404_v58, %v149_v60  ;;  %v316_v61 = vadd.f32 %v315_v55, %v314_v6  ;;  %v1412_v55 = vld [vmem:[#allocation7_spill] sm:$0xff]  ;;  %v1413_v6 = vld [vmem:[#allocation44_spill] sm:$0xff] }
  0x46   :  { %v244_v51 = vmul.f32 %v1413_v6, %v1413_v6  ;;  %v329_v17 = vsel %vm82_vm1, %v243_v10, 0.0 }
  0x47   :  { %v153_v3 = vadd.f32 %v1406_v20, %v151_v0  ;;  %v318_v34 = vadd.f32 %v317_v15, %v316_v61  ;;  %v1414_v15 = vld [vmem:[#allocation8_spill] sm:$0xff]  ;;  %v1415_v61 = vld [vmem:[#allocation45_spill] sm:$0xff] }
  0x48   :  { %v245_v5 = vmul.f32 %v1415_v61, %v1415_v61  ;;  %v331_v35 = vsel %vm82_vm1, %v244_v51, 0.0 }
  0x49   :  { %v155_v9 = vadd.f32 %v1408_v62, %v153_v3  ;;  %v320_v12 = vadd.f32 %v319_v56, %v318_v34  ;;  %v1416_v56 = vld [vmem:[#allocation9_spill] sm:$0xff]  ;;  %v1417_v34 = vld [vmem:[#allocation46_spill] sm:$0xff] }
  0x4a   :  { %v246_v49 = vmul.f32 %v1417_v34, %v1417_v34  ;;  %v333_v11 = vsel %vm82_vm1, %v245_v5, 0.0 }
  0x4b   :  { %v157_v63 = vadd.f32 %v1410_v41, %v155_v9  ;;  %v322_v24 = vadd.f32 %v321_v30, %v320_v12  ;;  %v1418_v30 = vld [vmem:[#allocation10_spill] sm:$0xff]  ;;  %v1419_v12 = vld [vmem:[#allocation47_spill] sm:$0xff] }
  0x4c   :  { %v247_v14 = vmul.f32 %v1419_v12, %v1419_v12  ;;  %v335_v10 = vsel %vm82_vm1, %v246_v49, 0.0  ;;  %v1427_v49 = vld [vmem:[#allocation15_spill] sm:$0xff]  ;;  %v1428_v12 = vld [vmem:[#allocation16_spill] sm:$0xff] }
  0x4d   :  { %v159_v25 = vadd.f32 %v1412_v55, %v157_v63  ;;  %v324_v60 = vadd.f32 %v323_v16, %v322_v24  ;;  %v1420_v16 = vld [vmem:[#allocation11_spill] sm:$0xff]  ;;  %v1421_v24 = vld [vmem:[#allocation48_spill] sm:$0xff] }
  0x4e   :  { %v248_v7 = vmul.f32 %v1421_v24, %v1421_v24  ;;  %v337_v51 = vsel %vm82_vm1, %v247_v14, 0.0 }
  0x4f   :  { %v161_v58 = vadd.f32 %v1414_v15, %v159_v25  ;;  %v326_v0 = vadd.f32 %v325_v1, %v324_v60  ;;  %v1422_v1 = vld [vmem:[#allocation12_spill] sm:$0xff] }
  0x50   :  { %v1423_v60 = vld [vmem:[#allocation52_spill] sm:$0xff]  ;;  %v339_v5 = vsel %vm82_vm1, %v248_v7, 0.0  ;;  %v1430_v7 = vld [vmem:[#allocation18_spill] sm:$0xff] }
  0x51   :  { %v163_v20 = vadd.f32 %v1416_v56, %v161_v58  ;;  %v328_v3 = vadd.f32 %v327_v2, %v326_v0  ;;  %v249_v6 = vmul.f32 %v1423_v60, %v1423_v60  ;;  %v1424_v2 = vld [vmem:[#allocation13_spill] sm:$0xff] }
  0x52   :  { %v1425_v0 = vld [vmem:[#allocation53_spill] sm:$0xff] }
  0x53   :  { %v165_v62 = vadd.f32 %v1418_v30, %v163_v20  ;;  %v330_v9 = vadd.f32 %v329_v17, %v328_v3  ;;  %v250_v61 = vmul.f32 %v1425_v0, %v1425_v0  ;;  %v1426_v17 = vld [vmem:[#allocation14_spill] sm:$0xff]  ;;  %v251_v3 = vmul.f32 %v1165_v32, %v1165_v32 }
  0x54   :  { %v341_v34 = vsel %vm82_vm1, %v249_v6, 0.0  ;;  %v1432_v6 = vld [vmem:[#allocation20_spill] sm:$0xff]  ;;  %v1434_v0 = vld [vmem:[#allocation22_spill] sm:$0xff] }
  0x55   :  { %v167_v41 = vadd.f32 %v1420_v16, %v165_v62  ;;  %v332_v63 = vadd.f32 %v331_v35, %v330_v9  ;;  %v252_v62 = vmul.f32 %v1183_v43, %v1183_v43  ;;  %v343_v9 = vsel %vm82_vm1, %v250_v61, 0.0 }
  0x56   :  { %v345_v16 = vsel %vm82_vm1, %v251_v3, 0.0  ;;  %v1436_v3 = vld [vmem:[#allocation24_spill] sm:$0xff] }
  0x57   :  { %v169_v55 = vadd.f32 %v1422_v1, %v167_v41  ;;  %v334_v25 = vadd.f32 %v333_v11, %v332_v63  ;;  %v1429_v41 = vld [vmem:[#allocation17_spill] sm:$0xff]  ;;  %v347_v32 = vsel %vm82_vm1, %v252_v62, 0.0  ;;  %v1438_v62 = vld [vmem:[#allocation27_spill] sm:$0xff] }
  0x59   :  { %v171_v15 = vadd.f32 %v1424_v2, %v169_v55  ;;  %v336_v58 = vadd.f32 %v335_v10, %v334_v25  ;;  %v1431_v55 = vld [vmem:[#allocation19_spill] sm:$0xff]  ;;  %v1433_v2 = vld [vmem:[#allocation21_spill] sm:$0xff] }
  0x5b   :  { %v173_v56 = vadd.f32 %v1426_v17, %v171_v15  ;;  %v338_v20 = vadd.f32 %v337_v51, %v336_v58  ;;  %v1435_v17 = vld [vmem:[#allocation23_spill] sm:$0xff] }
  0x5d   :  { %v175_v35 = vadd.f32 %v1427_v49, %v173_v56  ;;  %v340_v30 = vadd.f32 %v339_v5, %v338_v20 }
  0x5f   :  { %v177_v14 = vadd.f32 %v1428_v12, %v175_v35  ;;  %v342_v11 = vadd.f32 %v341_v34, %v340_v30  ;;  %v1437_v35 = vld [vmem:[#allocation25_spill] sm:$0xff]  ;;  %v1439_v12 = vld [vmem:[#allocation28_spill] sm:$0xff] }
  0x61   :  { %v179_v63 = vadd.f32 %v1429_v41, %v177_v14  ;;  %v344_v24 = vadd.f32 %v343_v9, %v342_v11  ;;  %v1440_v11 = vld [vmem:[#allocation29_spill] sm:$0xff]  ;;  %v1441_v41 = vld [vmem:[#allocation31_spill] sm:$0xff] }
  0x63   :  { %v181_v10 = vadd.f32 %v1430_v7, %v179_v63  ;;  %v346_v1 = vadd.f32 %v345_v16, %v344_v24  ;;  %v1442_v24 = vld [vmem:[#allocation32_spill] sm:$0xff]  ;;  %v1443_v7 = vld [vmem:[#allocation33_spill] sm:$0xff] }
  0x65   :  { %v183_v25 = vadd.f32 %v1431_v55, %v181_v10  ;;  %v348_v60 = vadd.f32 %v347_v32, %v346_v1  ;;  %v1444_v1 = vld [vmem:[#allocation34_spill] sm:$0xff] }
  0x67   :  { %v185_v43 = vadd.f32 %v1432_v6, %v183_v25  ;;  %v350_v51 = vadd.f32 %v1072_v50, %v348_v60 }
  0x69   :  { %v187_v15 = vadd.f32 %v1433_v2, %v185_v43  ;;  %v352_v58 = vadd.f32 %v1075_v31, %v350_v51 }
  0x6b   :  { %v189_v61 = vadd.f32 %v1434_v0, %v187_v15  ;;  %v354_v5 = vadd.f32 %v1078_v26, %v352_v58 }
  0x6d   :  { %v191_v56 = vadd.f32 %v1435_v17, %v189_v61  ;;  %v356_v20 = vadd.f32 %v1081_v44, %v354_v5 }
  0x6f   :  { %v193_v34 = vadd.f32 %v1436_v3, %v191_v56  ;;  %v358_v49 = vadd.f32 %v1084_v57, %v356_v20 }
  0x71   :  { %v195_v30 = vadd.f32 %v1437_v35, %v193_v34  ;;  %v360_v50 = vadd.f32 %v1088_v13, %v358_v49 }
  0x73   :  { %v197_v9 = vadd.f32 %v1438_v62, %v195_v30  ;;  %v362_v31 = vadd.f32 %v1091_v18, %v360_v50 }
  0x75   :  { %v199_v14 = vadd.f32 %v1439_v12, %v197_v9  ;;  %v364_v26 = vadd.f32 %v1094_v19, %v362_v31 }
  0x77   :  { %v201_v16 = vadd.f32 %v1440_v11, %v199_v14  ;;  %v366_v44 = vadd.f32 %v1097_v21, %v364_v26 }
  0x79   :  { %v203_v63 = vadd.f32 %v1441_v41, %v201_v16  ;;  %v368_v57 = vadd.f32 %v1100_v22, %v366_v44 }
  0x7b   :  { %v205_v32 = vadd.f32 %v1442_v24, %v203_v63  ;;  %v370_v13 = vadd.f32 %v1103_v23, %v368_v57 }
  0x7d   :  { %v207_v10 = vadd.f32 %v1443_v7, %v205_v32  ;;  %v372_v18 = vadd.f32 %v1107_v45, %v370_v13  ;;  %v81_v45 = vld [vmem:[%s1319_s1] sm:$0x1] }
  0x7f   :  { %v209_v55 = vadd.f32 %v1444_v1, %v207_v10  ;;  %v374_v19 = vadd.f32 %v1110_v4, %v372_v18 }
  0x81   :  { %v210_v25 = vrot.slane %v209_v55, 4  ;;  %v376_v60 = vadd.f32 %v1113_v27, %v374_v19 }
  0x83   :  { %v211_v21 = vadd.f32 %v210_v25, %v209_v55  ;;  %v378_v6 = vadd.f32 %v1116_v28, %v376_v60 }
  0x85   :  { %v212_v43 = vrot.slane %v211_v21, 2  ;;  %v380_v22 = vadd.f32 %v1119_v29, %v378_v6 }
  0x87   :  { %v213_v51 = vadd.f32 %v212_v43, %v211_v21  ;;  %v382_v23 = vadd.f32 %v1122_v33, %v380_v22 }
  0x89   :  { %v214_v2 = vrot.slane %v213_v51, 1  ;;  %v384_v15 = vadd.f32 %v1126_v40, %v382_v23 }
  0x8b   :  { %v215_v4 = vadd.f32 %v214_v2, %v213_v51  ;;  %v386_v58 = vadd.f32 %v1129_v42, %v384_v15 }
  0x8d   :  { %v216_v27 = vadd.f32 %v215_v4, %v81_v45  ;;  %v388_v0 = vadd.f32 %v1132_v46, %v386_v58 }
  0x8f   :  { %218 = vst.msk [vmem:[%s1319_s1] sm:$0x1] %vm14_vm0, %v216_v27  ;;  %v390_v28 = vadd.f32 %v1135_v47, %v388_v0 }
  0x91   :  { %v392_v29 = vadd.f32 %v1138_v39, %v390_v28 }
  0x93   :  { %v394_v33 = vadd.f32 %v1141_v48, %v392_v29 }
  0x95   :  { %v396_v40 = vadd.f32 %v1145_v37, %v394_v33  ;;  %v219_v37 = vld [vmem:[%s1320_s2] sm:$0x1] }
  0x97   :  { %v398_v61 = vadd.f32 %v1148_v53, %v396_v40 }
  0x99   :  { %v400_v42 = vadd.f32 %v1151_v54, %v398_v61 }
  0x9b   :  { %v402_v5 = vadd.f32 %v1154_v38, %v400_v42 }
  0x9d   :  { %v404_v46 = vadd.f32 %v1157_v59, %v402_v5 }
  0x9f   :  { %v406_v17 = vadd.f32 %v1160_v36, %v404_v46 }
  0xa1   :  { %v408_v56 = vadd.f32 %v1169_v52, %v406_v17 }
  0xa3   :  { %v410_v47 = vadd.f32 %v1172_v8, %v408_v56 }
  0xa5   :  { %v411_v20 = vrot.slane %v410_v47, 4 }
  0xa7   :  { %v412_v39 = vadd.f32 %v411_v20, %v410_v47 }
  0xa9   :  { %v413_v3 = vrot.slane %v412_v39, 2 }
  0xab   :  { %v414_v48 = vadd.f32 %v413_v3, %v412_v39 }
  0xad   :  { %v415_v34 = vrot.slane %v414_v48, 1 }
  0xaf   :  { %v416_v53 = vadd.f32 %v415_v34, %v414_v48 }
  0xb1   :  { %v417_v54 = vadd.f32 %v416_v53, %v219_v37 }
  0xb3   :  { %418 = vst.msk [vmem:[%s1320_s2] sm:$0x1] %vm14_vm0, %v417_v54 }

// kernel: basic_block_forward.6
= control target key start
LH: loop header
LB: loop body
LE: loop exit
PB: predicated region body
PF: predicated region fallthrough
CT: control target
= control target key end

     0   :  { %vm14_vm0 = vcmask 57344   ;;  %vm82_vm1 = vcmask 64512   ;;  %v428_v0 = vmov 0.0   ;;  %s1318_s0 = inlined_call_operand.vmem [shape: f32[512,8], index: 0, kind: input, shape index: {}]   ;;  %s1319_s1 = inlined_call_operand.vmem [shape: f32[1,8], index: 1, kind: output, shape index: {0}]   ;;  %s1320_s2 = inlined_call_operand.vmem [shape: f32[1,8], index: 2, kind: output, shape index: {1}]  }
   0x1   :  { %15 = vst.msk [vmem:[%s1319_s1] sm:$0x1] %vm14_vm0, %v428_v0  ;;  %16 = vst.msk [vmem:[%s1320_s2] sm:$0x1] %vm14_vm0, %v428_v0  ;;  %v455_v1 = vld [vmem:[%s1318_s0] sm:$0xff]  ;;  %v460_v2 = vld [vmem:[%s1318_s0 + $0x8] sm:$0xff] }
   0x2   :  { %v465_v3 = vld [vmem:[%s1318_s0 + $0x10] sm:$0xff]  ;;  %v83_v4 = vsel %vm82_vm1, %v455_v1, 0.0  ;;  %v84_v5 = vsel %vm82_vm1, %v460_v2, 0.0  ;;  %v476_v7 = vld [vmem:[%s1318_s0 + $0x18] sm:$0xff]  ;;  %v483_v10 = vld [vmem:[%s1318_s0 + $0x20] sm:$0xff] }
   0x3   :  { %v86_v6 = vsel %vm82_vm1, %v465_v3, 0.0  ;;  %v85_v8 = vadd.f32 %v84_v5, %v83_v4  ;;  %v88_v9 = vsel %vm82_vm1, %v476_v7, 0.0  ;;  %v90_v12 = vsel %vm82_vm1, %v483_v10, 0.0  ;;  %v490_v13 = vld [vmem:[%s1318_s0 + $0x28] sm:$0xff]  ;;  %v497_v16 = vld [vmem:[%s1318_s0 + $0x30] sm:$0xff]  ;;  %v502_v18 = vld [vmem:[%s1318_s0 + $0x38] sm:$0xff] }
   0x4   :  { %v92_v15 = vsel %vm82_vm1, %v490_v13, 0.0  ;;  %v507_v19 = vld [vmem:[%s1318_s0 + $0x40] sm:$0xff]  ;;  %v94_v20 = vsel %vm82_vm1, %v497_v16, 0.0  ;;  %v514_v21 = vld [vmem:[%s1318_s0 + $0x48] sm:$0xff]  ;;  %v519_v22 = vld [vmem:[%s1318_s0 + $0x50] sm:$0xff]  ;;  %v96_v25 = vsel %vm82_vm1, %v502_v18, 0.0 }
   0x5   :  { %v87_v11 = vadd.f32 %v86_v6, %v85_v8  ;;  %v524_v23 = vld [vmem:[%s1318_s0 + $0x58] sm:$0xff]  ;;  %v98_v26 = vsel %vm82_vm1, %v507_v19, 0.0  ;;  %v533_v27 = vld [vmem:[%s1318_s0 + $0x108] sm:$0xff]  ;;  %v538_v28 = vld [vmem:[%s1318_s0 + $0x110] sm:$0xff]  ;;  %v100_v30 = vsel %vm82_vm1, %v514_v21, 0.0  ;;  %v102_v31 = vsel %vm82_vm1, %v519_v22, 0.0 }
   0x6   :  { %v543_v29 = vld [vmem:[%s1318_s0 + $0x118] sm:$0xff]  ;;  %v551_v32 = vsel %vm82_vm1, %v524_v23, 0.0  ;;  %v556_v33 = vld [vmem:[%s1318_s0 + $0x120] sm:$0xff]  ;;  %v561_v34 = vld [vmem:[%s1318_s0 + $0x128] sm:$0xff]  ;;  %v570_v37 = vsel %vm82_vm1, %v533_v27, 0.0  ;;  %v574_v38 = vsel %vm82_vm1, %v538_v28, 0.0 }
   0x7   :  { %v89_v14 = vadd.f32 %v88_v9, %v87_v11  ;;  %v566_v35 = vld [vmem:[%s1318_s0 + $0x130] sm:$0xff]  ;;  %1339 = vst [vmem:[#allocation2_spill] sm:$0xff] %v570_v37  ;;  %1340 = vst [vmem:[#allocation3_spill] sm:$0xff] %v574_v38  ;;  %v578_v39 = vsel %vm82_vm1, %v543_v29, 0.0  ;;  %v583_v40 = vld [vmem:[%s1318_s0 + $0x138] sm:$0xff]  ;;  %v597_v43 = vsel %vm82_vm1, %v556_v33, 0.0  ;;  %v222_v37 = vmul.f32 %v465_v3, %v465_v3 }
   0x8   :  { %1341 = vst [vmem:[#allocation4_spill] sm:$0xff] %v578_v39  ;;  %v588_v41 = vld [vmem:[%s1318_s0 + $0x140] sm:$0xff]  ;;  %v593_v42 = vld [vmem:[%s1318_s0 + $0x148] sm:$0xff]  ;;  %1342 = vst [vmem:[#allocation5_spill] sm:$0xff] %v597_v43  ;;  %v601_v44 = vsel %vm82_vm1, %v561_v34, 0.0  ;;  %v605_v45 = vsel %vm82_vm1, %v566_v35, 0.0 }
   0x9   :  { %v91_v17 = vadd.f32 %v90_v12, %v89_v14  ;;  %1343 = vst [vmem:[#allocation6_spill] sm:$0xff] %v601_v44  ;;  %1344 = vst [vmem:[#allocation7_spill] sm:$0xff] %v605_v45  ;;  %v610_v46 = vld [vmem:[%s1318_s0 + $0x150] sm:$0xff]  ;;  %v615_v47 = vld [vmem:[%s1318_s0 + $0x158] sm:$0xff]  ;;  %v624_v50 = vsel %vm82_vm1, %v583_v40, 0.0  ;;  %v628_v51 = vsel %vm82_vm1, %v588_v41, 0.0 }
   0xa   :  { %v620_v48 = vld [vmem:[%s1318_s0 + $0x160] sm:$0xff]  ;;  %1345 = vst [vmem:[#allocation8_spill] sm:$0xff] %v624_v50  ;;  %1346 = vst [vmem:[#allocation9_spill] sm:$0xff] %v628_v51  ;;  %v632_v52 = vsel %vm82_vm1, %v593_v42, 0.0  ;;  %v637_v53 = vld [vmem:[%s1318_s0 + $0x168] sm:$0xff]  ;;  %v651_v56 = vsel %vm82_vm1, %v610_v46, 0.0 }
   0xb   :  { %v93_v24 = vadd.f32 %v92_v15, %v91_v17  ;;  %1347 = vst [vmem:[#allocation10_spill] sm:$0xff] %v632_v52  ;;  %v642_v54 = vld [vmem:[%s1318_s0 + $0x170] sm:$0xff]  ;;  %v647_v55 = vld [vmem:[%s1318_s0 + $0x178] sm:$0xff]  ;;  %1348 = vst [vmem:[#allocation11_spill] sm:$0xff] %v651_v56  ;;  %v655_v57 = vsel %vm82_vm1, %v615_v47, 0.0  ;;  %v659_v58 = vsel %vm82_vm1, %v620_v48, 0.0 }
   0xc   :  { %1349 = vst [vmem:[#allocation12_spill] sm:$0xff] %v655_v57  ;;  %1350 = vst [vmem:[#allocation13_spill] sm:$0xff] %v659_v58  ;;  %v664_v59 = vld [vmem:[%s1318_s0 + $0x180] sm:$0xff]  ;;  %v669_v60 = vld [vmem:[%s1318_s0 + $0x188] sm:$0xff]  ;;  %v678_v63 = vsel %vm82_vm1, %v637_v53, 0.0  ;;  %v682_v0 = vsel %vm82_vm1, %v642_v54, 0.0 }
   0xd   :  { %v95_v36 = vadd.f32 %v94_v20, %v93_v24  ;;  %v674_v61 = vld [vmem:[%s1318_s0 + $0x190] sm:$0xff]  ;;  %1351 = vst [vmem:[#allocation14_spill] sm:$0xff] %v678_v63  ;;  %1352 = vst [vmem:[#allocation15_spill] sm:$0xff] %v682_v0  ;;  %v686_v4 = vsel %vm82_vm1, %v647_v55, 0.0  ;;  %v691_v5 = vld [vmem:[%s1318_s0 + $0x198] sm:$0xff]  ;;  %v705_v9 = vsel %vm82_vm1, %v664_v59, 0.0 }
   0xe   :  { %1353 = vst [vmem:[#allocation16_spill] sm:$0xff] %v686_v4  ;;  %v696_v6 = vld [vmem:[%s1318_s0 + $0x1a0] sm:$0xff]  ;;  %v701_v8 = vld [vmem:[%s1318_s0 + $0x1a8] sm:$0xff]  ;;  %1354 = vst [vmem:[#allocation17_spill] sm:$0xff] %v705_v9  ;;  %v709_v11 = vsel %vm82_vm1, %v669_v60, 0.0  ;;  %v713_v12 = vsel %vm82_vm1, %v674_v61, 0.0 }
   0xf   :  { %v97_v49 = vadd.f32 %v96_v25, %v95_v36  ;;  %1355 = vst [vmem:[#allocation18_spill] sm:$0xff] %v709_v11  ;;  %1356 = vst [vmem:[#allocation19_spill] sm:$0xff] %v713_v12  ;;  %v718_v14 = vld [vmem:[%s1318_s0 + $0x60] sm:$0xff]  ;;  %v723_v15 = vld [vmem:[%s1318_s0 + $0x1b0] sm:$0xff]  ;;  %v737_v25 = vsel %vm82_vm1, %v691_v5, 0.0  ;;  %v745_v36 = vsel %vm82_vm1, %v701_v8, 0.0 }
  0x10   :  { %v728_v17 = vld [vmem:[%s1318_s0 + $0x1b8] sm:$0xff]  ;;  %v733_v20 = vld [vmem:[%s1318_s0 + $0x1c0] sm:$0xff]  ;;  %1357 = vst [vmem:[#allocation20_spill] sm:$0xff] %v737_v25  ;;  %1359 = vst [vmem:[#allocation22_spill] sm:$0xff] %v745_v36 }
  0x11   :  { %v99_v62 = vadd.f32 %v98_v26, %v97_v49  ;;  %v741_v26 = vsel %vm82_vm1, %v696_v6, 0.0  ;;  %v750_v49 = vld [vmem:[%s1318_s0 + $0x1c8] sm:$0xff]  ;;  %v768_v36 = vsel %vm82_vm1, %v728_v17, 0.0  ;;  %v772_v25 = vsel %vm82_vm1, %v733_v20, 0.0  ;;  %v777_v12 = vld [vmem:[%s1318_s0 + $0x1e0] sm:$0xff]  ;;  %v804_v0 = vld [vmem:[%s1318_s0 + $0x1f8] sm:$0xff] }
  0x12   :  { %1358 = vst [vmem:[#allocation21_spill] sm:$0xff] %v741_v26  ;;  %v764_v26 = vsel %vm82_vm1, %v723_v15, 0.0  ;;  %1361 = vst [vmem:[#allocation24_spill] sm:$0xff] %v768_v36  ;;  %v782_v11 = vld [vmem:[%s1318_s0 + $0x1e8] sm:$0xff]  ;;  %v791_v9 = vsel %vm82_vm1, %v750_v49, 0.0  ;;  %v826_v58 = vsel %vm82_vm1, %v804_v0, 0.0 }
  0x13   :  { %v101_v24 = vadd.f32 %v100_v30, %v99_v62  ;;  %v755_v30 = vld [vmem:[%s1318_s0 + $0x1d0] sm:$0xff]  ;;  %v760_v62 = vld [vmem:[%s1318_s0 + $0x1d8] sm:$0xff]  ;;  %1360 = vst [vmem:[#allocation23_spill] sm:$0xff] %v764_v26  ;;  %1362 = vst [vmem:[#allocation25_spill] sm:$0xff] %v772_v25 }
  0x14   :  { %v787_v26 = vld [vmem:[%s1318_s0 + $0x1f0] sm:$0xff]  ;;  %1364 = vst [vmem:[#allocation27_spill] sm:$0xff] %v791_v9  ;;  %v795_v25 = vsel %vm82_vm1, %v755_v30, 0.0  ;;  %v799_v4 = vsel %vm82_vm1, %v760_v62, 0.0  ;;  %1367 = vst [vmem:[#allocation30_spill] sm:$0xff] %v804_v0  ;;  %v814_v9 = vsel %vm82_vm1, %v782_v11, 0.0 }
  0x15   :  { %1363 = vst [vmem:[#allocation26_spill] sm:$0xff] %v787_v26  ;;  %v103_v36 = vadd.f32 %v102_v31, %v101_v24  ;;  %1365 = vst [vmem:[#allocation28_spill] sm:$0xff] %v795_v25  ;;  %v106_v31 = vsel %vm82_vm1, %v718_v14, 0.0  ;;  %v810_v24 = vsel %vm82_vm1, %v777_v12, 0.0  ;;  %v818_v25 = vsel %vm82_vm1, %v787_v26, 0.0  ;;  %v855_v56 = vld [vmem:[%s1318_s0 + $0x90] sm:$0xff] }
  0x16   :  { %1366 = vst [vmem:[#allocation29_spill] sm:$0xff] %v799_v4  ;;  %1368 = vst [vmem:[#allocation31_spill] sm:$0xff] %v810_v24  ;;  %v30_v4 = vld [vmem:[%s1318_s0 + $0x68] sm:$0xff]  ;;  %v860_v52 = vld [vmem:[%s1318_s0 + $0x98] sm:$0xff] }
  0x17   :  { %1369 = vst [vmem:[#allocation32_spill] sm:$0xff] %v814_v9  ;;  %1370 = vst [vmem:[#allocation33_spill] sm:$0xff] %v818_v25  ;;  %v105_v63 = vadd.f32 %v551_v32, %v103_v36  ;;  %v108_v24 = vsel %vm82_vm1, %v30_v4, 0.0  ;;  %v31_v9 = vld [vmem:[%s1318_s0 + $0x70] sm:$0xff]  ;;  %v835_v25 = vld [vmem:[%s1318_s0 + $0x78] sm:$0xff]  ;;  %v120_v39 = vsel %vm82_vm1, %v860_v52, 0.0 }
  0x18   :  { %1371 = vst [vmem:[#allocation34_spill] sm:$0xff] %v826_v58  ;;  %1372 = vst [vmem:[#allocation35_spill] sm:$0xff] %v835_v25  ;;  %v840_v32 = vld [vmem:[%s1318_s0 + $0x80] sm:$0xff]  ;;  %v845_v36 = vld [vmem:[%s1318_s0 + $0x88] sm:$0xff]  ;;  %v110_v58 = vsel %vm82_vm1, %v31_v9, 0.0 }
  0x19   :  { %v107_v57 = vadd.f32 %v106_v31, %v105_v63  ;;  %1373 = vst [vmem:[#allocation36_spill] sm:$0xff] %v840_v32  ;;  %1374 = vst [vmem:[#allocation37_spill] sm:$0xff] %v845_v36  ;;  %v220_v63 = vmul.f32 %v455_v1, %v455_v1  ;;  %v221_v31 = vmul.f32 %v460_v2, %v460_v2  ;;  %v865_v51 = vld [vmem:[%s1318_s0 + $0xa0] sm:$0xff]  ;;  %v112_v1 = vsel %vm82_vm1, %v835_v25, 0.0  ;;  %v876_v44 = vld [vmem:[%s1318_s0 + $0xa8] sm:$0xff] }
  0x1a   :  { %1375 = vst [vmem:[#allocation38_spill] sm:$0xff] %v855_v56  ;;  %1376 = vst [vmem:[#allocation39_spill] sm:$0xff] %v860_v52  ;;  %v114_v2 = vsel %vm82_vm1, %v840_v32, 0.0  ;;  %v116_v45 = vsel %vm82_vm1, %v845_v36, 0.0  ;;  %v881_v43 = vld [vmem:[%s1318_s0 + $0xb0] sm:$0xff]  ;;  %v122_v38 = vsel %vm82_vm1, %v865_v51, 0.0  ;;  %v223_v25 = vmul.f32 %v476_v7, %v476_v7 }
  0x1b   :  { %1377 = vst [vmem:[#allocation40_spill] sm:$0xff] %v865_v51  ;;  %v109_v50 = vadd.f32 %v108_v24, %v107_v57  ;;  %1378 = vst [vmem:[#allocation41_spill] sm:$0xff] %v876_v44  ;;  %v886_v57 = vld [vmem:[%s1318_s0 + $0xb8] sm:$0xff]  ;;  %v118_v24 = vsel %vm82_vm1, %v855_v56, 0.0  ;;  %v899_v36 = vld [vmem:[%s1318_s0 + $0xc0] sm:$0xff]  ;;  %v124_v51 = vsel %vm82_vm1, %v876_v44, 0.0 }
  0x1c   :  { %1379 = vst [vmem:[#allocation42_spill] sm:$0xff] %v881_v43  ;;  %1380 = vst [vmem:[#allocation43_spill] sm:$0xff] %v886_v57  ;;  %v904_v32 = vld [vmem:[%s1318_s0 + $0xc8] sm:$0xff]  ;;  %v909_v52 = vld [vmem:[%s1318_s0 + $0xd0] sm:$0xff]  ;;  %v915_v3 = vsel %vm82_vm1, %v881_v43, 0.0 }
  0x1d   :  { %1381 = vst [vmem:[#allocation44_spill] sm:$0xff] %v899_v36  ;;  %1382 = vst [vmem:[#allocation45_spill] sm:$0xff] %v904_v32  ;;  %v111_v56 = vadd.f32 %v110_v58, %v109_v50  ;;  %v922_v0 = vld [vmem:[%s1318_s0 + $0xd8] sm:$0xff]  ;;  %v927_v26 = vld [vmem:[%s1318_s0 + $0xe0] sm:$0xff]  ;;  %v931_v50 = vsel %vm82_vm1, %v886_v57, 0.0  ;;  %v935_v58 = vsel %vm82_vm1, %v899_v36, 0.0 }
  0x1e   :  { %1383 = vst [vmem:[#allocation46_spill] sm:$0xff] %v909_v52  ;;  %1384 = vst [vmem:[#allocation47_spill] sm:$0xff] %v922_v0  ;;  %v939_v7 = vsel %vm82_vm1, %v904_v32, 0.0  ;;  %v943_v43 = vsel %vm82_vm1, %v909_v52, 0.0  ;;  %v948_v44 = vld [vmem:[%s1318_s0 + $0xe8] sm:$0xff]  ;;  %v953_v57 = vld [vmem:[%s1318_s0 + $0xf0] sm:$0xff]  ;;  %v224_v52 = vmul.f32 %v483_v10, %v483_v10  ;;  %v228_v10 = vmul.f32 %v507_v19, %v507_v19 }
  0x1f   :  { %1385 = vst [vmem:[#allocation48_spill] sm:$0xff] %v927_v26  ;;  %1386 = vst [vmem:[#allocation49_spill] sm:$0xff] %v935_v58  ;;  %v113_v36 = vadd.f32 %v112_v1, %v111_v56  ;;  %v957_v58 = vsel %vm82_vm1, %v922_v0, 0.0  ;;  %v961_v32 = vsel %vm82_vm1, %v927_v26, 0.0  ;;  %v225_v56 = vmul.f32 %v490_v13, %v490_v13 }
  0x20   :  { %1387 = vst [vmem:[#allocation50_spill] sm:$0xff] %v939_v7  ;;  %1388 = vst [vmem:[#allocation51_spill] sm:$0xff] %v943_v43  ;;  %v967_v43 = vsel %vm82_vm1, %v948_v44, 0.0  ;;  %v971_v7 = vsel %vm82_vm1, %v953_v57, 0.0  ;;  %v226_v1 = vmul.f32 %v497_v16, %v497_v16  ;;  %v227_v26 = vmul.f32 %v502_v18, %v502_v18 }
  0x21   :  { %1389 = vst [vmem:[#allocation52_spill] sm:$0xff] %v948_v44  ;;  %1390 = vst [vmem:[#allocation53_spill] sm:$0xff] %v953_v57  ;;  %v115_v0 = vadd.f32 %v114_v2, %v113_v36  ;;  %v229_v44 = vmul.f32 %v514_v21, %v514_v21  ;;  %v230_v57 = vmul.f32 %v519_v22, %v519_v22 }
  0x22   :  { %1391 = vst [vmem:[#allocation54_spill] sm:$0xff] %v971_v7  ;;  %v231_v7 = vmul.f32 %v524_v23, %v524_v23  ;;  %v232_v13 = vmul.f32 %v718_v14, %v718_v14  ;;  %v989_v16 = vmul.f32 %v30_v4, %v30_v4  ;;  %v991_v2 = vmul.f32 %v31_v9, %v31_v9 }
  0x23   :  { %v117_v36 = vadd.f32 %v116_v45, %v115_v0  ;;  %v253_v18 = vmul.f32 %v533_v27, %v533_v27  ;;  %v254_v19 = vmul.f32 %v538_v28, %v538_v28  ;;  %v255_v21 = vmul.f32 %v543_v29, %v543_v29 }
  0x24   :  { %v256_v22 = vmul.f32 %v556_v33, %v556_v33  ;;  %v257_v23 = vmul.f32 %v561_v34, %v561_v34  ;;  %v258_v45 = vmul.f32 %v566_v35, %v566_v35  ;;  %v259_v4 = vmul.f32 %v583_v40, %v583_v40 }
  0x25   :  { %v119_v0 = vadd.f32 %v118_v24, %v117_v36  ;;  %v260_v27 = vmul.f32 %v588_v41, %v588_v41  ;;  %v261_v28 = vmul.f32 %v593_v42, %v593_v42  ;;  %v262_v29 = vmul.f32 %v610_v46, %v610_v46 }
  0x26   :  { %v263_v33 = vmul.f32 %v615_v47, %v615_v47  ;;  %v284_v34 = vsel %vm82_vm1, %v220_v63, 0.0  ;;  %v285_v35 = vsel %vm82_vm1, %v221_v31, 0.0  ;;  %v264_v40 = vmul.f32 %v620_v48, %v620_v48 }
  0x27   :  { %v121_v9 = vadd.f32 %v120_v39, %v119_v0  ;;  %v286_v14 = vadd.f32 %v285_v35, %v284_v34  ;;  %v287_v41 = vsel %vm82_vm1, %v222_v37, 0.0  ;;  %v265_v42 = vmul.f32 %v637_v53, %v637_v53  ;;  %v1392_v0 = vld [vmem:[#allocation26_spill] sm:$0xff] }
  0x28   :  { %v266_v46 = vmul.f32 %v642_v54, %v642_v54  ;;  %v267_v47 = vmul.f32 %v647_v55, %v647_v55  ;;  %v289_v63 = vsel %vm82_vm1, %v223_v25, 0.0  ;;  %v268_v39 = vmul.f32 %v664_v59, %v664_v59  ;;  %v1393_v34 = vld [vmem:[#allocation30_spill] sm:$0xff] }
  0x29   :  { %v123_v24 = vadd.f32 %v122_v38, %v121_v9  ;;  %v269_v48 = vmul.f32 %v669_v60, %v669_v60  ;;  %v288_v31 = vadd.f32 %v287_v41, %v286_v14  ;;  %v270_v37 = vmul.f32 %v674_v61, %v674_v61  ;;  %v1394_v41 = vld [vmem:[#allocation49_spill] sm:$0xff] }
  0x2a   :  { %v271_v53 = vmul.f32 %v691_v5, %v691_v5  ;;  %v272_v54 = vmul.f32 %v696_v6, %v696_v6  ;;  %v291_v55 = vsel %vm82_vm1, %v224_v52, 0.0  ;;  %v273_v38 = vmul.f32 %v701_v8, %v701_v8 }
  0x2b   :  { %v125_v25 = vadd.f32 %v124_v51, %v123_v24  ;;  %v274_v59 = vmul.f32 %v723_v15, %v723_v15  ;;  %v290_v60 = vadd.f32 %v289_v63, %v288_v31  ;;  %v275_v36 = vmul.f32 %v728_v17, %v728_v17 }
  0x2c   :  { %v276_v61 = vmul.f32 %v733_v20, %v733_v20  ;;  %v277_v5 = vmul.f32 %v750_v49, %v750_v49  ;;  %v293_v6 = vsel %vm82_vm1, %v225_v56, 0.0  ;;  %v278_v52 = vmul.f32 %v755_v30, %v755_v30 }
  0x2d   :  { %v127_v51 = vadd.f32 %v915_v3, %v125_v25  ;;  %v279_v8 = vmul.f32 %v760_v62, %v760_v62  ;;  %v292_v15 = vadd.f32 %v291_v55, %v290_v60  ;;  %v280_v17 = vmul.f32 %v777_v12, %v777_v12  ;;  %v1396_v25 = vld [vmem:[#allocation51_spill] sm:$0xff] }
  0x2e   :  { %v281_v20 = vmul.f32 %v782_v11, %v782_v11  ;;  %v282_v49 = vmul.f32 %v1392_v0, %v1392_v0  ;;  %v295_v56 = vsel %vm82_vm1, %v226_v1, 0.0  ;;  %v283_v30 = vmul.f32 %v1393_v34, %v1393_v34  ;;  %v1398_v34 = vld [vmem:[#allocation54_spill] sm:$0xff] }
  0x2f   :  { %v129_v3 = vadd.f32 %v931_v50, %v127_v51  ;;  %v294_v35 = vadd.f32 %v293_v6, %v292_v15  ;;  %v297_v62 = vsel %vm82_vm1, %v227_v26, 0.0  ;;  %v299_v9 = vsel %vm82_vm1, %v228_v10, 0.0 }
  0x30   :  { %v301_v12 = vsel %vm82_vm1, %v229_v44, 0.0  ;;  %v303_v14 = vsel %vm82_vm1, %v230_v57, 0.0  ;;  %v305_v11 = vsel %vm82_vm1, %v231_v7, 0.0  ;;  %v307_v1 = vsel %vm82_vm1, %v232_v13, 0.0  ;;  %v1395_v7 = vld [vmem:[#allocation50_spill] sm:$0xff] }
  0x31   :  { %v131_v63 = vadd.f32 %v1394_v41, %v129_v3  ;;  %v296_v24 = vadd.f32 %v295_v56, %v294_v35  ;;  %v1072_v50 = vsel %vm82_vm1, %v253_v18, 0.0  ;;  %v1075_v31 = vsel %vm82_vm1, %v254_v19, 0.0  ;;  %v1397_v56 = vld [vmem:[#allocation35_spill] sm:$0xff] }
  0x32   :  { %v1078_v26 = vsel %vm82_vm1, %v255_v21, 0.0  ;;  %v1081_v44 = vsel %vm82_vm1, %v256_v22, 0.0  ;;  %v1084_v57 = vsel %vm82_vm1, %v257_v23, 0.0  ;;  %v1088_v13 = vsel %vm82_vm1, %v258_v45, 0.0 }
  0x33   :  { %v133_v10 = vadd.f32 %v1395_v7, %v131_v63  ;;  %v298_v55 = vadd.f32 %v297_v62, %v296_v24  ;;  %v1091_v18 = vsel %vm82_vm1, %v259_v4, 0.0  ;;  %v1094_v19 = vsel %vm82_vm1, %v260_v27, 0.0  ;;  %v1399_v62 = vld [vmem:[#allocation36_spill] sm:$0xff] }
  0x34   :  { %v1097_v21 = vsel %vm82_vm1, %v261_v28, 0.0  ;;  %v1100_v22 = vsel %vm82_vm1, %v262_v29, 0.0  ;;  %v1103_v23 = vsel %vm82_vm1, %v263_v33, 0.0  ;;  %v1107_v45 = vsel %vm82_vm1, %v264_v40, 0.0 }
  0x35   :  { %v135_v60 = vadd.f32 %v1396_v25, %v133_v10  ;;  %v300_v6 = vadd.f32 %v299_v9, %v298_v55  ;;  %v1110_v4 = vsel %vm82_vm1, %v265_v42, 0.0  ;;  %v1113_v27 = vsel %vm82_vm1, %v266_v46, 0.0  ;;  %v1401_v10 = vld [vmem:[#allocation38_spill] sm:$0xff] }
  0x36   :  { %v1116_v28 = vsel %vm82_vm1, %v267_v47, 0.0  ;;  %v1119_v29 = vsel %vm82_vm1, %v268_v39, 0.0  ;;  %v1122_v33 = vsel %vm82_vm1, %v269_v48, 0.0  ;;  %v1126_v40 = vsel %vm82_vm1, %v270_v37, 0.0  ;;  %v1402_v25 = vld [vmem:[#allocation2_spill] sm:$0xff] }
  0x37   :  { %v137_v51 = vadd.f32 %v957_v58, %v135_v60  ;;  %v302_v15 = vadd.f32 %v301_v12, %v300_v6  ;;  %v1129_v42 = vsel %vm82_vm1, %v271_v53, 0.0  ;;  %v1132_v46 = vsel %vm82_vm1, %v272_v54, 0.0 }
  0x38   :  { %v1135_v47 = vsel %vm82_vm1, %v273_v38, 0.0  ;;  %v1138_v39 = vsel %vm82_vm1, %v274_v59, 0.0  ;;  %v1141_v48 = vsel %vm82_vm1, %v275_v36, 0.0  ;;  %v1145_v37 = vsel %vm82_vm1, %v276_v61, 0.0 }
  0x39   :  { %v139_v58 = vadd.f32 %v961_v32, %v137_v51  ;;  %v304_v0 = vadd.f32 %v303_v14, %v302_v15  ;;  %v1148_v53 = vsel %vm82_vm1, %v277_v5, 0.0  ;;  %v1151_v54 = vsel %vm82_vm1, %v278_v52, 0.0  ;;  %v1165_v32 = vld [vmem:[%s1318_s0 + $0xf8] sm:$0xff]  ;;  %v1403_v51 = vld [vmem:[#allocation39_spill] sm:$0xff] }
  0x3a   :  { %v1154_v38 = vsel %vm82_vm1, %v279_v8, 0.0  ;;  %v1157_v59 = vsel %vm82_vm1, %v280_v17, 0.0  ;;  %v1160_v36 = vsel %vm82_vm1, %v281_v20, 0.0  ;;  %v1169_v52 = vsel %vm82_vm1, %v282_v49, 0.0 }
  0x3b   :  { %v141_v61 = vadd.f32 %v967_v43, %v139_v58  ;;  %v306_v5 = vadd.f32 %v305_v11, %v304_v0  ;;  %v1172_v8 = vsel %vm82_vm1, %v283_v30, 0.0  ;;  %v144_v17 = vsel %vm82_vm1, %v1165_v32, 0.0  ;;  %v1183_v43 = vld [vmem:[%s1318_s0 + $0x100] sm:$0xff]  ;;  %v1404_v58 = vld [vmem:[#allocation3_spill] sm:$0xff] }
  0x3c   :  { %v235_v20 = vmul.f32 %v1397_v56, %v1397_v56  ;;  %v309_v3 = vsel %vm82_vm1, %v989_v16, 0.0  ;;  %v146_v30 = vsel %vm82_vm1, %v1183_v43, 0.0  ;;  %v236_v9 = vmul.f32 %v1399_v62, %v1399_v62  ;;  %v1400_v16 = vld [vmem:[#allocation37_spill] sm:$0xff] }
  0x3d   :  { %v143_v49 = vadd.f32 %v1398_v34, %v141_v61  ;;  %v308_v35 = vadd.f32 %v307_v1, %v306_v5  ;;  %v311_v12 = vsel %vm82_vm1, %v991_v2, 0.0  ;;  %v237_v41 = vmul.f32 %v1400_v16, %v1400_v16  ;;  %v1405_v5 = vld [vmem:[#allocation40_spill] sm:$0xff]  ;;  %v1408_v62 = vld [vmem:[#allocation5_spill] sm:$0xff] }
  0x3e   :  { %v313_v63 = vsel %vm82_vm1, %v235_v20, 0.0  ;;  %v238_v1 = vmul.f32 %v1401_v10, %v1401_v10  ;;  %v315_v55 = vsel %vm82_vm1, %v236_v9, 0.0  ;;  %v239_v2 = vmul.f32 %v1403_v51, %v1403_v51  ;;  %v1406_v20 = vld [vmem:[#allocation4_spill] sm:$0xff] }
  0x3f   :  { %v145_v14 = vadd.f32 %v144_v17, %v143_v49  ;;  %v310_v11 = vadd.f32 %v309_v3, %v308_v35  ;;  %v317_v15 = vsel %vm82_vm1, %v237_v41, 0.0  ;;  %v240_v17 = vmul.f32 %v1405_v5, %v1405_v5  ;;  %v1407_v49 = vld [vmem:[#allocation41_spill] sm:$0xff]  ;;  %v1410_v41 = vld [vmem:[#allocation6_spill] sm:$0xff] }
  0x40   :  { %v319_v56 = vsel %vm82_vm1, %v238_v1, 0.0  ;;  %v241_v35 = vmul.f32 %v1407_v49, %v1407_v49 }
  0x41   :  { %v147_v24 = vadd.f32 %v146_v30, %v145_v14  ;;  %v312_v7 = vadd.f32 %v311_v12, %v310_v11  ;;  %v321_v30 = vsel %vm82_vm1, %v239_v2, 0.0  ;;  %v1409_v14 = vld [vmem:[#allocation42_spill] sm:$0xff]  ;;  %v323_v16 = vsel %vm82_vm1, %v240_v17, 0.0 }
  0x42   :  { %v242_v11 = vmul.f32 %v1409_v14, %v1409_v14  ;;  %v325_v1 = vsel %vm82_vm1, %v241_v35, 0.0 }
  0x43   :  { %v149_v60 = vadd.f32 %v1402_v25, %v147_v24  ;;  %v314_v6 = vadd.f32 %v313_v63, %v312_v7  ;;  %v1411_v7 = vld [vmem:[#allocation43_spill] sm:$0xff] }
  0x44   :  { %v243_v10 = vmul.f32 %v1411_v7, %v1411_v7  ;;  %v327_v2 = vsel %vm82_vm1, %v242_v11, 0.0 }
  0x45   :  { %v151_v0 = vadd.f32 %v1404_v58, %v149_v60  ;;  %v316_v61 = vadd.f32 %v315_v55, %v314_v6  ;;  %v1412_v55 = vld [vmem:[#allocation7_spill] sm:$0xff]  ;;  %v1413_v6 = vld [vmem:[#allocation44_spill] sm:$0xff] }
  0x46   :  { %v244_v51 = vmul.f32 %v1413_v6, %v1413_v6  ;;  %v329_v17 = vsel %vm82_vm1, %v243_v10, 0.0 }
  0x47   :  { %v153_v3 = vadd.f32 %v1406_v20, %v151_v0  ;;  %v318_v34 = vadd.f32 %v317_v15, %v316_v61  ;;  %v1414_v15 = vld [vmem:[#allocation8_spill] sm:$0xff]  ;;  %v1415_v61 = vld [vmem:[#allocation45_spill] sm:$0xff] }
  0x48   :  { %v245_v5 = vmul.f32 %v1415_v61, %v1415_v61  ;;  %v331_v35 = vsel %vm82_vm1, %v244_v51, 0.0 }
  0x49   :  { %v155_v9 = vadd.f32 %v1408_v62, %v153_v3  ;;  %v320_v12 = vadd.f32 %v319_v56, %v318_v34  ;;  %v1416_v56 = vld [vmem:[#allocation9_spill] sm:$0xff]  ;;  %v1417_v34 = vld [vmem:[#allocation46_spill] sm:$0xff] }
  0x4a   :  { %v246_v49 = vmul.f32 %v1417_v34, %v1417_v34  ;;  %v333_v11 = vsel %vm82_vm1, %v245_v5, 0.0 }
  0x4b   :  { %v157_v63 = vadd.f32 %v1410_v41, %v155_v9  ;;  %v322_v24 = vadd.f32 %v321_v30, %v320_v12  ;;  %v1418_v30 = vld [vmem:[#allocation10_spill] sm:$0xff]  ;;  %v1419_v12 = vld [vmem:[#allocation47_spill] sm:$0xff] }
  0x4c   :  { %v247_v14 = vmul.f32 %v1419_v12, %v1419_v12  ;;  %v335_v10 = vsel %vm82_vm1, %v246_v49, 0.0  ;;  %v1427_v49 = vld [vmem:[#allocation15_spill] sm:$0xff]  ;;  %v1428_v12 = vld [vmem:[#allocation16_spill] sm:$0xff] }
  0x4d   :  { %v159_v25 = vadd.f32 %v1412_v55, %v157_v63  ;;  %v324_v60 = vadd.f32 %v323_v16, %v322_v24  ;;  %v1420_v16 = vld [vmem:[#allocation11_spill] sm:$0xff]  ;;  %v1421_v24 = vld [vmem:[#allocation48_spill] sm:$0xff] }
  0x4e   :  { %v248_v7 = vmul.f32 %v1421_v24, %v1421_v24  ;;  %v337_v51 = vsel %vm82_vm1, %v247_v14, 0.0 }
  0x4f   :  { %v161_v58 = vadd.f32 %v1414_v15, %v159_v25  ;;  %v326_v0 = vadd.f32 %v325_v1, %v324_v60  ;;  %v1422_v1 = vld [vmem:[#allocation12_spill] sm:$0xff] }
  0x50   :  { %v1423_v60 = vld [vmem:[#allocation52_spill] sm:$0xff]  ;;  %v339_v5 = vsel %vm82_vm1, %v248_v7, 0.0  ;;  %v1430_v7 = vld [vmem:[#allocation18_spill] sm:$0xff] }
  0x51   :  { %v163_v20 = vadd.f32 %v1416_v56, %v161_v58  ;;  %v328_v3 = vadd.f32 %v327_v2, %v326_v0  ;;  %v249_v6 = vmul.f32 %v1423_v60, %v1423_v60  ;;  %v1424_v2 = vld [vmem:[#allocation13_spill] sm:$0xff] }
  0x52   :  { %v1425_v0 = vld [vmem:[#allocation53_spill] sm:$0xff] }
  0x53   :  { %v165_v62 = vadd.f32 %v1418_v30, %v163_v20  ;;  %v330_v9 = vadd.f32 %v329_v17, %v328_v3  ;;  %v250_v61 = vmul.f32 %v1425_v0, %v1425_v0  ;;  %v1426_v17 = vld [vmem:[#allocation14_spill] sm:$0xff]  ;;  %v251_v3 = vmul.f32 %v1165_v32, %v1165_v32 }
  0x54   :  { %v341_v34 = vsel %vm82_vm1, %v249_v6, 0.0  ;;  %v1432_v6 = vld [vmem:[#allocation20_spill] sm:$0xff]  ;;  %v1434_v0 = vld [vmem:[#allocation22_spill] sm:$0xff] }
  0x55   :  { %v167_v41 = vadd.f32 %v1420_v16, %v165_v62  ;;  %v332_v63 = vadd.f32 %v331_v35, %v330_v9  ;;  %v252_v62 = vmul.f32 %v1183_v43, %v1183_v43  ;;  %v343_v9 = vsel %vm82_vm1, %v250_v61, 0.0 }
  0x56   :  { %v345_v16 = vsel %vm82_vm1, %v251_v3, 0.0  ;;  %v1436_v3 = vld [vmem:[#allocation24_spill] sm:$0xff] }
  0x57   :  { %v169_v55 = vadd.f32 %v1422_v1, %v167_v41  ;;  %v334_v25 = vadd.f32 %v333_v11, %v332_v63  ;;  %v1429_v41 = vld [vmem:[#allocation17_spill] sm:$0xff]  ;;  %v347_v32 = vsel %vm82_vm1, %v252_v62, 0.0  ;;  %v1438_v62 = vld [vmem:[#allocation27_spill] sm:$0xff] }
  0x59   :  { %v171_v15 = vadd.f32 %v1424_v2, %v169_v55  ;;  %v336_v58 = vadd.f32 %v335_v10, %v334_v25  ;;  %v1431_v55 = vld [vmem:[#allocation19_spill] sm:$0xff]  ;;  %v1433_v2 = vld [vmem:[#allocation21_spill] sm:$0xff] }
  0x5b   :  { %v173_v56 = vadd.f32 %v1426_v17, %v171_v15  ;;  %v338_v20 = vadd.f32 %v337_v51, %v336_v58  ;;  %v1435_v17 = vld [vmem:[#allocation23_spill] sm:$0xff] }
  0x5d   :  { %v175_v35 = vadd.f32 %v1427_v49, %v173_v56  ;;  %v340_v30 = vadd.f32 %v339_v5, %v338_v20 }
  0x5f   :  { %v177_v14 = vadd.f32 %v1428_v12, %v175_v35  ;;  %v342_v11 = vadd.f32 %v341_v34, %v340_v30  ;;  %v1437_v35 = vld [vmem:[#allocation25_spill] sm:$0xff]  ;;  %v1439_v12 = vld [vmem:[#allocation28_spill] sm:$0xff] }
  0x61   :  { %v179_v63 = vadd.f32 %v1429_v41, %v177_v14  ;;  %v344_v24 = vadd.f32 %v343_v9, %v342_v11  ;;  %v1440_v11 = vld [vmem:[#allocation29_spill] sm:$0xff]  ;;  %v1441_v41 = vld [vmem:[#allocation31_spill] sm:$0xff] }
  0x63   :  { %v181_v10 = vadd.f32 %v1430_v7, %v179_v63  ;;  %v346_v1 = vadd.f32 %v345_v16, %v344_v24  ;;  %v1442_v24 = vld [vmem:[#allocation32_spill] sm:$0xff]  ;;  %v1443_v7 = vld [vmem:[#allocation33_spill] sm:$0xff] }
  0x65   :  { %v183_v25 = vadd.f32 %v1431_v55, %v181_v10  ;;  %v348_v60 = vadd.f32 %v347_v32, %v346_v1  ;;  %v1444_v1 = vld [vmem:[#allocation34_spill] sm:$0xff] }
  0x67   :  { %v185_v43 = vadd.f32 %v1432_v6, %v183_v25  ;;  %v350_v51 = vadd.f32 %v1072_v50, %v348_v60 }
  0x69   :  { %v187_v15 = vadd.f32 %v1433_v2, %v185_v43  ;;  %v352_v58 = vadd.f32 %v1075_v31, %v350_v51 }
  0x6b   :  { %v189_v61 = vadd.f32 %v1434_v0, %v187_v15  ;;  %v354_v5 = vadd.f32 %v1078_v26, %v352_v58 }
  0x6d   :  { %v191_v56 = vadd.f32 %v1435_v17, %v189_v61  ;;  %v356_v20 = vadd.f32 %v1081_v44, %v354_v5 }
  0x6f   :  { %v193_v34 = vadd.f32 %v1436_v3, %v191_v56  ;;  %v358_v49 = vadd.f32 %v1084_v57, %v356_v20 }
  0x71   :  { %v195_v30 = vadd.f32 %v1437_v35, %v193_v34  ;;  %v360_v50 = vadd.f32 %v1088_v13, %v358_v49 }
  0x73   :  { %v197_v9 = vadd.f32 %v1438_v62, %v195_v30  ;;  %v362_v31 = vadd.f32 %v1091_v18, %v360_v50 }
  0x75   :  { %v199_v14 = vadd.f32 %v1439_v12, %v197_v9  ;;  %v364_v26 = vadd.f32 %v1094_v19, %v362_v31 }
  0x77   :  { %v201_v16 = vadd.f32 %v1440_v11, %v199_v14  ;;  %v366_v44 = vadd.f32 %v1097_v21, %v364_v26 }
  0x79   :  { %v203_v63 = vadd.f32 %v1441_v41, %v201_v16  ;;  %v368_v57 = vadd.f32 %v1100_v22, %v366_v44 }
  0x7b   :  { %v205_v32 = vadd.f32 %v1442_v24, %v203_v63  ;;  %v370_v13 = vadd.f32 %v1103_v23, %v368_v57 }
  0x7d   :  { %v207_v10 = vadd.f32 %v1443_v7, %v205_v32  ;;  %v372_v18 = vadd.f32 %v1107_v45, %v370_v13  ;;  %v81_v45 = vld [vmem:[%s1319_s1] sm:$0x1] }
  0x7f   :  { %v209_v55 = vadd.f32 %v1444_v1, %v207_v10  ;;  %v374_v19 = vadd.f32 %v1110_v4, %v372_v18 }
  0x81   :  { %v210_v25 = vrot.slane %v209_v55, 4  ;;  %v376_v60 = vadd.f32 %v1113_v27, %v374_v19 }
  0x83   :  { %v211_v21 = vadd.f32 %v210_v25, %v209_v55  ;;  %v378_v6 = vadd.f32 %v1116_v28, %v376_v60 }
  0x85   :  { %v212_v43 = vrot.slane %v211_v21, 2  ;;  %v380_v22 = vadd.f32 %v1119_v29, %v378_v6 }
  0x87   :  { %v213_v51 = vadd.f32 %v212_v43, %v211_v21  ;;  %v382_v23 = vadd.f32 %v1122_v33, %v380_v22 }
  0x89   :  { %v214_v2 = vrot.slane %v213_v51, 1  ;;  %v384_v15 = vadd.f32 %v1126_v40, %v382_v23 }
  0x8b   :  { %v215_v4 = vadd.f32 %v214_v2, %v213_v51  ;;  %v386_v58 = vadd.f32 %v1129_v42, %v384_v15 }
  0x8d   :  { %v216_v27 = vadd.f32 %v215_v4, %v81_v45  ;;  %v388_v0 = vadd.f32 %v1132_v46, %v386_v58 }
  0x8f   :  { %218 = vst.msk [vmem:[%s1319_s1] sm:$0x1] %vm14_vm0, %v216_v27  ;;  %v390_v28 = vadd.f32 %v1135_v47, %v388_v0 }
  0x91   :  { %v392_v29 = vadd.f32 %v1138_v39, %v390_v28 }
  0x93   :  { %v394_v33 = vadd.f32 %v1141_v48, %v392_v29 }
  0x95   :  { %v396_v40 = vadd.f32 %v1145_v37, %v394_v33  ;;  %v219_v37 = vld [vmem:[%s1320_s2] sm:$0x1] }
  0x97   :  { %v398_v61 = vadd.f32 %v1148_v53, %v396_v40 }
  0x99   :  { %v400_v42 = vadd.f32 %v1151_v54, %v398_v61 }
  0x9b   :  { %v402_v5 = vadd.f32 %v1154_v38, %v400_v42 }
  0x9d   :  { %v404_v46 = vadd.f32 %v1157_v59, %v402_v5 }
  0x9f   :  { %v406_v17 = vadd.f32 %v1160_v36, %v404_v46 }
  0xa1   :  { %v408_v56 = vadd.f32 %v1169_v52, %v406_v17 }
  0xa3   :  { %v410_v47 = vadd.f32 %v1172_v8, %v408_v56 }
  0xa5   :  { %v411_v20 = vrot.slane %v410_v47, 4 }
  0xa7   :  { %v412_v39 = vadd.f32 %v411_v20, %v410_v47 }
  0xa9   :  { %v413_v3 = vrot.slane %v412_v39, 2 }
  0xab   :  { %v414_v48 = vadd.f32 %v413_v3, %v412_v39 }
  0xad   :  { %v415_v34 = vrot.slane %v414_v48, 1 }
  0xaf   :  { %v416_v53 = vadd.f32 %v415_v34, %v414_v48 }
  0xb1   :  { %v417_v54 = vadd.f32 %v416_v53, %v219_v37 }
  0xb3   :  { %418 = vst.msk [vmem:[%s1320_s2] sm:$0x1] %vm14_vm0, %v417_v54 }

// kernel: basic_block_forward.5
= control target key start
LH: loop header
LB: loop body
LE: loop exit
PB: predicated region body
PF: predicated region fallthrough
CT: control target
= control target key end

     0   :  { %s4110_s18 = smov 0   ;;  %s5478_s0 = inlined_call_operand.vmem [shape: f32[2,18,18,4], index: 0, kind: input, shape index: {}]   ;;  %s5479_s1 = inlined_call_operand.vmem [shape: f32[18,18,1], index: 1, kind: input, shape index: {}]   ;;  %s5480_s2 = inlined_call_operand.vmem [shape: f32[1,4], index: 2, kind: input, shape index: {}]   ;;  %s5481_s3 = inlined_call_operand.vmem [shape: f32[1,4], index: 3, kind: input, shape index: {}]   ;;  %s5482_s4 = inlined_call_operand.vmem [shape: bf16[9,4,8], index: 4, kind: input, shape index: {}]   ;;  %s5483_s5 = inlined_call_operand.vmem [shape: f32[2,256,8], index: 5, kind: output, shape index: {}]  }
   0x1 LB: > { %s3165_s19 = sadd.s32 4294967295, %s4077_s18   ;;  %p3169_p0 = scmp.ge.s32.totalorder %s4077_s18, 1  ;;  %s4077_s18 = sphi %s4110_s18, %s15_s18  }
   0x2   : > { %p187_p1 = scmp.lt.s32.totalorder %s4077_s18, 3 }
   0x4   : > { %p188_p2 = pnand %p3169_p0, %p187_p1 }
   0x6   : > { %191 = sbr.rel (%p188_p2) target bundleno = 685 (0x2ad), region = 40 }
   0xd   : > { %v458_v0 = vld [vmem:[%s5479_s1 + $0x10] sm:$0x3]  ;;  %v456_v1 = vld [vmem:[%s5479_s1] sm:$0xff]  ;;  %v4079_v2 = vmov 0   ;;  %v459_v3 = vld [vmem:[%s5479_s1 + $0x18] sm:$0xff]  ;;  %vm1079_vm0 = vcmask 1041408  }
   0xe   : > { %4068 = vset.pattern.permute.xlu1 %v4079_v2  ;;  %4067 = vset.pattern.permute.xlu0 %v4079_v2  ;;  %v457_v4 = vld [vmem:[%s5479_s1 + $0x8] sm:$0xff]  ;;  %v460_v6 = vld [vmem:[%s5479_s1 + $0x20] sm:$0xff]  ;;  %v463_v7 = vld [vmem:[%s5479_s1 + $0x38] sm:$0xff]  ;;  %p215_p3 = scmp.lt.s32.totalorder %s3165_s19, 1  ;;  %vm899_vm1 = vcmask 1046528   ;;  %vm1456_vm2 = vcmask 1045504  }
   0xf   : > { %522 = vperm.xlu1 %4068, %v458_v0   ;;  %512 = vperm.xlu0 %4067, %v456_v1   ;;  %v461_v5 = vld [vmem:[%s5479_s1 + $0x28] sm:$0x3]  ;;  %v462_v8 = vld [vmem:[%s5479_s1 + $0x30] sm:$0xff]  ;;  %v464_v10 = vld [vmem:[%s5479_s1 + $0x40] sm:$0x3]  ;;  %vm1030_vm3 = vcmask 31744  }
  0x10   : > { %v465_v9 = vld [vmem:[%s5479_s1 + $0x48] sm:$0xff]  ;;  %v467_v11 = vld [vmem:[%s5479_s1 + $0x58] sm:$0x3]  ;;  %v466_v12 = vld [vmem:[%s5479_s1 + $0x50] sm:$0xff]  ;;  %s5574_s19 = smov (!%p215_p3, %s3165_s19), 1  ;;  %vm3077_vm4 = vcmask 64512  }
  0x11   : > { %v3175_v13 = vld [vmem:[%s5482_s4 + $0x2] sm:$0x3]  ;;  %v3242_v15 = vld [vmem:[%s5482_s4 + $0x8] sm:$0x3]  ;;  %v471_v19 = vld [vmem:[%s5479_s1 + $0x78] sm:$0xff]  ;;  %s4057_s21 = smul.u32 432, %s5574_s19 }
  0x12   : > { %4047 = vmatprep.subr.msk.bf16.mxu1 %vm1079_vm0, %v3175_v13  ;;  %v1081_v14 = vsel %vm1079_vm0, %v3175_v13, 0  ;;  %v469_v16 = vld [vmem:[%s5479_s1 + $0x68] sm:$0xff]  ;;  %v468_v17 = vld [vmem:[%s5479_s1 + $0x60] sm:$0xff]  ;;  %4051 = vmatprep.subr.msk.bf16.mxu0 %vm1079_vm0, %v3242_v15  ;;  %v4170_v18 = vsel %vm1079_vm0, %v3242_v15, 0  ;;  %v470_v20 = vld [vmem:[%s5479_s1 + $0x70] sm:$0x3] }
  0x13   : > { %527 = vperm.xlu1 %4068, %v459_v3   ;;  %517 = vperm.xlu0 %4067, %v457_v4   ;;  %5509 = vst [vmem:[#allocation2_spill] sm:$0xff] %v4170_v18  ;;  %v473_v21 = vld [vmem:[%s5479_s1 + $0x88] sm:$0x3]  ;;  %v472_v22 = vld [vmem:[%s5479_s1 + $0x80] sm:$0xff]  ;;  %v475_v23 = vld [vmem:[%s5479_s1 + $0x98] sm:$0xff]  ;;  %s4317_s24 = scalar_lea.vmem %s5478_s0, %s4057_s21  ;;  %s3329_s20 = sshll.u32 %s5574_s19, 8 }
  0x14   : > { %3484 = vmatpush3.bf16.msra.mxu1 %v1081_v14  ;;  %3620 = vmatpush3.bf16.msra.mxu0 %v4170_v18  ;;  %v474_v24 = vld [vmem:[%s5479_s1 + $0x90] sm:$0xff]  ;;  %v477_v25 = vld [vmem:[%s5479_s1 + $0xa8] sm:$0xff]  ;;  %v476_v26 = vld [vmem:[%s5479_s1 + $0xa0] sm:$0x3]  ;;  %s5409_s23 = scalar_lea.vmem %s5483_s5, %s3329_s20 }
  0x15   : > { %v479_v27 = vld [vmem:[%s5479_s1 + $0xb8] sm:$0x3]  ;;  %v478_v28 = vld [vmem:[%s5479_s1 + $0xb0] sm:$0xff]  ;;  %v4206_v29 = vld [vmem:[%s5482_s4] sm:$0x3] }
  0x16   : > { %v4211_v30 = vld [vmem:[%s5482_s4 + $0xa] sm:$0x3]  ;;  %v480_v32 = vld [vmem:[%s5479_s1 + $0xc0] sm:$0xff]  ;;  %4048 = vmatprep.subr.msk.bf16.mxu1 %vm1079_vm0, %v4206_v29  ;;  %v483_v33 = vld [vmem:[%s5479_s1 + $0xd8] sm:$0xff] }
  0x17   : > { %537 = vperm.xlu1 %4068, %v461_v5   ;;  %532 = vperm.xlu0 %4067, %v460_v6   ;;  %v481_v31 = vld [vmem:[%s5479_s1 + $0xc8] sm:$0xff]  ;;  %v482_v34 = vld [vmem:[%s5479_s1 + $0xd0] sm:$0x3]  ;;  %v484_v36 = vld [vmem:[%s5479_s1 + $0xe0] sm:$0xff] }
  0x18   : > { %4053 = vmatprep.subr.msk.bf16.mxu0 %vm1079_vm0, %v4211_v30  ;;  %v485_v35 = vld [vmem:[%s5479_s1 + $0xe8] sm:$0x3]  ;;  %v487_v37 = vld [vmem:[%s5479_s1 + $0xf8] sm:$0xff]  ;;  %v486_v38 = vld [vmem:[%s5479_s1 + $0xf0] sm:$0xff] }
  0x19   : > { %v489_v39 = vld [vmem:[%s5479_s1 + $0x108] sm:$0xff]  ;;  %v488_v40 = vld [vmem:[%s5479_s1 + $0x100] sm:$0x3]  ;;  %v491_v41 = vld [vmem:[%s5479_s1 + $0x118] sm:$0x3] }
  0x1a   : > { %v490_v42 = vld [vmem:[%s5479_s1 + $0x110] sm:$0xff]  ;;  %v493_v43 = vld [vmem:[%s5479_s1 + $0x128] sm:$0xff]  ;;  %v492_v44 = vld [vmem:[%s5479_s1 + $0x120] sm:$0xff] }
  0x1b   : > { %547 = vperm.xlu1 %4068, %v463_v7   ;;  %542 = vperm.xlu0 %4067, %v462_v8   ;;  %v495_v45 = vld [vmem:[%s5479_s1 + $0x138] sm:$0xff]  ;;  %v494_v46 = vld [vmem:[%s5479_s1 + $0x130] sm:$0x3]  ;;  %v497_v47 = vld [vmem:[%s5479_s1 + $0x148] sm:$0x3] }
  0x1c   : > { %v496_v48 = vld [vmem:[%s5479_s1 + $0x140] sm:$0xff]  ;;  %v499_v49 = vld [vmem:[%s5479_s1 + $0x158] sm:$0xff]  ;;  %v498_v50 = vld [vmem:[%s5479_s1 + $0x150] sm:$0xff] }
  0x1d   : > { %v501_v51 = vld [vmem:[%s5479_s1 + $0x168] sm:$0xff]  ;;  %v500_v52 = vld [vmem:[%s5479_s1 + $0x160] sm:$0x3]  ;;  %v503_v53 = vld [vmem:[%s5479_s1 + $0x178] sm:$0x3] }
  0x1e   : > { %v502_v54 = vld [vmem:[%s5479_s1 + $0x170] sm:$0xff]  ;;  %v505_v55 = vld [vmem:[%s5479_s1 + $0x188] sm:$0xff]  ;;  %v504_v56 = vld [vmem:[%s5479_s1 + $0x180] sm:$0xff] }
  0x1f   : > { %557 = vperm.xlu1 %4068, %v465_v9   ;;  %552 = vperm.xlu0 %4067, %v464_v10   ;;  %v507_v57 = vld [vmem:[%s5479_s1 + $0x198] sm:$0xff]  ;;  %v506_v58 = vld [vmem:[%s5479_s1 + $0x190] sm:$0x3]  ;;  %v509_v59 = vld [vmem:[%s5479_s1 + $0x1a8] sm:$0x3] }
  0x20   : > { %v508_v60 = vld [vmem:[%s5479_s1 + $0x1a0] sm:$0xff]  ;;  %v228_v61 = vld [vmem:[%s4317_s24 + $0x10] sm:$0x3]  ;;  %v227_v1 = vld [vmem:[%s4317_s24 + $0x8] sm:$0xff] }
  0x21   : > { %v4323_v62 = vld [vmem:[%s5480_s2] ss:$0 sm:$0xff]  ;;  %v229_v4 = vld [vmem:[%s4317_s24 + $0x18] sm:$0xff]  ;;  %v231_v6 = vld [vmem:[%s4317_s24 + $0x28] sm:$0x3] }
  0x22   : > { %v226_v63 = vld [vmem:[%s4317_s24] sm:$0xff]  ;;  %v289_v0 = vmul.f32 %v4323_v62, %v228_v61  ;;  %v288_v5 = vmul.f32 %v4323_v62, %v227_v1  ;;  %v233_v9 = vld [vmem:[%s4317_s24 + $0x38] sm:$0xff]  ;;  %v292_v13 = vmul.f32 %v4323_v62, %v231_v6 }
  0x23   : > { %567 = vperm.xlu1 %4068, %v467_v11   ;;  %562 = vperm.xlu0 %4067, %v466_v12   ;;  %v4331_v2 = vld [vmem:[%s5481_s3] ss:$0 sm:$0xff]  ;;  %v287_v3 = vmul.f32 %v4323_v62, %v226_v63  ;;  %v290_v11 = vmul.f32 %v4323_v62, %v229_v4  ;;  %v232_v12 = vld [vmem:[%s4317_s24 + $0x30] sm:$0xff] }
  0x24   : > { %v230_v7 = vld [vmem:[%s4317_s24 + $0x20] sm:$0xff]  ;;  %v350_v8 = vadd.f32 %v4331_v2, %v289_v0  ;;  %v349_v15 = vadd.f32 %v4331_v2, %v288_v5 }
  0x25   : > { %v348_v10 = vadd.f32 %v4331_v2, %v287_v3  ;;  %v291_v14 = vmul.f32 %v4323_v62, %v230_v7 }
  0x27   : > { %577 = vperm.xlu1 %4068, %v469_v16   ;;  %572 = vperm.xlu0 %4067, %v468_v17   ;;  %v294_v16 = vmul.f32 %v4323_v62, %v233_v9  ;;  %v404_v17 = vmax.f32 %v350_v8, 0.0 }
  0x2b   : > { %587 = vperm.xlu1 %4068, %v471_v19   ;;  %582 = vperm.xlu0 %4067, %v470_v20   ;;  %v293_v19 = vmul.f32 %v4323_v62, %v232_v12  ;;  %v235_v20 = vld [vmem:[%s4317_s24 + $0x48] sm:$0xff] }
  0x2f   : > { %597 = vperm.xlu1 %4068, %v473_v21   ;;  %592 = vperm.xlu0 %4067, %v472_v22   ;;  %v402_v21 = vmax.f32 %v348_v10, 0.0  ;;  %v351_v22 = vadd.f32 %v4331_v2, %v290_v11 }
  0x33   : > { %607 = vperm.xlu1 %4068, %v475_v23   ;;  %602 = vperm.xlu0 %4067, %v474_v24  }
  0x37   : > { %617 = vperm.xlu1 %4068, %v477_v25   ;;  %612 = vperm.xlu0 %4067, %v476_v26   ;;  %v353_v25 = vadd.f32 %v4331_v2, %v292_v13  ;;  %v352_v26 = vadd.f32 %v4331_v2, %v291_v14  ;;  %v241_v14 = vld [vmem:[%s4317_s24 + $0x78] sm:$0xff] }
  0x3b   : > { %627 = vperm.xlu1 %4068, %v479_v27   ;;  %622 = vperm.xlu0 %4067, %v478_v28   ;;  %v403_v27 = vmax.f32 %v349_v15, 0.0  ;;  %v355_v28 = vadd.f32 %v4331_v2, %v294_v16 }
  0x3f   : > { %637 = vperm.xlu1 %4068, %v481_v31   ;;  %632 = vperm.xlu0 %4067, %v480_v32   ;;  %v296_v31 = vmul.f32 %v4323_v62, %v235_v20  ;;  %v234_v32 = vld [vmem:[%s4317_s24 + $0x40] sm:$0x3] }
  0x43   : > { %647 = vperm.xlu1 %4068, %v483_v33   ;;  %642 = vperm.xlu0 %4067, %v482_v34   ;;  %v354_v34 = vadd.f32 %v4331_v2, %v293_v19 }
  0x47   : > { %657 = vperm.xlu1 %4068, %v485_v35   ;;  %652 = vperm.xlu0 %4067, %v484_v36   ;;  %v237_v35 = vld [vmem:[%s4317_s24 + $0x58] sm:$0x3] }
  0x4b   : > { %667 = vperm.xlu1 %4068, %v487_v37   ;;  %662 = vperm.xlu0 %4067, %v486_v38   ;;  %v405_v37 = vmax.f32 %v351_v22, 0.0  ;;  %v236_v38 = vld [vmem:[%s4317_s24 + $0x50] sm:$0xff] }
  0x4f   : > { %677 = vperm.xlu1 %4068, %v489_v39   ;;  %672 = vperm.xlu0 %4067, %v488_v40   ;;  %v239_v39 = vld [vmem:[%s4317_s24 + $0x68] sm:$0xff] }
  0x53   : > { %687 = vperm.xlu1 %4068, %v491_v41   ;;  %682 = vperm.xlu0 %4067, %v490_v42   ;;  %v407_v42 = vmax.f32 %v353_v25, 0.0 }
  0x57   : > { %697 = vperm.xlu1 %4068, %v493_v43   ;;  %692 = vperm.xlu0 %4067, %v492_v44   ;;  %v406_v43 = vmax.f32 %v352_v26, 0.0  ;;  %v295_v44 = vmul.f32 %v4323_v62, %v234_v32  ;;  %v302_v32 = vmul.f32 %v4323_v62, %v241_v14 }
  0x59   : > { %v356_v0 = vadd.f32 %v4331_v2, %v295_v44 }
  0x5b   : > { %707 = vperm.xlu1 %4068, %v495_v45   ;;  %702 = vperm.xlu0 %4067, %v494_v46   ;;  %v409_v46 = vmax.f32 %v355_v28, 0.0 }
  0x5f   : > { %717 = vperm.xlu1 %4068, %v497_v47   ;;  %712 = vperm.xlu0 %4067, %v496_v48   ;;  %v4365_v47 = vadd.f32 %v4331_v2, %v296_v31  ;;  %v298_v48 = vmul.f32 %v4323_v62, %v237_v35 }
  0x61   : > { %v359_v19 = vadd.f32 %v4331_v2, %v298_v48  ;;  %v411_v35 = vmax.f32 %v4365_v47, 0.0  ;;  %v242_v48 = vld [vmem:[%s4317_s24 + $0x80] sm:$0xff] }
  0x63   : > { %727 = vperm.xlu1 %4068, %v499_v49   ;;  %722 = vperm.xlu0 %4067, %v498_v50   ;;  %v408_v50 = vmax.f32 %v354_v34, 0.0 }
  0x67   : > { %737 = vperm.xlu1 %4068, %v501_v51   ;;  %732 = vperm.xlu0 %4067, %v500_v52   ;;  %v297_v51 = vmul.f32 %v4323_v62, %v236_v38  ;;  %v300_v52 = vmul.f32 %v4323_v62, %v239_v39  ;;  %v4428_v39 = vld [vmem:[%s5482_s4 + $0x4] sm:$0x3] }
  0x69   : > { %v358_v20 = vadd.f32 %v4331_v2, %v297_v51  ;;  %v361_v31 = vadd.f32 %v4331_v2, %v300_v52  ;;  %v4441_v52 = vadd.f32 %v4331_v2, %v302_v32 }
  0x6b   : > { %747 = vperm.xlu1 %4068, %v503_v53   ;;  %742 = vperm.xlu0 %4067, %v502_v54   ;;  %v412_v47 = vmax.f32 %v358_v20, 0.0  ;;  %v415_v51 = vmax.f32 %v361_v31, 0.0 }
  0x6f   : > { %757 = vperm.xlu1 %4068, %v505_v55   ;;  %752 = vperm.xlu0 %4067, %v504_v56   ;;  %v263_v55 = vld [vmem:[%s4317_s24 + $0x128] sm:$0xff] }
  0x73   : > { %767 = vperm.xlu1 %4068, %v507_v57   ;;  %762 = vperm.xlu0 %4067, %v506_v58   ;;  %v238_v57 = vld [vmem:[%s4317_s24 + $0x60] sm:$0xff] }
  0x74   : > { %v299_v7 = vmul.f32 %v4323_v62, %v238_v57 }
  0x77   : > { %777 = vperm.xlu1 %4068, %v509_v59   ;;  %772 = vperm.xlu0 %4067, %v508_v60  }
  0x8e   : > { %v523_v23 = vpop.permute.xlu1 %522  ;;  %v513_v24 = vpop.permute.xlu0 %512 }
  0x8f   : > { %v782_v33 = vmul.f32 %v523_v23, %v404_v17  ;;  %v4357_v36 = vmul.f32 %v513_v24, %v402_v21  ;;  %v410_v17 = vmax.f32 %v356_v0, 0.0  ;;  %v240_v21 = vld [vmem:[%s4317_s24 + $0x70] sm:$0x3] }
  0x90   : > { %v301_v38 = vmul.f32 %v4323_v62, %v240_v21 }
  0x91   : > { %v903_v49 = vrot.slane %v782_v33, 1  ;;  %v900_v53 = vrot.slane %v4357_v36, 1  ;;  %v1460_v58 = vrot.slane %v782_v33, 2  ;;  %v1457_v59 = vrot.slane %v4357_v36, 2 }
  0x92   : > { %v528_v40 = vpop.permute.xlu1 %527  ;;  %v518_v41 = vpop.permute.xlu0 %517  ;;  %v1293_v33 = vsel %vm1079_vm0, %v4206_v29, 0 }
  0x93   : > { %v4362_v45 = vmul.f32 %v518_v41, %v403_v27  ;;  %v4371_v54 = vmul.f32 %v528_v40, %v405_v37  ;;  %v243_v27 = vld [vmem:[%s4317_s24 + $0x88] sm:$0x3]  ;;  %v360_v37 = vadd.f32 %v4331_v2, %v299_v7  ;;  %v413_v41 = vmax.f32 %v359_v19, 0.0 }
  0x94   : > { %v2259_v19 = vsel %vm1079_vm0, %v4211_v30, 0 }
  0x95   : > { %v901_v56 = vrot.slane %v4362_v45, 1  ;;  %v1458_v60 = vrot.slane %v4362_v45, 2  ;;  %v905_v10 = vrot.slane %v4371_v54, 1  ;;  %v414_v57 = vmax.f32 %v360_v37, 0.0  ;;  %v248_v37 = vld [vmem:[%s4317_s24 + $0xb0] sm:$0xff] }
  0x96   : > { %v538_v61 = vpop.permute.xlu1 %537  ;;  %v533_v63 = vpop.permute.xlu0 %532 }
  0x97   : > { %v4380_v1 = vmul.f32 %v538_v61, %v407_v42  ;;  %v4382_v3 = vmul.f32 %v533_v63, %v406_v43  ;;  %v902_v4 = vsel %vm899_vm1, %v900_v53, %v901_v56  ;;  %v904_v5 = vsel %vm899_vm1, %v901_v56, %v903_v49  ;;  %v245_v49 = vld [vmem:[%s4317_s24 + $0x98] sm:$0xff] }
  0x98   : > { %v1012_v6 = vpack.c.bf16 %v904_v5, %v902_v4  ;;  %v4388_v8 = vsel %vm1456_vm2, %v1457_v59, %v1458_v60  ;;  %v4391_v9 = vsel %vm1456_vm2, %v1458_v60, %v1460_v58  ;;  %v304_v42 = vmul.f32 %v4323_v62, %v243_v27  ;;  %v247_v59 = vld [vmem:[%s4317_s24 + $0xa8] sm:$0xff]  ;;  %v246_v60 = vld [vmem:[%s4317_s24 + $0xa0] sm:$0x3] }
  0x99   : > { %5510 = vst [vmem:[#allocation3_spill] sm:$0xff] %v4388_v8  ;;  %5511 = vst [vmem:[#allocation4_spill] sm:$0xff] %v4391_v9  ;;  %v908_v11 = vrot.slane %v4380_v1, 1  ;;  %v4397_v12 = vpack.c.bf16 %v4382_v3, %v4371_v54  ;;  %v906_v13 = vrot.slane %v4382_v3, 1  ;;  %v362_v58 = vadd.f32 %v4331_v2, %v301_v38  ;;  %v4480_v27 = vld [vmem:[%s5482_s4 + $0xc] sm:$0x3] }
  0x9a   : > { %v548_v15 = vpop.permute.xlu1 %547  ;;  %v543_v16 = vpop.permute.xlu0 %542  ;;  %3485 = vmatprep.mubr.msk.bf16.mxu1 %vm1030_vm3, %v1012_v6  ;;  %v4452_v0 = vadd.f32 %v4331_v2, %v304_v42  ;;  %v303_v4 = vmul.f32 %v4323_v62, %v242_v48  ;;  %v306_v5 = vmul.f32 %v4323_v62, %v245_v49  ;;  %v251_v38 = vld [vmem:[%s4317_s24 + $0xc8] sm:$0xff] }
  0x9b   : > { %v4407_v23 = vmul.f32 %v548_v15, %v409_v46  ;;  %v4409_v24 = vmul.f32 %v543_v16, %v408_v50  ;;  %v907_v25 = vsel %vm899_vm1, %v905_v10, %v906_v13  ;;  %v909_v26 = vsel %vm899_vm1, %v906_v13, %v908_v11  ;;  %v244_v50 = vld [vmem:[%s4317_s24 + $0x90] sm:$0xff] }
  0x9c   : > { %v1013_v28 = vpack.c.bf16 %v909_v26, %v907_v25  ;;  %v305_v6 = vmul.f32 %v4323_v62, %v244_v50  ;;  %v308_v15 = vmul.f32 %v4323_v62, %v247_v59  ;;  %v307_v16 = vmul.f32 %v4323_v62, %v246_v60 }
  0x9d   : > { %v4420_v34 = vpack.c.bf16 %v4407_v23, %v4409_v24  ;;  %v911_v43 = vrot.slane %v4407_v23, 1  ;;  %v910_v44 = vrot.slane %v4409_v24, 1  ;;  %v416_v30 = vmax.f32 %v362_v58, 0.0 }
  0x9e   : > { %v558_v40 = vpop.permute.xlu1 %557  ;;  %v553_v29 = vpop.permute.xlu0 %552  ;;  %3486 = vmatmul.mubr.msk.bf16.vlgmr.msra.gmra.mrb[0].mxu1 %vm1030_vm3, %v1013_v28  ;;  %3621 = vmatprep.mubr.msk.bf16.mxu0 %vm1030_vm3, %v1013_v28  ;;  %v364_v32 = vadd.f32 %v4331_v2, %v303_v4  ;;  %v4508_v48 = vadd.f32 %v4331_v2, %v307_v16  ;;  %v419_v60 = vmax.f32 %v4452_v0, 0.0  ;;  %v253_v4 = vld [vmem:[%s4317_s24 + $0xd8] sm:$0xff] }
  0x9f   : > { %v4435_v46 = vmul.f32 %v553_v29, %v410_v17  ;;  %3518 = vmatpush3.bf16.msra.mxu1 %v1293_v33  ;;  %v4445_v53 = vmul.f32 %v558_v40, %v411_v35  ;;  %v912_v13 = vsel %vm899_vm1, %v910_v44, %v911_v43  ;;  %v249_v17 = vld [vmem:[%s4317_s24 + $0xb8] sm:$0x3]  ;;  %v4488_v33 = vadd.f32 %v4331_v2, %v306_v5 }
  0xa0   : > { %4049 = vmatprep.subr.msk.bf16.mxu1 %vm1079_vm0, %v4428_v39  ;;  %v4491_v35 = vadd.f32 %v4331_v2, %v305_v6  ;;  %v310_v49 = vmul.f32 %v4323_v62, %v249_v17  ;;  %v422_v17 = vmax.f32 %v4508_v48, 0.0 }
  0xa1   : > { %v913_v56 = vrot.slane %v4435_v46, 1  ;;  %v915_v20 = vrot.slane %v4445_v53, 1 }
  0xa2   : > { %v568_v61 = vpop.permute.xlu1 %567  ;;  %v563_v63 = vpop.permute.xlu0 %562  ;;  %v420_v16 = vmax.f32 %v4491_v35, 0.0 }
  0xa3   : > { %v914_v7 = vsel %vm899_vm1, %v911_v43, %v913_v56  ;;  %v4458_v10 = vmul.f32 %v568_v61, %v413_v41  ;;  %v4460_v11 = vmul.f32 %v563_v63, %v412_v47  ;;  %v250_v43 = vld [vmem:[%s4317_s24 + $0xc0] sm:$0xff]  ;;  %v4505_v47 = vadd.f32 %v4331_v2, %v308_v15  ;;  %v255_v15 = vld [vmem:[%s4317_s24 + $0xe8] sm:$0x3] }
  0xa4   : > { %v4463_v14 = vpack.c.bf16 %v914_v7, %v912_v13  ;;  %v309_v56 = vmul.f32 %v4323_v62, %v248_v37  ;;  %v418_v61 = vmax.f32 %v364_v32, 0.0  ;;  %v421_v63 = vmax.f32 %v4488_v33, 0.0  ;;  %v252_v13 = vld [vmem:[%s4317_s24 + $0xd0] sm:$0x3] }
  0xa5   : > { %v918_v21 = vrot.slane %v4458_v10, 1  ;;  %v4474_v25 = vpack.c.bf16 %v4460_v11, %v4445_v53  ;;  %v916_v26 = vrot.slane %v4460_v11, 1  ;;  %v256_v32 = vld [vmem:[%s4317_s24 + $0xf0] sm:$0xff]  ;;  %v5520_v18 = vmax.f32 %v4505_v47, 0.0 }
  0xa6   : > { %5512 = vst [vmem:[#allocation5_spill] sm:$0xff] %v4463_v14  ;;  %v578_v28 = vpop.permute.xlu1 %577  ;;  %v573_v31 = vpop.permute.xlu0 %572  ;;  %3489 = vmatprep.mubr.msk.bf16.mxu1 %vm1030_vm3, %v4463_v14  ;;  %3622 = vmatmul.mubr.msk.bf16.vlgmr.msra.gmra.mrb[0].mxu0 %vm1030_vm3, %v4463_v14  ;;  %v324_v47 = vmul.f32 %v4323_v62, %v263_v55 }
  0xa7   : > { %5513 = vst [vmem:[#allocation6_spill] sm:$0xff] %v4474_v25  ;;  %v4495_v40 = vmul.f32 %v578_v28, %v415_v51  ;;  %v4497_v29 = vmul.f32 %v573_v31, %v414_v57  ;;  %v917_v41 = vsel %vm899_vm1, %v915_v20, %v916_v26  ;;  %v919_v42 = vsel %vm899_vm1, %v916_v26, %v918_v21  ;;  %v254_v31 = vld [vmem:[%s4317_s24 + $0xe0] sm:$0xff] }
  0xa8   : > { %3654 = vmatpush3.bf16.msra.mxu0 %v2259_v19  ;;  %v4502_v44 = vpack.c.bf16 %v919_v42, %v917_v41  ;;  %v417_v51 = vmax.f32 %v4441_v52, 0.0  ;;  %v312_v57 = vmul.f32 %v4323_v62, %v251_v38  ;;  %v311_v52 = vmul.f32 %v4323_v62, %v250_v43 }
  0xa9   : > { %4054 = vmatprep.subr.msk.bf16.mxu0 %vm1079_vm0, %v4480_v27  ;;  %v4515_v50 = vpack.c.bf16 %v4495_v40, %v4497_v29  ;;  %v921_v5 = vrot.slane %v4495_v40, 1  ;;  %v920_v6 = vrot.slane %v4497_v29, 1  ;;  %v4538_v19 = vadd.f32 %v4331_v2, %v310_v49 }
  0xaa   : > { %5514 = vst [vmem:[#allocation7_spill] sm:$0xff] %v4502_v44  ;;  %v588_v58 = vpop.permute.xlu1 %587  ;;  %v583_v59 = vpop.permute.xlu0 %582  ;;  %3490 = vmatmul.mubr.msk.bf16.gmra.mrb[4].mxu1 %vm1030_vm3, %v4502_v44  ;;  %3625 = vmatprep.mubr.msk.bf16.mxu0 %vm1030_vm3, %v4502_v44  ;;  %v4544_v26 = vadd.f32 %v4331_v2, %v309_v56  ;;  %v4547_v28 = vadd.f32 %v4331_v2, %v312_v57  ;;  %v259_v56 = vld [vmem:[%s4317_s24 + $0x108] sm:$0xff]  ;;  %v264_v44 = vld [vmem:[%s4317_s24 + $0x130] sm:$0x3] }
  0xab   : > { %5515 = vst [vmem:[#allocation8_spill] sm:$0xff] %v4515_v50  ;;  %v4530_v7 = vmul.f32 %v583_v59, %v416_v30  ;;  %v4540_v20 = vmul.f32 %v588_v58, %v417_v51  ;;  %v257_v30 = vld [vmem:[%s4317_s24 + $0xf8] sm:$0xff]  ;;  %v4553_v37 = vadd.f32 %v4331_v2, %v311_v52  ;;  %v314_v38 = vmul.f32 %v4323_v62, %v253_v4 }
  0xac   : > { %v313_v41 = vmul.f32 %v4323_v62, %v252_v13  ;;  %v316_v42 = vmul.f32 %v4323_v62, %v255_v15  ;;  %v922_v51 = vsel %vm899_vm1, %v920_v6, %v921_v5  ;;  %v315_v58 = vmul.f32 %v4323_v62, %v254_v31 }
  0xad   : > { %v923_v21 = vrot.slane %v4530_v7, 1  ;;  %v318_v59 = vmul.f32 %v4323_v62, %v257_v30  ;;  %v317_v52 = vmul.f32 %v4323_v62, %v256_v32  ;;  %v925_v4 = vrot.slane %v4540_v20, 1  ;;  %v258_v32 = vld [vmem:[%s4317_s24 + $0x100] sm:$0x3] }
  0xae   : > { %v598_v33 = vpop.permute.xlu1 %597  ;;  %v593_v35 = vpop.permute.xlu0 %592  ;;  %v425_v15 = vmax.f32 %v4538_v19, 0.0  ;;  %v4586_v31 = vadd.f32 %v4331_v2, %v313_v41  ;;  %v320_v30 = vmul.f32 %v4323_v62, %v259_v56  ;;  %v4599_v19 = vadd.f32 %v4331_v2, %v316_v42 }
  0xaf   : > { %v924_v43 = vsel %vm899_vm1, %v921_v5, %v923_v21  ;;  %v4559_v48 = vmul.f32 %v598_v33, %v419_v60  ;;  %v4561_v49 = vmul.f32 %v593_v35, %v418_v61  ;;  %v4583_v21 = vadd.f32 %v4331_v2, %v314_v38 }
  0xb0   : > { %v4565_v57 = vpack.c.bf16 %v924_v43, %v922_v51  ;;  %v4602_v38 = vadd.f32 %v4331_v2, %v315_v58  ;;  %v4605_v41 = vadd.f32 %v4331_v2, %v318_v59  ;;  %v4613_v56 = vadd.f32 %v4331_v2, %v317_v52 }
  0xb1   : > { %v928_v13 = vrot.slane %v4559_v48, 1  ;;  %v4574_v60 = vpack.c.bf16 %v4561_v49, %v4540_v20  ;;  %v926_v61 = vrot.slane %v4561_v49, 1  ;;  %v319_v42 = vmul.f32 %v4323_v62, %v258_v32 }
  0xb2   : > { %5516 = vst [vmem:[#allocation9_spill] sm:$0xff] %v4565_v57  ;;  %v608_v5 = vpop.permute.xlu1 %607  ;;  %v603_v6 = vpop.permute.xlu0 %602  ;;  %3493 = vmatprep.mubr.msk.bf16.mxu1 %vm1030_vm3, %v4565_v57  ;;  %3626 = vmatmul.mubr.msk.bf16.gmra.mrb[4].mxu0 %vm1030_vm3, %v4565_v57  ;;  %v427_v59 = vmax.f32 %v4547_v28, 0.0  ;;  %v262_v28 = vld [vmem:[%s4317_s24 + $0x120] sm:$0xff]  ;;  %v265_v57 = vld [vmem:[%s4317_s24 + $0x138] sm:$0xff] }
  0xb3   : > { %5517 = vst [vmem:[#allocation10_spill] sm:$0xff] %v4574_v60  ;;  %v4590_v33 = vmul.f32 %v608_v5, %v421_v63  ;;  %v4592_v35 = vmul.f32 %v603_v6, %v420_v16  ;;  %v927_v43 = vsel %vm899_vm1, %v925_v4, %v926_v61  ;;  %v929_v51 = vsel %vm899_vm1, %v926_v61, %v928_v13  ;;  %v261_v4 = vld [vmem:[%s4317_s24 + $0x118] sm:$0x3] }
  0xb4   : > { %v4596_v22 = vpack.c.bf16 %v929_v51, %v927_v43  ;;  %v424_v16 = vmax.f32 %v4544_v26, 0.0  ;;  %v426_v26 = vmax.f32 %v4553_v37, 0.0  ;;  %v4625_v61 = vadd.f32 %v4331_v2, %v320_v30  ;;  %v260_v51 = vld [vmem:[%s4317_s24 + $0x110] sm:$0xff] }
  0xb5   : > { %v4609_v63 = vpack.c.bf16 %v4590_v33, %v4592_v35  ;;  %v931_v5 = vrot.slane %v4590_v33, 1  ;;  %v930_v6 = vrot.slane %v4592_v35, 1  ;;  %v322_v0 = vmul.f32 %v4323_v62, %v261_v4 }
  0xb6   : > { %5518 = vst [vmem:[#allocation11_spill] sm:$0xff] %v4596_v22  ;;  %v618_v58 = vpop.permute.xlu1 %617  ;;  %v613_v13 = vpop.permute.xlu0 %612  ;;  %3494 = vmatmul.mubr.msk.bf16.gmra.mrb[8].mxu1 %vm1030_vm3, %v4596_v22  ;;  %3629 = vmatprep.mubr.msk.bf16.mxu0 %vm1030_vm3, %v4596_v22  ;;  %v4646_v43 = vadd.f32 %v4331_v2, %v319_v42  ;;  %v321_v4 = vmul.f32 %v4323_v62, %v260_v51 }
  0xb7   : > { %5519 = vst [vmem:[#allocation12_spill] sm:$0xff] %v4609_v63  ;;  %v4629_v32 = vmul.f32 %v613_v13, %v422_v17  ;;  %v4641_v22 = vmul.f32 %v618_v58, %v5520_v18  ;;  %v323_v18 = vmul.f32 %v4323_v62, %v262_v28  ;;  %v932_v42 = vsel %vm899_vm1, %v930_v6, %v931_v5  ;;  %v269_v63 = vld [vmem:[%s4317_s24 + $0x158] sm:$0xff] }
  0xb8   : > { %v4663_v9 = vadd.f32 %v4331_v2, %v322_v0  ;;  %v326_v52 = vmul.f32 %v4323_v62, %v265_v57  ;;  %v325_v51 = vmul.f32 %v4323_v62, %v264_v44  ;;  %v4681_v57 = vadd.f32 %v4331_v2, %v321_v4 }
  0xb9   : > { %v933_v17 = vrot.slane %v4629_v32, 1  ;;  %v935_v55 = vrot.slane %v4641_v22, 1  ;;  %v4684_v6 = vadd.f32 %v4331_v2, %v324_v47 }
  0xba   : > { %v628_v37 = vpop.permute.xlu1 %627  ;;  %v623_v14 = vpop.permute.xlu0 %622  ;;  %v4700_v4 = vadd.f32 %v4331_v2, %v326_v52  ;;  %v4703_v47 = vadd.f32 %v4331_v2, %v325_v51  ;;  %v330_v51 = vmul.f32 %v4323_v62, %v269_v63 }
  0xbb   : > { %v934_v58 = vsel %vm899_vm1, %v931_v5, %v933_v17  ;;  %v4655_v30 = vmul.f32 %v628_v37, %v425_v15  ;;  %v4657_v13 = vmul.f32 %v623_v14, %v424_v16  ;;  %v267_v16 = vld [vmem:[%s4317_s24 + $0x148] sm:$0x3]  ;;  %v4687_v37 = vadd.f32 %v4331_v2, %v323_v18 }
  0xbc   : > { %v4660_v8 = vpack.c.bf16 %v934_v58, %v932_v42  ;;  %v328_v18 = vmul.f32 %v4323_v62, %v267_v16  ;;  %v1462_v16 = vrot.slane %v4371_v54, 2  ;;  %v5526_v54 = vmax.f32 %v4583_v21, 0.0 }
  0xbd   : > { %v938_v28 = vrot.slane %v4655_v30, 1  ;;  %v4671_v14 = vpack.c.bf16 %v4657_v13, %v4641_v22  ;;  %v936_v15 = vrot.slane %v4657_v13, 1  ;;  %v4751_v21 = vadd.f32 %v4331_v2, %v330_v51 }
  0xbe   : > { %5521 = vst [vmem:[#allocation13_spill] sm:$0xff] %v4660_v8  ;;  %v638_v5 = vpop.permute.xlu1 %637  ;;  %v633_v0 = vpop.permute.xlu0 %632  ;;  %3497 = vmatprep.mubr.msk.bf16.mxu1 %vm1030_vm3, %v4660_v8  ;;  %3630 = vmatmul.mubr.msk.bf16.gmra.mrb[8].mxu0 %vm1030_vm3, %v4660_v8  ;;  %v266_v8 = vld [vmem:[%s4317_s24 + $0x140] sm:$0xff] }
  0xbf   : > { %5522 = vst [vmem:[#allocation14_spill] sm:$0xff] %v4671_v14  ;;  %v4689_v17 = vmul.f32 %v638_v5, %v427_v59  ;;  %v4691_v58 = vmul.f32 %v633_v0, %v426_v26  ;;  %v937_v42 = vsel %vm899_vm1, %v935_v55, %v936_v15  ;;  %v939_v14 = vsel %vm899_vm1, %v936_v15, %v938_v28 }
  0xc0   : > { %v4697_v44 = vpack.c.bf16 %v939_v14, %v937_v42  ;;  %v1465_v59 = vrot.slane %v4380_v1, 2  ;;  %v1463_v26 = vrot.slane %v4382_v3, 2  ;;  %v327_v3 = vmul.f32 %v4323_v62, %v266_v8 }
  0xc1   : > { %v4710_v55 = vpack.c.bf16 %v4689_v17, %v4691_v58  ;;  %v941_v5 = vrot.slane %v4689_v17, 1  ;;  %v940_v0 = vrot.slane %v4691_v58, 1  ;;  %v5525_v42 = vmax.f32 %v4586_v31, 0.0 }
  0xc2   : > { %5523 = vst [vmem:[#allocation15_spill] sm:$0xff] %v4697_v44  ;;  %v648_v14 = vpop.permute.xlu1 %647  ;;  %v643_v15 = vpop.permute.xlu0 %642  ;;  %3498 = vmatmul.mubr.msk.bf16.gmra.mrb[12].mxu1 %vm1030_vm3, %v4697_v44  ;;  %3633 = vmatprep.mubr.msk.bf16.mxu0 %vm1030_vm3, %v4697_v44  ;;  %v268_v44 = vld [vmem:[%s4317_s24 + $0x150] sm:$0xff]  ;;  %v4733_v8 = vadd.f32 %v4331_v2, %v328_v18  ;;  %v1464_v31 = vsel %vm1456_vm2, %v1462_v16, %v1463_v26  ;;  %v4745_v1 = vsel %vm1079_vm0, %v4480_v27, 0 }
  0xc3   : > { %5524 = vst [vmem:[#allocation16_spill] sm:$0xff] %v4710_v55  ;;  %v4726_v28 = vmul.f32 %v643_v15, %v5525_v42  ;;  %v4737_v63 = vmul.f32 %v648_v14, %v5526_v54  ;;  %v1466_v15 = vsel %vm1456_vm2, %v1463_v26, %v1465_v59  ;;  %v271_v42 = vld [vmem:[%s4317_s24 + $0x168] sm:$0xff]  ;;  %v4748_v18 = vadd.f32 %v4331_v2, %v327_v3 }
  0xc4   : > { %v329_v14 = vmul.f32 %v4323_v62, %v268_v44  ;;  %v5527_v59 = vmax.f32 %v4599_v19, 0.0  ;;  %v5528_v54 = vmax.f32 %v4602_v38, 0.0  ;;  %v942_v27 = vsel %vm899_vm1, %v940_v0, %v941_v5 }
  0xc5   : > { %v943_v60 = vrot.slane %v4726_v28, 1  ;;  %v1470_v3 = vrot.slane %v4435_v46, 2  ;;  %v4767_v51 = vpack.c.bf16 %v1466_v15, %v1464_v31  ;;  %v332_v44 = vmul.f32 %v4323_v62, %v271_v42 }
  0xc6   : > { %v658_v50 = vpop.permute.xlu1 %657  ;;  %v653_v52 = vpop.permute.xlu0 %652  ;;  %v1467_v46 = vrot.slane %v4409_v24, 2  ;;  %v1475_v0 = vrot.slane %v4458_v10, 2  ;;  %v1473_v31 = vrot.slane %v4460_v11, 2  ;;  %v1472_v11 = vrot.slane %v4445_v53, 2 }
  0xc7   : > { %v944_v16 = vsel %vm899_vm1, %v941_v5, %v943_v60  ;;  %v4757_v26 = vmul.f32 %v658_v50, %v5527_v59  ;;  %v4761_v55 = vmul.f32 %v653_v52, %v5528_v54  ;;  %5530 = vst [vmem:[#allocation18_spill] sm:$0xff] %v4767_v51  ;;  %v945_v60 = vrot.slane %v4737_v63, 1  ;;  %v270_v52 = vld [vmem:[%s4317_s24 + $0x160] sm:$0x3] }
  0xc8   : > { %v4765_v25 = vpack.c.bf16 %v944_v16, %v942_v27  ;;  %v1468_v5 = vrot.slane %v4407_v23, 2  ;;  %v5531_v16 = vmax.f32 %v4605_v41, 0.0  ;;  %v5532_v23 = vmax.f32 %v4613_v56, 0.0 }
  0xc9   : > { %v948_v19 = vrot.slane %v4757_v26, 1  ;;  %v4774_v50 = vpack.c.bf16 %v4761_v55, %v4737_v63  ;;  %v946_v38 = vrot.slane %v4761_v55, 1  ;;  %v331_v41 = vmul.f32 %v4323_v62, %v270_v52 }
  0xca   : > { %5529 = vst [vmem:[#allocation17_spill] sm:$0xff] %v4765_v25  ;;  %v668_v15 = vpop.permute.xlu1 %667  ;;  %v663_v42 = vpop.permute.xlu0 %662  ;;  %3501 = vmatprep.mubr.msk.bf16.mxu1 %vm1030_vm3, %v4765_v25  ;;  %3634 = vmatmul.mubr.msk.bf16.gmra.mrb[12].mxu0 %vm1030_vm3, %v4765_v25  ;;  %v4802_v25 = vadd.f32 %v4331_v2, %v329_v14  ;;  %v1471_v56 = vsel %vm1456_vm2, %v1468_v5, %v1470_v3  ;;  %v5536_v52 = vmax.f32 %v4625_v61, 0.0 }
  0xcb   : > { %v4788_v59 = vmul.f32 %v668_v15, %v5531_v16  ;;  %v4792_v54 = vmul.f32 %v663_v42, %v5532_v23  ;;  %3655 = vmatprep.mubr.msk.bf16.mxu0 %vm1030_vm3, %v4767_v51  ;;  %v947_v24 = vsel %vm899_vm1, %v945_v60, %v946_v38  ;;  %v949_v10 = vsel %vm899_vm1, %v946_v38, %v948_v19  ;;  %v274_v51 = vld [vmem:[%s4317_s24 + $0x180] sm:$0xff] }
  0xcc   : > { %v4799_v27 = vpack.c.bf16 %v949_v10, %v947_v24  ;;  %v4812_v60 = vadd.f32 %v4331_v2, %v332_v44  ;;  %v1474_v14 = vsel %vm1456_vm2, %v1472_v11, %v1473_v31  ;;  %v1476_v38 = vsel %vm1456_vm2, %v1473_v31, %v1475_v0 }
  0xcd   : > { %v4808_v15 = vpack.c.bf16 %v4788_v59, %v4792_v54  ;;  %v1469_v16 = vsel %vm1456_vm2, %v1467_v46, %v1468_v5  ;;  %v951_v23 = vrot.slane %v4788_v59, 1  ;;  %v950_v44 = vrot.slane %v4792_v54, 1 }
  0xce   : > { %5533 = vst [vmem:[#allocation19_spill] sm:$0xff] %v4799_v27  ;;  %v678_v19 = vpop.permute.xlu1 %677  ;;  %v673_v53 = vpop.permute.xlu0 %672  ;;  %3502 = vmatmul.mubr.msk.bf16.gmra.mrb[16].mxu1 %vm1030_vm3, %v4799_v27  ;;  %v5534_v24 = vmax.f32 %v4646_v43, 0.0  ;;  %v4827_v42 = vpack.c.bf16 %v1471_v56, %v1469_v16  ;;  %v1480_v11 = vrot.slane %v4530_v7, 2  ;;  %v4832_v31 = vadd.f32 %v4331_v2, %v331_v41  ;;  %v273_v56 = vld [vmem:[%s4317_s24 + $0x178] sm:$0x3] }
  0xcf   : > { %v4836_v5 = vmul.f32 %v678_v19, %v5536_v52  ;;  %v4839_v3 = vpack.c.bf16 %v1476_v38, %v1474_v14  ;;  %v1477_v7 = vrot.slane %v4497_v29, 2  ;;  %v1485_v16 = vrot.slane %v4559_v48, 2  ;;  %v4852_v19 = vld [vmem:[%s5482_s4 + $0xe] sm:$0x3]  ;;  %v272_v52 = vld [vmem:[%s4317_s24 + $0x170] sm:$0xff] }
  0xd0   : > { %v4825_v10 = vmul.f32 %v673_v53, %v5534_v24  ;;  %5535 = vst [vmem:[#allocation20_spill] sm:$0xff] %v4827_v42  ;;  %v1478_v53 = vrot.slane %v4495_v40, 2  ;;  %v1483_v41 = vrot.slane %v4561_v49, 2  ;;  %v5538_v40 = vmax.f32 %v4663_v9, 0.0 }
  0xd1   : > { %5537 = vst [vmem:[#allocation21_spill] sm:$0xff] %v4839_v3  ;;  %v5539_v48 = vmax.f32 %v4681_v57, 0.0  ;;  %v952_v38 = vsel %vm899_vm1, %v950_v44, %v951_v23  ;;  %v1482_v43 = vrot.slane %v4540_v20, 2  ;;  %v334_v9 = vmul.f32 %v4323_v62, %v273_v56  ;;  %v275_v20 = vld [vmem:[%s4317_s24 + $0x188] sm:$0xff] }
  0xd2   : > { %v953_v46 = vrot.slane %v4825_v10, 1  ;;  %v688_v24 = vpop.permute.xlu1 %687  ;;  %v683_v61 = vpop.permute.xlu0 %682  ;;  %3656 = vmatmul.mubr.msk.bf16.vlgmr.msra.gmra.mrb[0].mxu0 %vm1030_vm3, %v4827_v42  ;;  %v1481_v0 = vsel %vm1456_vm2, %v1478_v53, %v1480_v11  ;;  %v955_v57 = vrot.slane %v4836_v5, 1 }
  0xd3   : > { %v4857_v29 = vmul.f32 %v688_v24, %v5538_v40  ;;  %v4861_v49 = vmul.f32 %v683_v61, %v5539_v48  ;;  %3659 = vmatprep.mubr.msk.bf16.mxu0 %vm1030_vm3, %v4839_v3  ;;  %3688 = vmatpush3.bf16.msra.mxu0 %v4745_v1  ;;  %v1479_v1 = vsel %vm1456_vm2, %v1477_v7, %v1478_v53  ;;  %v5541_v40 = vmax.f32 %v4684_v6, 0.0 }
  0xd4   : > { %v954_v14 = vsel %vm899_vm1, %v951_v23, %v953_v46  ;;  %4055 = vmatprep.subr.msk.bf16.mxu0 %vm1079_vm0, %v4852_v19  ;;  %v1484_v56 = vsel %vm1456_vm2, %v1482_v43, %v1483_v41  ;;  %v1486_v61 = vsel %vm1456_vm2, %v1483_v41, %v1485_v16  ;;  %v1490_v53 = vrot.slane %v4629_v32, 2 }
  0xd5   : > { %v4869_v27 = vpack.c.bf16 %v954_v14, %v952_v38  ;;  %v958_v46 = vrot.slane %v4857_v29, 1  ;;  %v4877_v24 = vpack.c.bf16 %v4861_v49, %v4836_v5  ;;  %v956_v23 = vrot.slane %v4861_v49, 1 }
  0xd6   : > { %v698_v44 = vpop.permute.xlu1 %697  ;;  %v693_v11 = vpop.permute.xlu0 %692  ;;  %v333_v14 = vmul.f32 %v4323_v62, %v272_v52  ;;  %v5542_v38 = vmax.f32 %v4687_v37, 0.0  ;;  %v4903_v7 = vpack.c.bf16 %v1481_v0, %v1479_v1  ;;  %v336_v16 = vmul.f32 %v4323_v62, %v275_v20  ;;  %v277_v20 = vld [vmem:[%s4317_s24 + $0x198] sm:$0xff] }
  0xd7   : > { %5540 = vst [vmem:[#allocation22_spill] sm:$0xff] %v4869_v27  ;;  %3505 = vmatprep.mubr.msk.bf16.mxu1 %vm1030_vm3, %v4869_v27  ;;  %v4891_v48 = vmul.f32 %v698_v44, %v5541_v40  ;;  %v957_v42 = vsel %vm899_vm1, %v955_v57, %v956_v23  ;;  %v959_v27 = vsel %vm899_vm1, %v956_v23, %v958_v46  ;;  %v1495_v6 = vrot.slane %v4655_v30, 2  ;;  %v276_v44 = vld [vmem:[%s4317_s24 + $0x190] sm:$0x3] }
  0xd8   : > { %v4895_v3 = vmul.f32 %v693_v11, %v5542_v38  ;;  %v4901_v43 = vpack.c.bf16 %v959_v27, %v957_v42  ;;  %v1493_v41 = vrot.slane %v4657_v13, 2  ;;  %v4912_v52 = vpack.c.bf16 %v1486_v61, %v1484_v56 }
  0xd9   : > { %v1488_v32 = vrot.slane %v4590_v33, 2  ;;  %v1487_v27 = vrot.slane %v4592_v35, 2  ;;  %v446_v30 = vmax.f32 %v4832_v31, 0.0  ;;  %v335_v13 = vmul.f32 %v4323_v62, %v274_v51 }
  0xda   : > { %v4910_v37 = vpack.c.bf16 %v4891_v48, %v4895_v3  ;;  %v708_v42 = vpop.permute.xlu1 %707  ;;  %v703_v0 = vpop.permute.xlu0 %702  ;;  %3506 = vmatmul.mubr.msk.bf16.gmra.mrb[20].mxu1 %vm1030_vm3, %v4901_v43  ;;  %3660 = vmatmul.mubr.msk.bf16.gmra.mrb[4].mxu0 %vm1030_vm3, %v4903_v7  ;;  %v1492_v57 = vrot.slane %v4641_v22, 2  ;;  %v961_v46 = vrot.slane %v4891_v48, 1  ;;  %v960_v33 = vrot.slane %v4895_v3, 1 }
  0xdb   : > { %v5543_v35 = vmax.f32 %v4703_v47, 0.0  ;;  %3663 = vmatprep.mubr.msk.bf16.mxu0 %vm1030_vm3, %v4912_v52  ;;  %v1491_v11 = vsel %vm1456_vm2, %v1488_v32, %v1490_v53  ;;  %v4935_v1 = vadd.f32 %v4331_v2, %v334_v9  ;;  %v4938_v22 = vadd.f32 %v4331_v2, %v333_v14 }
  0xdc   : > { %v4941_v51 = vadd.f32 %v4331_v2, %v336_v16  ;;  %v5544_v47 = vmax.f32 %v4700_v4, 0.0  ;;  %v1494_v40 = vsel %vm1456_vm2, %v1492_v57, %v1493_v41  ;;  %v1496_v38 = vsel %vm1456_vm2, %v1493_v41, %v1495_v6 }
  0xdd   : > { %v4927_v23 = vmul.f32 %v703_v0, %v5543_v35  ;;  %v1489_v9 = vsel %vm1456_vm2, %v1487_v27, %v1488_v32  ;;  %v4952_v14 = vadd.f32 %v4331_v2, %v335_v13  ;;  %v338_v16 = vmul.f32 %v4323_v62, %v277_v20 }
  0xde   : > { %v4945_v56 = vmul.f32 %v708_v42, %v5544_v47  ;;  %v718_v53 = vpop.permute.xlu1 %717  ;;  %v713_v0 = vpop.permute.xlu0 %712  ;;  %v337_v35 = vmul.f32 %v4323_v62, %v276_v44  ;;  %v5545_v42 = vmax.f32 %v4733_v8, 0.0  ;;  %v5546_v57 = vmax.f32 %v4748_v18, 0.0 }
  0xdf   : > { %v963_v61 = vrot.slane %v4927_v23, 1  ;;  %v962_v41 = vsel %vm899_vm1, %v960_v33, %v961_v46  ;;  %v1500_v32 = vrot.slane %v4726_v28, 2  ;;  %v4969_v13 = vpack.c.bf16 %v1491_v11, %v1489_v9 }
  0xe0   : > { %v4959_v47 = vmul.f32 %v718_v53, %v5545_v42  ;;  %v4963_v6 = vmul.f32 %v713_v0, %v5546_v57  ;;  %v4971_v20 = vpack.c.bf16 %v1496_v38, %v1494_v40  ;;  %v965_v44 = vrot.slane %v4945_v56, 1 }
  0xe1   : > { %v964_v4 = vsel %vm899_vm1, %v961_v46, %v963_v61  ;;  %v1498_v46 = vrot.slane %v4689_v17, 2  ;;  %v1497_v28 = vrot.slane %v4691_v58, 2  ;;  %v1505_v33 = vrot.slane %v4757_v26, 2 }
  0xe2   : > { %v4967_v27 = vpack.c.bf16 %v964_v4, %v962_v41  ;;  %v968_v8 = vrot.slane %v4959_v47, 1  ;;  %v4977_v61 = vpack.c.bf16 %v4963_v6, %v4945_v56  ;;  %v966_v18 = vrot.slane %v4963_v6, 1  ;;  %v728_v40 = vpop.permute.xlu1 %727  ;;  %v723_v38 = vpop.permute.xlu0 %722  ;;  %3664 = vmatmul.mubr.msk.bf16.gmra.mrb[8].mxu0 %vm1030_vm3, %v4969_v13 }
  0xe3   : > { %v1503_v11 = vrot.slane %v4761_v55, 2  ;;  %v5547_v53 = vmax.f32 %v4751_v21, 0.0  ;;  %v5548_v17 = vmax.f32 %v4802_v25, 0.0  ;;  %3667 = vmatprep.mubr.msk.bf16.mxu0 %vm1030_vm3, %v4971_v20  ;;  %v1502_v9 = vrot.slane %v4737_v63, 2 }
  0xe4   : > { %3509 = vmatprep.mubr.msk.bf16.mxu1 %vm1030_vm3, %v4967_v27  ;;  %v967_v55 = vsel %vm899_vm1, %v965_v44, %v966_v18  ;;  %v969_v26 = vsel %vm899_vm1, %v966_v18, %v968_v8  ;;  %v449_v21 = vmax.f32 %v4935_v1, 0.0  ;;  %v5005_v42 = vadd.f32 %v4331_v2, %v337_v35  ;;  %v279_v8 = vld [vmem:[%s4317_s24 + $0x1a8] sm:$0x3] }
  0xe5   : > { %v4990_v0 = vmul.f32 %v728_v40, %v5547_v53  ;;  %v4994_v58 = vmul.f32 %v723_v38, %v5548_v17  ;;  %v5001_v4 = vpack.c.bf16 %v969_v26, %v967_v55  ;;  %v1501_v25 = vsel %vm1456_vm2, %v1498_v46, %v1500_v32  ;;  %v278_v38 = vld [vmem:[%s4317_s24 + $0x1a0] sm:$0xff] }
  0xe6   : > { %v448_v41 = vmax.f32 %v4938_v22, 0.0  ;;  %v451_v44 = vmax.f32 %v4941_v51, 0.0  ;;  %v738_v63 = vpop.permute.xlu1 %737  ;;  %v733_v18 = vpop.permute.xlu0 %732  ;;  %v1504_v1 = vsel %vm1456_vm2, %v1502_v9, %v1503_v11  ;;  %v1506_v35 = vsel %vm1456_vm2, %v1503_v11, %v1505_v33 }
  0xe7   : > { %v5010_v57 = vpack.c.bf16 %v4990_v0, %v4994_v58  ;;  %3510 = vmatmul.mubr.msk.bf16.gmra.mrb[24].mxu1 %vm1030_vm3, %v5001_v4  ;;  %v450_v32 = vmax.f32 %v4952_v14, 0.0  ;;  %v5021_v40 = vadd.f32 %v4331_v2, %v338_v16  ;;  %v971_v22 = vrot.slane %v4990_v0, 1 }
  0xe8   : > { %v970_v51 = vrot.slane %v4994_v58, 1  ;;  %v5028_v53 = vmul.f32 %v733_v18, %v446_v30  ;;  %v1499_v17 = vsel %vm1456_vm2, %v1497_v28, %v1498_v46  ;;  %v1510_v55 = vrot.slane %v4825_v10, 2 }
  0xe9   : > { %v5032_v26 = vpack.c.bf16 %v1501_v25, %v1499_v17  ;;  %v452_v14 = vmax.f32 %v5005_v42, 0.0  ;;  %v340_v2 = vmul.f32 %v4323_v62, %v279_v8  ;;  %v5549_v16 = vmax.f32 %v4812_v60, 0.0 }
  0xea   : > { %v973_v11 = vrot.slane %v5028_v53, 1  ;;  %v5041_v9 = vpack.c.bf16 %v1506_v35, %v1504_v1  ;;  %v339_v31 = vmul.f32 %v4323_v62, %v278_v38  ;;  %v1508_v30 = vrot.slane %v4788_v59, 2  ;;  %v748_v42 = vpop.permute.xlu1 %747  ;;  %v743_v25 = vpop.permute.xlu0 %742 }
  0xeb   : > { %v5038_v33 = vmul.f32 %v738_v63, %v5549_v16  ;;  %v1507_v10 = vrot.slane %v4792_v54, 2  ;;  %v1515_v46 = vrot.slane %v4857_v29, 2  ;;  %v1513_v28 = vrot.slane %v4861_v49, 2  ;;  %3668 = vmatmul.mubr.msk.bf16.gmra.mrb[12].mxu0 %vm1030_vm3, %v5032_v26  ;;  %v4069_v49 = vld [vmem:[%s5481_s3] ss:$0 sm:$0xff] }
  0xec   : > { %v974_v60 = vsel %vm899_vm1, %v971_v22, %v973_v11  ;;  %v5051_v8 = vmul.f32 %v748_v42, %v449_v21  ;;  %v5053_v63 = vmul.f32 %v743_v25, %v448_v41  ;;  %3671 = vmatprep.mubr.msk.bf16.mxu0 %vm1030_vm3, %v5041_v9  ;;  %v972_v62 = vsel %vm899_vm1, %v970_v51, %v971_v22 }
  0xed   : > { %v1512_v59 = vrot.slane %v4836_v5, 2  ;;  %v1511_v54 = vsel %vm1456_vm2, %v1508_v30, %v1510_v55  ;;  %v5060_v29 = vpack.c.bf16 %v974_v60, %v972_v62  ;;  %v401_v18 = vadd.f32 %v4069_v49, %v340_v2 }
  0xee   : > { %v975_v21 = vrot.slane %v5038_v33, 1  ;;  %v978_v41 = vrot.slane %v5051_v8, 1  ;;  %v5069_v1 = vpack.c.bf16 %v5053_v63, %v5038_v33  ;;  %v976_v35 = vrot.slane %v5053_v63, 1  ;;  %v758_v5 = vpop.permute.xlu1 %757  ;;  %v753_v38 = vpop.permute.xlu0 %752 }
  0xef   : > { %3513 = vmatprep.mubr.msk.bf16.mxu1 %vm1030_vm3, %v5060_v29  ;;  %v1509_v22 = vsel %vm1456_vm2, %v1507_v10, %v1508_v30  ;;  %v1514_v51 = vsel %vm1456_vm2, %v1512_v59, %v1513_v28  ;;  %v1516_v17 = vsel %vm1456_vm2, %v1513_v28, %v1515_v46  ;;  %v400_v55 = vadd.f32 %v4069_v49, %v339_v31 }
  0xf0   : > { %v5077_v2 = vmul.f32 %v758_v5, %v451_v44  ;;  %v5079_v16 = vmul.f32 %v753_v38, %v450_v32  ;;  %v977_v11 = vsel %vm899_vm1, %v975_v21, %v976_v35  ;;  %v979_v42 = vsel %vm899_vm1, %v976_v35, %v978_v41 }
  0xf1   : > { %v453_v25 = vmax.f32 %v5021_v40, 0.0  ;;  %v5084_v60 = vpack.c.bf16 %v979_v42, %v977_v11  ;;  %v5086_v62 = vpack.c.bf16 %v1511_v54, %v1509_v22  ;;  %v1520_v30 = vrot.slane %v4927_v23, 2 }
  0xf2   : > { %v2037_v10 = vrot.slane %v5077_v2, 1  ;;  %v2036_v31 = vrot.slane %v5079_v16, 1  ;;  %v5091_v44 = vpack.c.bf16 %v1516_v17, %v1514_v51  ;;  %v1525_v32 = vrot.slane %v4959_v47, 2  ;;  %v768_v28 = vpop.permute.xlu1 %767  ;;  %v763_v59 = vpop.permute.xlu0 %762 }
  0xf3   : > { %v1523_v46 = vrot.slane %v4963_v6, 2  ;;  %3514 = vmatmul.mubr.msk.bf16.gmra.mrb[28].mxu1 %vm1030_vm3, %v5084_v60  ;;  %3672 = vmatmul.mubr.msk.bf16.gmra.mrb[16].mxu0 %vm1030_vm3, %v5086_v62  ;;  %v455_v40 = vmax.f32 %v401_v18, 0.0  ;;  %v454_v23 = vmax.f32 %v400_v55, 0.0  ;;  %v1518_v54 = vrot.slane %v4891_v48, 2 }
  0xf4   : > { %v1517_v49 = vrot.slane %v4895_v3, 2  ;;  %v830_v21 = vmul.f32 %v763_v59, %v452_v14  ;;  %v5550_v47 = vpack.c.bf16 %v4362_v45, %v4357_v36  ;;  %3675 = vmatprep.mubr.msk.bf16.mxu0 %vm1030_vm3, %v5091_v44  ;;  %v2038_v6 = vsel %vm899_vm1, %v2036_v31, %v2037_v10 }
  0xf5   : > { %v1522_v41 = vrot.slane %v4945_v56, 2  ;;  %v1521_v18 = vsel %vm1456_vm2, %v1518_v54, %v1520_v30  ;;  %v5110_v5 = vmul.f32 %v768_v28, %v453_v25  ;;  %v1526_v36 = vsel %vm1456_vm2, %v1523_v46, %v1525_v32  ;;  %v3225_v30 = vld [vmem:[%s5482_s4 + $0x6] sm:$0x3] }
  0xf6   : > { %3519 = vmatprep.mubr.msk.bf16.mxu1 %vm1030_vm3, %v5550_v47  ;;  %v2039_v35 = vrot.slane %v830_v21, 1  ;;  %v778_v48 = vpop.permute.xlu1 %777  ;;  %v773_v3 = vpop.permute.xlu0 %772  ;;  %v1519_v51 = vsel %vm1456_vm2, %v1517_v49, %v1518_v54  ;;  %v1636_v56 = vsel %vm1079_vm0, %v4428_v39, 0  ;;  %v1530_v11 = vrot.slane %v5028_v53, 2  ;;  %v5551_v47 = vld [vmem:[#allocation6_spill] sm:$0xff] }
  0xf7   : > { %v1524_v14 = vsel %vm1456_vm2, %v1522_v41, %v1523_v46  ;;  %v5115_v38 = vmul.f32 %v778_v48, %v455_v40  ;;  %v5117_v22 = vmul.f32 %v773_v3, %v454_v23  ;;  %v5122_v17 = vpack.c.bf16 %v1521_v18, %v1519_v51  ;;  %v5552_v18 = vld [vmem:[#allocation8_spill] sm:$0xff]  ;;  %v5553_v3 = vld [vmem:[#allocation10_spill] sm:$0xff] }
  0xf8   : > { %v2040_v45 = vsel %vm899_vm1, %v2037_v10, %v2039_v35  ;;  %v5128_v25 = vpack.c.bf16 %v1526_v36, %v1524_v14  ;;  %v1535_v10 = vrot.slane %v5051_v8, 2  ;;  %v1533_v31 = vrot.slane %v5053_v63, 2  ;;  %v5554_v14 = vld [vmem:[#allocation12_spill] sm:$0xff] }
  0xf9   : > { %v5124_v55 = vpack.c.bf16 %v2040_v45, %v2038_v6  ;;  %v2871_v42 = vrot.slane %v5115_v38, 2  ;;  %v2868_v39 = vrot.slane %v5110_v5, 2  ;;  %v2869_v32 = vrot.slane %v5117_v22, 2  ;;  %v5555_v45 = vld [vmem:[#allocation14_spill] sm:$0xff]  ;;  %v3310_v51 = vld [vmem:[%s5482_s4 + $0x10] sm:$0x3] }
  0xfa   : > { %v1528_v53 = vrot.slane %v4990_v0, 2  ;;  %v1527_v46 = vrot.slane %v4994_v58, 2  ;;  %v1532_v8 = vrot.slane %v5038_v33, 2  ;;  %v1536_v33 = vsel %vm1456_vm2, %v1533_v31, %v1535_v10 }
  0xfb   : > { %3520 = vmatmul.mubr.msk.bf16.vlgmr.msra.gmra.mrb[0].mxu1 %vm1030_vm3, %v4397_v12  ;;  %3676 = vmatmul.mubr.msk.bf16.gmra.mrb[20].mxu0 %vm1030_vm3, %v5122_v17  ;;  %v5150_v63 = vsel %vm1456_vm2, %v2868_v39, %v2869_v32  ;;  %v5153_v28 = vsel %vm1456_vm2, %v2869_v32, %v2871_v42  ;;  %v2248_v54 = vrot.slane %v830_v21, 2  ;;  %v2246_v6 = vrot.slane %v5077_v2, 2  ;;  %v5561_v39 = vld [vmem:[#allocation20_spill] sm:$0xff]  ;;  %v4070_v32 = vld [vmem:[%s5482_s4 + $0x8] sm:$0x3] }
  0xfc   : > { %3552 = vmatpush3.bf16.msra.mxu1 %v1636_v56  ;;  %3523 = vmatprep.mubr.msk.bf16.mxu1 %vm1030_vm3, %v4420_v34  ;;  %v1531_v0 = vsel %vm1456_vm2, %v1528_v53, %v1530_v11  ;;  %v2875_v58 = vpack.c.bf16 %v5153_v28, %v5150_v63  ;;  %v1534_v59 = vsel %vm1456_vm2, %v1532_v8, %v1533_v31  ;;  %v2245_v41 = vrot.slane %v5079_v16, 2  ;;  %v5556_v56 = vld [vmem:[#allocation16_spill] sm:$0xff]  ;;  %v5558_v11 = vld [vmem:[#allocation3_spill] sm:$0xff]  ;;  %v5560_v31 = vld [vmem:[#allocation18_spill] sm:$0xff] }
  0xfd   : > { %3679 = vmatprep.mubr.msk.bf16.mxu0 %vm1030_vm3, %v5128_v25  ;;  %4050 = vmatprep.subr.msk.bf16.mxu1 %vm1079_vm0, %v3225_v30  ;;  %v1529_v40 = vsel %vm1456_vm2, %v1527_v46, %v1528_v53  ;;  %v5163_v49 = vpack.c.bf16 %v1536_v33, %v1534_v59  ;;  %v2249_v21 = vsel %vm1456_vm2, %v2246_v6, %v2248_v54  ;;  %v2673_v36 = vsel %vm1079_vm0, %v4852_v19, 0  ;;  %v5557_v19 = vld [vmem:[#allocation4_spill] sm:$0xff]  ;;  %v5562_v53 = vld [vmem:[#allocation21_spill] sm:$0xff]  ;;  %v5564_v8 = vld [vmem:[#allocation7_spill] sm:$0xff] }
  0xfe   : > { %v5161_v23 = vpack.c.bf16 %v1531_v0, %v1529_v40  ;;  %v2247_v35 = vsel %vm1456_vm2, %v2245_v41, %v2246_v6  ;;  %v5559_v42 = vpack.c.bf16 %v5557_v19, %v5558_v11  ;;  %v1838_v10 = vsel %vm1079_vm0, %v3225_v30, 0  ;;  %v5565_v0 = vld [vmem:[#allocation9_spill] sm:$0xff]  ;;  %v5566_v59 = vld [vmem:[#allocation11_spill] sm:$0xff]  ;;  %v5571_v41 = vld [vmem:[#allocation22_spill] sm:$0xff] }
  0xff   : > { %v5177_v48 = vpack.c.bf16 %v2249_v21, %v2247_v35  ;;  %v5250_v30 = vpack.c.bf16 %v5077_v2, %v5079_v16  ;;  %v2454_v46 = vpack.c.bf16 %v5117_v22, %v5110_v5  ;;  %v5563_v2 = vld [vmem:[#allocation5_spill] sm:$0xff]  ;;  %v2882_v16 = vsel %vm1079_vm0, %v3310_v51, 0  ;;  %v5568_v40 = vld [vmem:[#allocation15_spill] sm:$0xff]  ;;  %v5572_v21 = vld [vmem:[#allocation2_spill] sm:$0xff] }
 0x100   : > { %v5567_v33 = vld [vmem:[#allocation13_spill] sm:$0xff]  ;;  %v5570_v6 = vld [vmem:[#allocation19_spill] sm:$0xff]  ;;  %v2662_v35 = vrot.slane %v5115_v38, 1 }
 0x101   : > { %v5569_v54 = vld [vmem:[#allocation17_spill] sm:$0xff] }
 0x103   : > { %3524 = vmatmul.mubr.msk.bf16.gmra.mrb[4].mxu1 %vm1030_vm3, %v5551_v47  ;;  %3680 = vmatmul.mubr.msk.bf16.gmra.mrb[24].mxu0 %vm1030_vm3, %v5161_v23 }
 0x104   : > { %3527 = vmatprep.mubr.msk.bf16.mxu1 %vm1030_vm3, %v5552_v18  ;;  %3683 = vmatprep.mubr.msk.bf16.mxu0 %vm1030_vm3, %v5163_v49 }
 0x10b   : > { %3528 = vmatmul.mubr.msk.bf16.gmra.mrb[8].mxu1 %vm1030_vm3, %v5553_v3  ;;  %3684 = vmatmul.mubr.msk.bf16.gmra.mrb[28].mxu0 %vm1030_vm3, %v5177_v48 }
 0x10c   : > { %3531 = vmatprep.mubr.msk.bf16.mxu1 %vm1030_vm3, %v5554_v14  ;;  %3689 = vmatprep.mubr.msk.bf16.mxu0 %vm1030_vm3, %v4420_v34 }
 0x113   : > { %3532 = vmatmul.mubr.msk.bf16.gmra.mrb[12].mxu1 %vm1030_vm3, %v5555_v45  ;;  %3690 = vmatmul.mubr.msk.bf16.vlgmr.msra.gmra.mrb[0].mxu0 %vm1030_vm3, %v5551_v47 }
 0x114   : > { %3535 = vmatprep.mubr.msk.bf16.mxu1 %vm1030_vm3, %v5556_v56  ;;  %3693 = vmatprep.mubr.msk.bf16.mxu0 %vm1030_vm3, %v5552_v18 }
 0x115   : > { %3722 = vmatpush3.bf16.msra.mxu0 %v2673_v36 }
 0x116   : > { %4056 = vmatprep.subr.msk.bf16.mxu0 %vm1079_vm0, %v3310_v51 }
 0x11b   : > { %3536 = vmatmul.mubr.msk.bf16.gmra.mrb[16].mxu1 %vm1030_vm3, %v4774_v50  ;;  %3694 = vmatmul.mubr.msk.bf16.gmra.mrb[4].mxu0 %vm1030_vm3, %v5553_v3 }
 0x11c   : > { %3539 = vmatprep.mubr.msk.bf16.mxu1 %vm1030_vm3, %v4808_v15  ;;  %3697 = vmatprep.mubr.msk.bf16.mxu0 %vm1030_vm3, %v5554_v14 }
 0x123   : > { %3540 = vmatmul.mubr.msk.bf16.gmra.mrb[20].mxu1 %vm1030_vm3, %v4877_v24  ;;  %3698 = vmatmul.mubr.msk.bf16.gmra.mrb[8].mxu0 %vm1030_vm3, %v5555_v45 }
 0x124   : > { %3543 = vmatprep.mubr.msk.bf16.mxu1 %vm1030_vm3, %v4910_v37  ;;  %3701 = vmatprep.mubr.msk.bf16.mxu0 %vm1030_vm3, %v5556_v56 }
 0x12b   : > { %3544 = vmatmul.mubr.msk.bf16.gmra.mrb[24].mxu1 %vm1030_vm3, %v4977_v61  ;;  %3702 = vmatmul.mubr.msk.bf16.gmra.mrb[12].mxu0 %vm1030_vm3, %v4774_v50 }
 0x12c   : > { %3547 = vmatprep.mubr.msk.bf16.mxu1 %vm1030_vm3, %v5010_v57  ;;  %3705 = vmatprep.mubr.msk.bf16.mxu0 %vm1030_vm3, %v4808_v15 }
 0x133   : > { %3548 = vmatmul.mubr.msk.bf16.gmra.mrb[28].mxu1 %vm1030_vm3, %v5069_v1  ;;  %3706 = vmatmul.mubr.msk.bf16.gmra.mrb[16].mxu0 %vm1030_vm3, %v4877_v24 }
 0x134   : > { %3553 = vmatprep.mubr.msk.bf16.mxu1 %vm1030_vm3, %v5559_v42  ;;  %3709 = vmatprep.mubr.msk.bf16.mxu0 %vm1030_vm3, %v4910_v37 }
 0x13b   : > { %3554 = vmatmul.mubr.msk.bf16.vlgmr.msra.gmra.mrb[0].mxu1 %vm1030_vm3, %v5560_v31  ;;  %3710 = vmatmul.mubr.msk.bf16.gmra.mrb[20].mxu0 %vm1030_vm3, %v4977_v61 }
 0x13c   : > { %3586 = vmatpush3.bf16.msra.mxu1 %v1838_v10  ;;  %3557 = vmatprep.mubr.msk.bf16.mxu1 %vm1030_vm3, %v5561_v39 }
 0x13d   : > { %3713 = vmatprep.mubr.msk.bf16.mxu0 %vm1030_vm3, %v5010_v57  ;;  %4052 = vmatprep.subr.msk.bf16.mxu1 %vm1079_vm0, %v4070_v32 }
 0x143   : > { %3558 = vmatmul.mubr.msk.bf16.gmra.mrb[4].mxu1 %vm1030_vm3, %v5562_v53  ;;  %3714 = vmatmul.mubr.msk.bf16.gmra.mrb[24].mxu0 %vm1030_vm3, %v5069_v1 }
 0x144   : > { %3561 = vmatprep.mubr.msk.bf16.mxu1 %vm1030_vm3, %v4903_v7  ;;  %3717 = vmatprep.mubr.msk.bf16.mxu0 %vm1030_vm3, %v5250_v30 }
 0x14b   : > { %3562 = vmatmul.mubr.msk.bf16.gmra.mrb[8].mxu1 %vm1030_vm3, %v4912_v52  ;;  %3718 = vmatmul.mubr.msk.bf16.gmra.mrb[28].mxu0 %vm1030_vm3, %v2454_v46 }
 0x14c   : > { %3565 = vmatprep.mubr.msk.bf16.mxu1 %vm1030_vm3, %v4969_v13  ;;  %3723 = vmatprep.mubr.msk.bf16.mxu0 %vm1030_vm3, %v5563_v2 }
 0x153   : > { %3566 = vmatmul.mubr.msk.bf16.gmra.mrb[12].mxu1 %vm1030_vm3, %v4971_v20  ;;  %3724 = vmatmul.mubr.msk.bf16.vlgmr.msra.gmra.mrb[0].mxu0 %vm1030_vm3, %v5564_v8 }
 0x154   : > { %3569 = vmatprep.mubr.msk.bf16.mxu1 %vm1030_vm3, %v5032_v26  ;;  %3727 = vmatprep.mubr.msk.bf16.mxu0 %vm1030_vm3, %v5565_v0 }
 0x155   : > { %3756 = vmatpush3.bf16.msra.mxu0 %v2882_v16 }
 0x15b   : > { %3570 = vmatmul.mubr.msk.bf16.gmra.mrb[16].mxu1 %vm1030_vm3, %v5041_v9  ;;  %3728 = vmatmul.mubr.msk.bf16.gmra.mrb[4].mxu0 %vm1030_vm3, %v5566_v59 }
 0x15c   : > { %3573 = vmatprep.mubr.msk.bf16.mxu1 %vm1030_vm3, %v5086_v62  ;;  %3731 = vmatprep.mubr.msk.bf16.mxu0 %vm1030_vm3, %v5567_v33 }
 0x163   : > { %3574 = vmatmul.mubr.msk.bf16.gmra.mrb[20].mxu1 %vm1030_vm3, %v5091_v44  ;;  %3732 = vmatmul.mubr.msk.bf16.gmra.mrb[8].mxu0 %vm1030_vm3, %v5568_v40 }
 0x164   : > { %3577 = vmatprep.mubr.msk.bf16.mxu1 %vm1030_vm3, %v5122_v17  ;;  %3735 = vmatprep.mubr.msk.bf16.mxu0 %vm1030_vm3, %v5569_v54 }
 0x16b   : > { %3578 = vmatmul.mubr.msk.bf16.gmra.mrb[24].mxu1 %vm1030_vm3, %v5128_v25  ;;  %3736 = vmatmul.mubr.msk.bf16.gmra.mrb[12].mxu0 %vm1030_vm3, %v5570_v6 }
 0x16c   : > { %3581 = vmatprep.mubr.msk.bf16.mxu1 %vm1030_vm3, %v5161_v23  ;;  %3739 = vmatprep.mubr.msk.bf16.mxu0 %vm1030_vm3, %v5571_v41 }
 0x173   : > { %3582 = vmatmul.mubr.msk.bf16.gmra.mrb[28].mxu1 %vm1030_vm3, %v5163_v49  ;;  %3740 = vmatmul.mubr.msk.bf16.gmra.mrb[16].mxu0 %vm1030_vm3, %v4901_v43 }
 0x174   : > { %3587 = vmatprep.mubr.msk.bf16.mxu1 %vm1030_vm3, %v4397_v12  ;;  %3743 = vmatprep.mubr.msk.bf16.mxu0 %vm1030_vm3, %v4967_v27  ;;  %v2660_v12 = vrot.slane %v5117_v22, 1 }
 0x176   : > { %v2663_v38 = vsel %vm899_vm1, %v2660_v12, %v2662_v35 }
 0x17b   : > { %3588 = vmatmul.mubr.msk.bf16.vlgmr.msra.gmra.mrb[0].mxu1 %vm1030_vm3, %v4420_v34  ;;  %3744 = vmatmul.mubr.msk.bf16.gmra.mrb[20].mxu0 %vm1030_vm3, %v5001_v4  ;;  %v2659_v34 = vrot.slane %v5110_v5, 1 }
 0x17c   : > { %3790 = vmatpush3.bf16.msra.mxu1 %v5572_v21  ;;  %3591 = vmatprep.mubr.msk.bf16.mxu1 %vm1030_vm3, %v5551_v47 }
 0x17d   : > { %3747 = vmatprep.mubr.msk.bf16.mxu0 %vm1030_vm3, %v5060_v29  ;;  %v2661_v47 = vsel %vm899_vm1, %v2659_v34, %v2660_v12 }
 0x17e   : > { %v2666_v36 = vpack.c.bf16 %v2663_v38, %v2661_v47 }
 0x183   : > { %3592 = vmatmul.mubr.msk.bf16.gmra.mrb[4].mxu1 %vm1030_vm3, %v5552_v18  ;;  %3748 = vmatmul.mubr.msk.bf16.gmra.mrb[24].mxu0 %vm1030_vm3, %v5084_v60 }
 0x184   : > { %3595 = vmatprep.mubr.msk.bf16.mxu1 %vm1030_vm3, %v5553_v3  ;;  %3751 = vmatprep.mubr.msk.bf16.mxu0 %vm1030_vm3, %v5124_v55 }
 0x18b   : > { %3596 = vmatmul.mubr.msk.bf16.gmra.mrb[8].mxu1 %vm1030_vm3, %v5554_v14  ;;  %3752 = vmatmul.mubr.msk.bf16.gmra.mrb[28].mxu0 %vm1030_vm3, %v2666_v36 }
 0x18c   : > { %3599 = vmatprep.mubr.msk.bf16.mxu1 %vm1030_vm3, %v5555_v45  ;;  %3757 = vmatprep.mubr.msk.bf16.mxu0 %vm1030_vm3, %v5561_v39 }
 0x193   : > { %3600 = vmatmul.mubr.msk.bf16.gmra.mrb[12].mxu1 %vm1030_vm3, %v5556_v56  ;;  %3758 = vmatmul.mubr.msk.bf16.vlgmr.msra.gmra.mrb[0].mxu0 %vm1030_vm3, %v5562_v53 }
 0x194   : > { %3603 = vmatprep.mubr.msk.bf16.mxu1 %vm1030_vm3, %v4774_v50  ;;  %3761 = vmatprep.mubr.msk.bf16.mxu0 %vm1030_vm3, %v4903_v7 }
 0x19b   : > { %3604 = vmatmul.mubr.msk.bf16.gmra.mrb[16].mxu1 %vm1030_vm3, %v4808_v15  ;;  %3762 = vmatmul.mubr.msk.bf16.gmra.mrb[4].mxu0 %vm1030_vm3, %v4912_v52 }
 0x19c   : > { %3607 = vmatprep.mubr.msk.bf16.mxu1 %vm1030_vm3, %v4877_v24  ;;  %3765 = vmatprep.mubr.msk.bf16.mxu0 %vm1030_vm3, %v4969_v13 }
 0x1a3   : > { %3608 = vmatmul.mubr.msk.bf16.gmra.mrb[20].mxu1 %vm1030_vm3, %v4910_v37  ;;  %3766 = vmatmul.mubr.msk.bf16.gmra.mrb[8].mxu0 %vm1030_vm3, %v4971_v20 }
 0x1a4   : > { %3611 = vmatprep.mubr.msk.bf16.mxu1 %vm1030_vm3, %v4977_v61  ;;  %3769 = vmatprep.mubr.msk.bf16.mxu0 %vm1030_vm3, %v5032_v26 }
 0x1ab   : > { %3612 = vmatmul.mubr.msk.bf16.gmra.mrb[24].mxu1 %vm1030_vm3, %v5010_v57  ;;  %3770 = vmatmul.mubr.msk.bf16.gmra.mrb[12].mxu0 %vm1030_vm3, %v5041_v9 }
 0x1ac   : > { %3615 = vmatprep.mubr.msk.bf16.mxu1 %vm1030_vm3, %v5069_v1  ;;  %3773 = vmatprep.mubr.msk.bf16.mxu0 %vm1030_vm3, %v5086_v62 }
 0x1b3   : > { %3616 = vmatmul.mubr.msk.bf16.gmra.mrb[28].mxu1 %vm1030_vm3, %v5250_v30  ;;  %3774 = vmatmul.mubr.msk.bf16.gmra.mrb[16].mxu0 %vm1030_vm3, %v5091_v44 }
 0x1b4   : > { %3637 = vmatprep.mubr.msk.bf16.mxu1 %vm1030_vm3, %v5570_v6  ;;  %3777 = vmatprep.mubr.msk.bf16.mxu0 %vm1030_vm3, %v5122_v17 }
 0x1bb   : > { %3638 = vmatmul.mubr.msk.bf16.vlgmr.msra.gmra.mrb[16].mxu1 %vm1030_vm3, %v5571_v41  ;;  %3778 = vmatmul.mubr.msk.bf16.gmra.mrb[20].mxu0 %vm1030_vm3, %v5128_v25 }
 0x1bc   : > { %3641 = vmatprep.mubr.msk.bf16.mxu1 %vm1030_vm3, %v4901_v43  ;;  %3781 = vmatprep.mubr.msk.bf16.mxu0 %vm1030_vm3, %v5161_v23 }
 0x1c3   : > { %3642 = vmatmul.mubr.msk.bf16.gmra.mrb[20].mxu1 %vm1030_vm3, %v4967_v27  ;;  %3782 = vmatmul.mubr.msk.bf16.gmra.mrb[24].mxu0 %vm1030_vm3, %v5163_v49 }
 0x1c4   : > { %3645 = vmatprep.mubr.msk.bf16.mxu1 %vm1030_vm3, %v5001_v4  ;;  %3785 = vmatprep.mubr.msk.bf16.mxu0 %vm1030_vm3, %v5177_v48 }
 0x1cb   : > { %3646 = vmatmul.mubr.msk.bf16.gmra.mrb[24].mxu1 %vm1030_vm3, %v5060_v29  ;;  %3786 = vmatmul.mubr.msk.bf16.gmra.mrb[28].mxu0 %vm1030_vm3, %v2875_v58 }
 0x1cc   : > { %3649 = vmatprep.mubr.msk.bf16.mxu1 %vm1030_vm3, %v5084_v60 }
 0x1d3   : > { %3650 = vmatmul.mubr.msk.bf16.gmra.mrb[28].mxu1 %vm1030_vm3, %v5124_v55 }
 0x24e   : > { %v3589_v50 = vpop.f32.mrb[0].mxu1 }
 0x24f   : > { %v1874_v15 = vpop.f32.mrb[1].mxu1 }
 0x250   : > { %v3590_v24 = vpop.f32.mrb[2].mxu1 }
 0x251   : > { %v1877_v43 = vpop.f32.mrb[3].mxu1 }
 0x256   : > { %v3593_v7 = vpop.f32.mrb[4].mxu1 }
 0x257   : > { %v1890_v37 = vpop.f32.mrb[5].mxu1 }
 0x258   : > { %v3594_v52 = vpop.f32.mrb[6].mxu1 }
 0x259   : > { %v1893_v27 = vpop.f32.mrb[7].mxu1 }
 0x25e   : > { %v3597_v13 = vpop.f32.mrb[8].mxu1 }
 0x25f   : > { %v1906_v20 = vpop.f32.mrb[9].mxu1 }
 0x260   : > { %v3598_v61 = vpop.f32.mrb[10].mxu1 }
 0x261   : > { %v1909_v4 = vpop.f32.mrb[11].mxu1 }
 0x266   : > { %v3601_v57 = vpop.f32.mrb[12].mxu1  ;;  %v3759_v26 = vpop.f32.mrb[0].mxu0 }
 0x267   : > { %v3791_v9 = vadd.f32 %v3759_v26, %v3589_v50  ;;  %v1922_v29 = vpop.f32.mrb[13].mxu1  ;;  %v2918_v1 = vpop.f32.mrb[1].mxu0 }
 0x268   : > { %v3792_v60 = vadd.f32 %v2918_v1, %v1874_v15  ;;  %v3602_v62 = vpop.f32.mrb[14].mxu1  ;;  %v3760_v44 = vpop.f32.mrb[2].mxu0 }
 0x269   : > { %3080 = vst.msk [vmem:[%s5409_s23 + $0x10] sm:$0xff] %vm3077_vm4, %v3791_v9  ;;  %v3793_v5 = vadd.f32 %v3760_v44, %v3590_v24  ;;  %v1925_v22 = vpop.f32.mrb[15].mxu1  ;;  %v2921_v17 = vpop.f32.mrb[3].mxu0 }
 0x26a   : > { %3078 = vst.msk [vmem:[%s5409_s23] sm:$0xff] %vm3077_vm4, %v3792_v60  ;;  %v3794_v55 = vadd.f32 %v2921_v17, %v1877_v43 }
 0x26b   : > { %3081 = vst.msk [vmem:[%s5409_s23 + $0x18] sm:$0xff] %vm3077_vm4, %v3793_v5 }
 0x26c   : > { %3079 = vst.msk [vmem:[%s5409_s23 + $0x8] sm:$0xff] %vm3077_vm4, %v3794_v55 }
 0x26e   : > { %v3763_v25 = vpop.f32.mrb[4].mxu0 }
 0x26f   : > { %v3795_v63 = vadd.f32 %v3763_v25, %v3593_v7  ;;  %v2934_v28 = vpop.f32.mrb[5].mxu0 }
 0x270   : > { %v3796_v58 = vadd.f32 %v2934_v28, %v1890_v37  ;;  %v3764_v23 = vpop.f32.mrb[6].mxu0 }
 0x271   : > { %3084 = vst.msk [vmem:[%s5409_s23 + $0x30] sm:$0xff] %vm3077_vm4, %v3795_v63  ;;  %v3797_v49 = vadd.f32 %v3764_v23, %v3594_v52  ;;  %v2937_v18 = vpop.f32.mrb[7].mxu0 }
 0x272   : > { %3082 = vst.msk [vmem:[%s5409_s23 + $0x20] sm:$0xff] %vm3077_vm4, %v3796_v58  ;;  %v3798_v48 = vadd.f32 %v2937_v18, %v1893_v27 }
 0x273   : > { %3085 = vst.msk [vmem:[%s5409_s23 + $0x38] sm:$0xff] %vm3077_vm4, %v3797_v49 }
 0x274   : > { %3083 = vst.msk [vmem:[%s5409_s23 + $0x28] sm:$0xff] %vm3077_vm4, %v3798_v48 }
 0x276   : > { %v3767_v3 = vpop.f32.mrb[8].mxu0 }
 0x277   : > { %v3799_v14 = vadd.f32 %v3767_v3, %v3597_v13  ;;  %v2950_v45 = vpop.f32.mrb[9].mxu0 }
 0x278   : > { %v3800_v51 = vadd.f32 %v2950_v45, %v1906_v20  ;;  %v3768_v56 = vpop.f32.mrb[10].mxu0 }
 0x279   : > { %3088 = vst.msk [vmem:[%s5409_s23 + $0x50] sm:$0xff] %vm3077_vm4, %v3799_v14  ;;  %v3801_v19 = vadd.f32 %v3768_v56, %v3598_v61  ;;  %v2953_v11 = vpop.f32.mrb[11].mxu0 }
 0x27a   : > { %3086 = vst.msk [vmem:[%s5409_s23 + $0x40] sm:$0xff] %vm3077_vm4, %v3800_v51  ;;  %v3802_v42 = vadd.f32 %v2953_v11, %v1909_v4 }
 0x27b   : > { %3089 = vst.msk [vmem:[%s5409_s23 + $0x58] sm:$0xff] %vm3077_vm4, %v3801_v19 }
 0x27c   : > { %3087 = vst.msk [vmem:[%s5409_s23 + $0x48] sm:$0xff] %vm3077_vm4, %v3802_v42 }
 0x27e   : > { %v3771_v10 = vpop.f32.mrb[12].mxu0 }
 0x27f   : > { %v3803_v31 = vadd.f32 %v3771_v10, %v3601_v57  ;;  %v2966_v39 = vpop.f32.mrb[13].mxu0 }
 0x280   : > { %v3804_v32 = vadd.f32 %v2966_v39, %v1922_v29  ;;  %v3772_v30 = vpop.f32.mrb[14].mxu0 }
 0x281   : > { %3092 = vst.msk [vmem:[%s5409_s23 + $0x70] sm:$0xff] %vm3077_vm4, %v3803_v31  ;;  %v3805_v53 = vadd.f32 %v3772_v30, %v3602_v62  ;;  %v2969_v46 = vpop.f32.mrb[15].mxu0 }
 0x282   : > { %3090 = vst.msk [vmem:[%s5409_s23 + $0x60] sm:$0xff] %vm3077_vm4, %v3804_v32  ;;  %v3806_v2 = vadd.f32 %v2969_v46, %v1925_v22 }
 0x283   : > { %3093 = vst.msk [vmem:[%s5409_s23 + $0x78] sm:$0xff] %vm3077_vm4, %v3805_v53 }
 0x284   : > { %3091 = vst.msk [vmem:[%s5409_s23 + $0x68] sm:$0xff] %vm3077_vm4, %v3806_v2 }
 0x286   : > { %v3775_v16 = vpop.f32.mrb[16].mxu0 }
 0x287   : > { %v2982_v8 = vpop.f32.mrb[17].mxu0 }
 0x288   : > { %v3776_v0 = vpop.f32.mrb[18].mxu0 }
 0x289   : > { %v2985_v59 = vpop.f32.mrb[19].mxu0 }
 0x28e   : > { %v3639_v33 = vpop.f32.mrb[16].mxu1  ;;  %v3779_v40 = vpop.f32.mrb[20].mxu0 }
 0x28f   : > { %v3807_v54 = vadd.f32 %v3775_v16, %v3639_v33  ;;  %v2150_v6 = vpop.f32.mrb[17].mxu1  ;;  %v2998_v41 = vpop.f32.mrb[21].mxu0 }
 0x290   : > { %v3808_v21 = vadd.f32 %v2982_v8, %v2150_v6  ;;  %v3640_v35 = vpop.f32.mrb[18].mxu1  ;;  %v3780_v12 = vpop.f32.mrb[22].mxu0 }
 0x291   : > { %3096 = vst.msk [vmem:[%s5409_s23 + $0x90] sm:$0xff] %vm3077_vm4, %v3807_v54  ;;  %v3809_v34 = vadd.f32 %v3776_v0, %v3640_v35  ;;  %v2153_v47 = vpop.f32.mrb[19].mxu1  ;;  %v3001_v38 = vpop.f32.mrb[23].mxu0 }
 0x292   : > { %3094 = vst.msk [vmem:[%s5409_s23 + $0x80] sm:$0xff] %vm3077_vm4, %v3808_v21  ;;  %v3810_v36 = vadd.f32 %v2985_v59, %v2153_v47 }
 0x293   : > { %3097 = vst.msk [vmem:[%s5409_s23 + $0x98] sm:$0xff] %vm3077_vm4, %v3809_v34 }
 0x294   : > { %3095 = vst.msk [vmem:[%s5409_s23 + $0x88] sm:$0xff] %vm3077_vm4, %v3810_v36 }
 0x296   : > { %v3643_v50 = vpop.f32.mrb[20].mxu1  ;;  %v3783_v15 = vpop.f32.mrb[24].mxu0 }
 0x297   : > { %v3811_v24 = vadd.f32 %v3779_v40, %v3643_v50  ;;  %v2166_v43 = vpop.f32.mrb[21].mxu1  ;;  %v3014_v7 = vpop.f32.mrb[25].mxu0 }
 0x298   : > { %v3812_v37 = vadd.f32 %v2998_v41, %v2166_v43  ;;  %v3644_v52 = vpop.f32.mrb[22].mxu1  ;;  %v3784_v27 = vpop.f32.mrb[26].mxu0 }
 0x299   : > { %3100 = vst.msk [vmem:[%s5409_s23 + $0xb0] sm:$0xff] %vm3077_vm4, %v3811_v24  ;;  %v3813_v13 = vadd.f32 %v3780_v12, %v3644_v52  ;;  %v2169_v20 = vpop.f32.mrb[23].mxu1  ;;  %v3017_v61 = vpop.f32.mrb[27].mxu0 }
 0x29a   : > { %3098 = vst.msk [vmem:[%s5409_s23 + $0xa0] sm:$0xff] %vm3077_vm4, %v3812_v37  ;;  %v3814_v4 = vadd.f32 %v3001_v38, %v2169_v20 }
 0x29b   : > { %3101 = vst.msk [vmem:[%s5409_s23 + $0xb8] sm:$0xff] %vm3077_vm4, %v3813_v13 }
 0x29c   : > { %3099 = vst.msk [vmem:[%s5409_s23 + $0xa8] sm:$0xff] %vm3077_vm4, %v3814_v4 }
 0x29e   : > { %v3647_v57 = vpop.f32.mrb[24].mxu1  ;;  %v3787_v26 = vpop.f32.mrb[28].mxu0 }
 0x29f   : > { %v3815_v9 = vadd.f32 %v3783_v15, %v3647_v57  ;;  %v2182_v29 = vpop.f32.mrb[25].mxu1  ;;  %v3030_v1 = vpop.f32.mrb[29].mxu0 }
 0x2a0   : > { %v3816_v60 = vadd.f32 %v3014_v7, %v2182_v29  ;;  %v3648_v62 = vpop.f32.mrb[26].mxu1  ;;  %v3788_v44 = vpop.f32.mrb[30].mxu0 }
 0x2a1   : > { %3104 = vst.msk [vmem:[%s5409_s23 + $0xd0] sm:$0xff] %vm3077_vm4, %v3815_v9  ;;  %v3817_v5 = vadd.f32 %v3784_v27, %v3648_v62  ;;  %v2185_v22 = vpop.f32.mrb[27].mxu1  ;;  %v3033_v17 = vpop.f32.mrb[31].mxu0 }
 0x2a2   : > { %3102 = vst.msk [vmem:[%s5409_s23 + $0xc0] sm:$0xff] %vm3077_vm4, %v3816_v60  ;;  %v3818_v55 = vadd.f32 %v3017_v61, %v2185_v22 }
 0x2a3   : > { %3105 = vst.msk [vmem:[%s5409_s23 + $0xd8] sm:$0xff] %vm3077_vm4, %v3817_v5 }
 0x2a4   : > { %3103 = vst.msk [vmem:[%s5409_s23 + $0xc8] sm:$0xff] %vm3077_vm4, %v3818_v55 }
 0x2a6   : > { %v3651_v25 = vpop.f32.mrb[28].mxu1 }
 0x2a7   : > { %v3819_v63 = vadd.f32 %v3787_v26, %v3651_v25  ;;  %v2198_v28 = vpop.f32.mrb[29].mxu1 }
 0x2a8   : > { %v3820_v58 = vadd.f32 %v3030_v1, %v2198_v28  ;;  %v3652_v23 = vpop.f32.mrb[30].mxu1 }
 0x2a9   : > { %3108 = vst.msk [vmem:[%s5409_s23 + $0xf0] sm:$0xff] %vm3077_vm4, %v3819_v63  ;;  %v3821_v49 = vadd.f32 %v3788_v44, %v3652_v23  ;;  %v2201_v18 = vpop.f32.mrb[31].mxu1 }
 0x2aa   : > { %3106 = vst.msk [vmem:[%s5409_s23 + $0xe0] sm:$0xff] %vm3077_vm4, %v3820_v58  ;;  %v3822_v48 = vadd.f32 %v3033_v17, %v2201_v18 }
 0x2ab   : > { %3109 = vst.msk [vmem:[%s5409_s23 + $0xf8] sm:$0xff] %vm3077_vm4, %v3821_v49 }
 0x2ac   : > { %3107 = vst.msk [vmem:[%s5409_s23 + $0xe8] sm:$0xff] %vm3077_vm4, %v3822_v48 }
 0x2ad PF: > { %s15_s18 = sadd.s32 1, %s4077_s18  }
 0x2ae   : > { %p12_p4 = scmp.ge.s32.totalorder %s15_s18, 4  }
 0x2b0   :  { %14 = sbr.rel (!%p12_p4) target bundleno = 1 (0x1), region = 78 }

// kernel: basic_block_forward.7
= control target key start
LH: loop header
LB: loop body
LE: loop exit
PB: predicated region body
PF: predicated region fallthrough
CT: control target
= control target key end

     0   :  { %s4776_s30 = smov 0   ;;  %s6067_s0 = inlined_call_operand.vmem [shape: f32[2,18,18,8], index: 0, kind: input, shape index: {}]   ;;  %s6068_s1 = inlined_call_operand.vmem [shape: f32[18,18,1], index: 1, kind: input, shape index: {}]   ;;  %s6069_s2 = inlined_call_operand.vmem [shape: f32[1,8], index: 2, kind: input, shape index: {}]   ;;  %s6070_s3 = inlined_call_operand.vmem [shape: f32[1,8], index: 3, kind: input, shape index: {}]   ;;  %s6071_s4 = inlined_call_operand.vmem [shape: bf16[9,8,8], index: 4, kind: input, shape index: {}]   ;;  %s6072_s5 = inlined_call_operand.vmem [shape: f32[2,256,4], index: 5, kind: input, shape index: {}]   ;;  %s6073_s6 = inlined_call_operand.vmem [shape: f32[1,4], index: 6, kind: input, shape index: {}]   ;;  %s6074_s7 = inlined_call_operand.vmem [shape: f32[1,4], index: 7, kind: input, shape index: {}]   ;;  %s6075_s8 = inlined_call_operand.vmem [shape: bf16[4,8], index: 8, kind: input, shape index: {}]   ;;  %s6076_s9 = inlined_call_operand.vmem [shape: f32[2,256,8], index: 9, kind: output, shape index: {}]  }
   0x1 LB: > { %s3709_s10 = sadd.s32 4294967295, %s4723_s30   ;;  %p3713_p0 = scmp.ge.s32.totalorder %s4723_s30, 1  ;;  %s4723_s30 = sphi %s4776_s30, %s19_s30  }
   0x2   : > { %p297_p1 = scmp.lt.s32.totalorder %s4723_s30, 3 }
   0x4   : > { %p298_p2 = pnand %p3713_p0, %p297_p1 }
   0x6   : > { %301 = sbr.rel (%p298_p2) target bundleno = 724 (0x2d4), region = 56 }
   0xd   : > { %v586_v0 = vld [vmem:[%s6068_s1 + $0x10] sm:$0x3]  ;;  %v584_v1 = vld [vmem:[%s6068_s1] sm:$0xff]  ;;  %v4725_v2 = vmov 0   ;;  %v587_v3 = vld [vmem:[%s6068_s1 + $0x18] sm:$0xff]  ;;  %vm1207_vm0 = vcmask 1043456  }
   0xe   : > { %4714 = vset.pattern.permute.xlu1 %v4725_v2  ;;  %4713 = vset.pattern.permute.xlu0 %v4725_v2  ;;  %v585_v4 = vld [vmem:[%s6068_s1 + $0x8] sm:$0xff]  ;;  %v588_v6 = vld [vmem:[%s6068_s1 + $0x20] sm:$0xff]  ;;  %v591_v7 = vld [vmem:[%s6068_s1 + $0x38] sm:$0xff]  ;;  %p338_p3 = scmp.lt.s32.totalorder %s3709_s10, 1  ;;  %vm1027_vm1 = vcmask 1046528   ;;  %vm1584_vm2 = vcmask 1045504  }
   0xf   : > { %650 = vperm.xlu1 %4714, %v586_v0   ;;  %640 = vperm.xlu0 %4713, %v584_v1   ;;  %v589_v5 = vld [vmem:[%s6068_s1 + $0x28] sm:$0x3]  ;;  %v590_v8 = vld [vmem:[%s6068_s1 + $0x30] sm:$0xff]  ;;  %v592_v10 = vld [vmem:[%s6068_s1 + $0x40] sm:$0x3]  ;;  %vm1158_vm3 = vcmask 64512  }
  0x10   : > { %v593_v9 = vld [vmem:[%s6068_s1 + $0x48] sm:$0xff]  ;;  %v595_v11 = vld [vmem:[%s6068_s1 + $0x58] sm:$0x3]  ;;  %v594_v12 = vld [vmem:[%s6068_s1 + $0x50] sm:$0xff]  ;;  %s6143_s10 = smov (!%p338_p3, %s3709_s10), 1  ;;  %vm3413_vm4 = vcmask 1041408  }
  0x11   : > { %v3721_v13 = vld [vmem:[%s6071_s4 + $0x4] sm:$0xf]  ;;  %v3805_v15 = vld [vmem:[%s6071_s4 + $0x14] sm:$0xf]  ;;  %v597_v16 = vld [vmem:[%s6068_s1 + $0x68] sm:$0xff]  ;;  %s4703_s13 = smul.u32 432, %s6143_s10 }
  0x12   : > { %4693 = vmatprep.subr.msk.bf16.mxu1 %vm1207_vm0, %v3721_v13  ;;  %v1209_v14 = vsel %vm1207_vm0, %v3721_v13, 0  ;;  %v596_v17 = vld [vmem:[%s6068_s1 + $0x60] sm:$0xff]  ;;  %4698 = vmatprep.subr.msk.bf16.mxu0 %vm1207_vm0, %v3805_v15  ;;  %v2387_v18 = vsel %vm1207_vm0, %v3805_v15, 0  ;;  %v599_v19 = vld [vmem:[%s6068_s1 + $0x78] sm:$0xff]  ;;  %v598_v20 = vld [vmem:[%s6068_s1 + $0x70] sm:$0x3] }
  0x13   : > { %655 = vperm.xlu1 %4714, %v587_v3   ;;  %645 = vperm.xlu0 %4713, %v585_v4   ;;  %v601_v21 = vld [vmem:[%s6068_s1 + $0x88] sm:$0x3]  ;;  %v600_v22 = vld [vmem:[%s6068_s1 + $0x80] sm:$0xff]  ;;  %v603_v23 = vld [vmem:[%s6068_s1 + $0x98] sm:$0xff]  ;;  %s4980_s16 = scalar_lea.vmem %s6067_s0, %s4703_s13  ;;  %s3893_s18 = sshll.u32 %s6143_s10, 8  ;;  %vm3364_vm5 = vcmask 31744  }
  0x14   : > { %4066 = vmatpush3.bf16.msra.mxu1 %v1209_v14  ;;  %4236 = vmatpush3.bf16.msra.mxu0 %v2387_v18  ;;  %v602_v24 = vld [vmem:[%s6068_s1 + $0x90] sm:$0xff]  ;;  %v605_v25 = vld [vmem:[%s6068_s1 + $0xa8] sm:$0xff]  ;;  %v604_v26 = vld [vmem:[%s6068_s1 + $0xa0] sm:$0x3]  ;;  %s5819_s21 = scalar_lea.vmem %s6072_s5, %s3893_s18  ;;  %s5998_s28 = scalar_lea.vmem %s6076_s9, %s3893_s18 }
  0x15   : > { %v607_v27 = vld [vmem:[%s6068_s1 + $0xb8] sm:$0x3]  ;;  %v606_v28 = vld [vmem:[%s6068_s1 + $0xb0] sm:$0xff]  ;;  %v609_v29 = vld [vmem:[%s6068_s1 + $0xc8] sm:$0xff] }
  0x16   : > { %v608_v30 = vld [vmem:[%s6068_s1 + $0xc0] sm:$0xff]  ;;  %v611_v31 = vld [vmem:[%s6068_s1 + $0xd8] sm:$0xff]  ;;  %v610_v32 = vld [vmem:[%s6068_s1 + $0xd0] sm:$0x3] }
  0x17   : > { %665 = vperm.xlu1 %4714, %v589_v5   ;;  %660 = vperm.xlu0 %4713, %v588_v6   ;;  %v4881_v33 = vld [vmem:[%s6071_s4] sm:$0xf]  ;;  %v4886_v34 = vld [vmem:[%s6071_s4 + $0x18] sm:$0xf]  ;;  %v613_v35 = vld [vmem:[%s6068_s1 + $0xe8] sm:$0x3] }
  0x18   : > { %v612_v36 = vld [vmem:[%s6068_s1 + $0xe0] sm:$0xff]  ;;  %4694 = vmatprep.subr.msk.bf16.mxu1 %vm1207_vm0, %v4881_v33  ;;  %4699 = vmatprep.subr.msk.bf16.mxu0 %vm1207_vm0, %v4886_v34  ;;  %v615_v37 = vld [vmem:[%s6068_s1 + $0xf8] sm:$0xff]  ;;  %v614_v38 = vld [vmem:[%s6068_s1 + $0xf0] sm:$0xff] }
  0x19   : > { %v617_v39 = vld [vmem:[%s6068_s1 + $0x108] sm:$0xff]  ;;  %v616_v40 = vld [vmem:[%s6068_s1 + $0x100] sm:$0x3]  ;;  %v619_v41 = vld [vmem:[%s6068_s1 + $0x118] sm:$0x3] }
  0x1a   : > { %v618_v42 = vld [vmem:[%s6068_s1 + $0x110] sm:$0xff]  ;;  %v621_v43 = vld [vmem:[%s6068_s1 + $0x128] sm:$0xff]  ;;  %v620_v44 = vld [vmem:[%s6068_s1 + $0x120] sm:$0xff] }
  0x1b   : > { %675 = vperm.xlu1 %4714, %v591_v7   ;;  %670 = vperm.xlu0 %4713, %v590_v8   ;;  %v623_v45 = vld [vmem:[%s6068_s1 + $0x138] sm:$0xff]  ;;  %v622_v46 = vld [vmem:[%s6068_s1 + $0x130] sm:$0x3]  ;;  %v625_v47 = vld [vmem:[%s6068_s1 + $0x148] sm:$0x3] }
  0x1c   : > { %v624_v48 = vld [vmem:[%s6068_s1 + $0x140] sm:$0xff]  ;;  %v627_v49 = vld [vmem:[%s6068_s1 + $0x158] sm:$0xff]  ;;  %v626_v50 = vld [vmem:[%s6068_s1 + $0x150] sm:$0xff] }
  0x1d   : > { %v629_v51 = vld [vmem:[%s6068_s1 + $0x168] sm:$0xff]  ;;  %v628_v52 = vld [vmem:[%s6068_s1 + $0x160] sm:$0x3]  ;;  %v631_v53 = vld [vmem:[%s6068_s1 + $0x178] sm:$0x3] }
  0x1e   : > { %v630_v54 = vld [vmem:[%s6068_s1 + $0x170] sm:$0xff]  ;;  %v633_v55 = vld [vmem:[%s6068_s1 + $0x188] sm:$0xff]  ;;  %v632_v56 = vld [vmem:[%s6068_s1 + $0x180] sm:$0xff] }
  0x1f   : > { %685 = vperm.xlu1 %4714, %v593_v9   ;;  %680 = vperm.xlu0 %4713, %v592_v10   ;;  %v635_v57 = vld [vmem:[%s6068_s1 + $0x198] sm:$0xff]  ;;  %v634_v58 = vld [vmem:[%s6068_s1 + $0x190] sm:$0x3]  ;;  %v637_v59 = vld [vmem:[%s6068_s1 + $0x1a8] sm:$0x3] }
  0x20   : > { %v636_v60 = vld [vmem:[%s6068_s1 + $0x1a0] sm:$0xff]  ;;  %v356_v61 = vld [vmem:[%s4980_s16 + $0x10] sm:$0x3]  ;;  %v357_v0 = vld [vmem:[%s4980_s16 + $0x18] sm:$0xff] }
  0x21   : > { %v4986_v62 = vld [vmem:[%s6069_s2] ss:$0 sm:$0xff]  ;;  %v355_v1 = vld [vmem:[%s4980_s16 + $0x8] sm:$0xff]  ;;  %v361_v9 = vld [vmem:[%s4980_s16 + $0x38] sm:$0xff] }
  0x22   : > { %v354_v63 = vld [vmem:[%s4980_s16] sm:$0xff]  ;;  %v417_v2 = vmul.f32 %v4986_v62, %v356_v61  ;;  %v359_v4 = vld [vmem:[%s4980_s16 + $0x28] sm:$0x3]  ;;  %v418_v6 = vmul.f32 %v4986_v62, %v357_v0  ;;  %v416_v7 = vmul.f32 %v4986_v62, %v355_v1  ;;  %v360_v10 = vld [vmem:[%s4980_s16 + $0x30] sm:$0xff] }
  0x23   : > { %695 = vperm.xlu1 %4714, %v595_v11   ;;  %690 = vperm.xlu0 %4713, %v594_v12   ;;  %v415_v3 = vmul.f32 %v4986_v62, %v354_v63  ;;  %v4997_v5 = vld [vmem:[%s6070_s3] ss:$0 sm:$0xff]  ;;  %v363_v11 = vld [vmem:[%s4980_s16 + $0x48] sm:$0xff]  ;;  %v420_v14 = vmul.f32 %v4986_v62, %v359_v4  ;;  %v365_v15 = vld [vmem:[%s4980_s16 + $0x58] sm:$0x3] }
  0x24   : > { %v358_v8 = vld [vmem:[%s4980_s16 + $0x20] sm:$0xff]  ;;  %v478_v13 = vadd.f32 %v4997_v5, %v417_v2 }
  0x25   : > { %v362_v12 = vld [vmem:[%s4980_s16 + $0x40] sm:$0x3]  ;;  %v476_v18 = vadd.f32 %v4997_v5, %v415_v3 }
  0x27   : > { %705 = vperm.xlu1 %4714, %v597_v16   ;;  %700 = vperm.xlu0 %4713, %v596_v17   ;;  %v364_v16 = vld [vmem:[%s4980_s16 + $0x50] sm:$0xff]  ;;  %v367_v17 = vld [vmem:[%s4980_s16 + $0x68] sm:$0xff] }
  0x2b   : > { %715 = vperm.xlu1 %4714, %v599_v19   ;;  %710 = vperm.xlu0 %4713, %v598_v20   ;;  %v419_v19 = vmul.f32 %v4986_v62, %v358_v8  ;;  %v422_v20 = vmul.f32 %v4986_v62, %v361_v9 }
  0x2f   : > { %725 = vperm.xlu1 %4714, %v601_v21   ;;  %720 = vperm.xlu0 %4713, %v600_v22   ;;  %v366_v21 = vld [vmem:[%s4980_s16 + $0x60] sm:$0xff]  ;;  %v479_v22 = vadd.f32 %v4997_v5, %v418_v6 }
  0x33   : > { %735 = vperm.xlu1 %4714, %v603_v23   ;;  %730 = vperm.xlu0 %4713, %v602_v24   ;;  %v477_v23 = vadd.f32 %v4997_v5, %v416_v7  ;;  %v421_v24 = vmul.f32 %v4986_v62, %v360_v10 }
  0x37   : > { %745 = vperm.xlu1 %4714, %v605_v25   ;;  %740 = vperm.xlu0 %4713, %v604_v26   ;;  %v424_v25 = vmul.f32 %v4986_v62, %v363_v11  ;;  %v423_v26 = vmul.f32 %v4986_v62, %v362_v12  ;;  %v373_v12 = vld [vmem:[%s4980_s16 + $0x98] sm:$0xff] }
  0x3b   : > { %755 = vperm.xlu1 %4714, %v607_v27   ;;  %750 = vperm.xlu0 %4713, %v606_v28   ;;  %v426_v27 = vmul.f32 %v4986_v62, %v365_v15  ;;  %v425_v28 = vmul.f32 %v4986_v62, %v364_v16 }
  0x3f   : > { %765 = vperm.xlu1 %4714, %v609_v29   ;;  %760 = vperm.xlu0 %4713, %v608_v30   ;;  %v428_v29 = vmul.f32 %v4986_v62, %v367_v17  ;;  %v532_v30 = vmax.f32 %v478_v13, 0.0  ;;  %v372_v13 = vld [vmem:[%s4980_s16 + $0x90] sm:$0xff] }
  0x43   : > { %775 = vperm.xlu1 %4714, %v611_v31   ;;  %770 = vperm.xlu0 %4713, %v610_v32   ;;  %v481_v31 = vadd.f32 %v4997_v5, %v420_v14  ;;  %v427_v32 = vmul.f32 %v4986_v62, %v366_v21 }
  0x47   : > { %785 = vperm.xlu1 %4714, %v613_v35   ;;  %780 = vperm.xlu0 %4713, %v612_v36   ;;  %v530_v35 = vmax.f32 %v476_v18, 0.0  ;;  %v480_v36 = vadd.f32 %v4997_v5, %v419_v19 }
  0x4b   : > { %795 = vperm.xlu1 %4714, %v615_v37   ;;  %790 = vperm.xlu0 %4713, %v614_v38   ;;  %v5027_v37 = vadd.f32 %v4997_v5, %v422_v20  ;;  %v369_v38 = vld [vmem:[%s4980_s16 + $0x78] sm:$0xff] }
  0x4f   : > { %805 = vperm.xlu1 %4714, %v617_v39   ;;  %800 = vperm.xlu0 %4713, %v616_v40   ;;  %v533_v39 = vmax.f32 %v479_v22, 0.0  ;;  %v531_v40 = vmax.f32 %v477_v23, 0.0 }
  0x53   : > { %815 = vperm.xlu1 %4714, %v619_v41   ;;  %810 = vperm.xlu0 %4713, %v618_v42   ;;  %v5031_v41 = vadd.f32 %v4997_v5, %v421_v24  ;;  %v5034_v42 = vadd.f32 %v4997_v5, %v424_v25 }
  0x55   : > { %v536_v61 = vmax.f32 %v5031_v41, 0.0  ;;  %v539_v63 = vmax.f32 %v5034_v42, 0.0 }
  0x57   : > { %825 = vperm.xlu1 %4714, %v621_v43   ;;  %820 = vperm.xlu0 %4713, %v620_v44   ;;  %v368_v43 = vld [vmem:[%s4980_s16 + $0x70] sm:$0x3]  ;;  %v371_v44 = vld [vmem:[%s4980_s16 + $0x88] sm:$0x3] }
  0x5b   : > { %835 = vperm.xlu1 %4714, %v623_v45   ;;  %830 = vperm.xlu0 %4713, %v622_v46  }
  0x5f   : > { %845 = vperm.xlu1 %4714, %v625_v47   ;;  %840 = vperm.xlu0 %4713, %v624_v48   ;;  %v5039_v47 = vadd.f32 %v4997_v5, %v423_v26  ;;  %v5042_v48 = vadd.f32 %v4997_v5, %v426_v27  ;;  %v434_v26 = vmul.f32 %v4986_v62, %v373_v12  ;;  %v1421_v12 = vsel %vm1207_vm0, %v4881_v33, 0 }
  0x60   : > { %v433_v27 = vmul.f32 %v4986_v62, %v372_v13 }
  0x61   : > { %v538_v3 = vmax.f32 %v5039_v47, 0.0  ;;  %v541_v4 = vmax.f32 %v5042_v48, 0.0  ;;  %v5177_v48 = vld [vmem:[%s6071_s4 + $0x1c] sm:$0xf] }
  0x63   : > { %855 = vperm.xlu1 %4714, %v627_v49   ;;  %850 = vperm.xlu0 %4713, %v626_v50   ;;  %v5045_v49 = vadd.f32 %v4997_v5, %v425_v28  ;;  %v5048_v50 = vadd.f32 %v4997_v5, %v428_v29 }
  0x65   : > { %v540_v6 = vmax.f32 %v5045_v49, 0.0  ;;  %v543_v7 = vmax.f32 %v5048_v50, 0.0 }
  0x67   : > { %865 = vperm.xlu1 %4714, %v629_v51   ;;  %860 = vperm.xlu0 %4713, %v628_v52   ;;  %v370_v51 = vld [vmem:[%s4980_s16 + $0x80] sm:$0xff] }
  0x68   : > { %v431_v0 = vmul.f32 %v4986_v62, %v370_v51  ;;  %v5104_v51 = vadd.f32 %v4997_v5, %v434_v26 }
  0x6a   : > { %v5086_v21 = vadd.f32 %v4997_v5, %v431_v0  ;;  %v549_v47 = vmax.f32 %v5104_v51, 0.0 }
  0x6b   : > { %875 = vperm.xlu1 %4714, %v631_v53   ;;  %870 = vperm.xlu0 %4713, %v630_v54   ;;  %v535_v53 = vmax.f32 %v481_v31, 0.0  ;;  %v5052_v54 = vadd.f32 %v4997_v5, %v427_v32 }
  0x6d   : > { %v542_v10 = vmax.f32 %v5052_v54, 0.0 }
  0x6f   : > { %885 = vperm.xlu1 %4714, %v633_v55   ;;  %880 = vperm.xlu0 %4713, %v632_v56   ;;  %v430_v55 = vmul.f32 %v4986_v62, %v369_v38  ;;  %v534_v56 = vmax.f32 %v480_v36, 0.0 }
  0x71   : > { %v5071_v11 = vadd.f32 %v4997_v5, %v430_v55 }
  0x73   : > { %895 = vperm.xlu1 %4714, %v635_v57   ;;  %890 = vperm.xlu0 %4713, %v634_v58   ;;  %v537_v57 = vmax.f32 %v5027_v37, 0.0  ;;  %v429_v58 = vmul.f32 %v4986_v62, %v368_v43  ;;  %v545_v26 = vmax.f32 %v5071_v11, 0.0 }
  0x75   : > { %v5076_v16 = vadd.f32 %v4997_v5, %v429_v58 }
  0x77   : > { %905 = vperm.xlu1 %4714, %v637_v59   ;;  %900 = vperm.xlu0 %4713, %v636_v60   ;;  %v432_v59 = vmul.f32 %v4986_v62, %v371_v44 }
  0x79   : > { %v5079_v17 = vadd.f32 %v4997_v5, %v432_v59 }
  0x8e   : > { %v651_v45 = vpop.permute.xlu1 %650  ;;  %v641_v46 = vpop.permute.xlu0 %640 }
  0x8f   : > { %v910_v52 = vmul.f32 %v651_v45, %v532_v30  ;;  %v5058_v60 = vmul.f32 %v641_v46, %v530_v35 }
  0x91   : > { %v1031_v8 = vrot.slane %v910_v52, 1  ;;  %v1588_v14 = vrot.slane %v910_v52, 2  ;;  %v1028_v18 = vrot.slane %v5058_v60, 1  ;;  %v1585_v22 = vrot.slane %v5058_v60, 2  ;;  %v375_v52 = vld [vmem:[%s4980_s16 + $0xa8] sm:$0xff] }
  0x92   : > { %v656_v1 = vpop.permute.xlu1 %655  ;;  %v646_v2 = vpop.permute.xlu0 %645 }
  0x93   : > { %v5067_v9 = vmul.f32 %v646_v2, %v531_v40  ;;  %v911_v15 = vmul.f32 %v656_v1, %v533_v39 }
  0x95   : > { %v1029_v20 = vrot.slane %v5067_v9, 1  ;;  %v1586_v23 = vrot.slane %v5067_v9, 2  ;;  %v1033_v32 = vrot.slane %v911_v15, 1  ;;  %v1590_v43 = vrot.slane %v911_v15, 2 }
  0x96   : > { %v666_v24 = vpop.permute.xlu1 %665  ;;  %v661_v25 = vpop.permute.xlu0 %660 }
  0x97   : > { %v913_v28 = vmul.f32 %v666_v24, %v535_v53  ;;  %v912_v29 = vmul.f32 %v661_v25, %v534_v56  ;;  %v1030_v30 = vsel %vm1027_vm1, %v1028_v18, %v1029_v20  ;;  %v1032_v31 = vsel %vm1027_vm1, %v1029_v20, %v1031_v8  ;;  %v374_v53 = vld [vmem:[%s4980_s16 + $0xa0] sm:$0x3] }
  0x98   : > { %v1140_v35 = vpack.c.bf16 %v1032_v31, %v1030_v30  ;;  %v5095_v36 = vsel %vm1584_vm2, %v1585_v22, %v1586_v23  ;;  %v5098_v37 = vsel %vm1584_vm2, %v1586_v23, %v1588_v14  ;;  %v377_v30 = vld [vmem:[%s4980_s16 + $0xb8] sm:$0x3]  ;;  %v376_v31 = vld [vmem:[%s4980_s16 + $0xb0] sm:$0xff] }
  0x99   : > { %v1036_v38 = vrot.slane %v913_v28, 1  ;;  %v1593_v39 = vrot.slane %v913_v28, 2  ;;  %v5100_v40 = vpack.c.bf16 %v912_v29, %v911_v15  ;;  %v1034_v41 = vrot.slane %v912_v29, 1  ;;  %v5125_v15 = vld [vmem:[%s6071_s4 + $0x8] sm:$0xf] }
  0x9a   : > { %v1591_v44 = vrot.slane %v912_v29, 2  ;;  %v676_v45 = vpop.permute.xlu1 %675  ;;  %v671_v46 = vpop.permute.xlu0 %670  ;;  %4067 = vmatprep.mubr.msk.bf16.mxu1 %vm1158_vm3, %v1140_v35  ;;  %v544_v28 = vmax.f32 %v5076_v16, 0.0  ;;  %v547_v29 = vmax.f32 %v5079_v17, 0.0  ;;  %v546_v35 = vmax.f32 %v5086_v21, 0.0 }
  0x9b   : > { %v915_v56 = vmul.f32 %v676_v45, %v537_v57  ;;  %v914_v58 = vmul.f32 %v671_v46, %v536_v61  ;;  %v1035_v59 = vsel %vm1027_vm1, %v1033_v32, %v1034_v41  ;;  %v1037_v0 = vsel %vm1027_vm1, %v1034_v41, %v1036_v38 }
  0x9c   : > { %v5112_v1 = vpack.c.bf16 %v1037_v0, %v1035_v59  ;;  %v1592_v2 = vsel %vm1584_vm2, %v1590_v43, %v1591_v44  ;;  %v1594_v8 = vsel %vm1584_vm2, %v1591_v44, %v1593_v39  ;;  %v436_v57 = vmul.f32 %v4986_v62, %v375_v52 }
  0x9d   : > { %v1039_v13 = vrot.slane %v915_v56, 1  ;;  %v5118_v14 = vpack.c.bf16 %v915_v56, %v914_v58  ;;  %v435_v61 = vmul.f32 %v4986_v62, %v374_v53  ;;  %v1596_v18 = vrot.slane %v915_v56, 2 }
  0x9e   : > { %6108 = vst [vmem:[#allocation2_spill] sm:$0xff] %v5112_v1  ;;  %v1038_v20 = vrot.slane %v914_v58, 1  ;;  %v1595_v22 = vrot.slane %v914_v58, 2  ;;  %v686_v23 = vpop.permute.xlu1 %685  ;;  %v681_v24 = vpop.permute.xlu0 %680  ;;  %4068 = vmatmul.mubr.msk.bf16.vlgmr.msra.gmra.mrb[0].mxu1 %vm1158_vm3, %v5112_v1  ;;  %v5129_v33 = vpack.c.bf16 %v1594_v8, %v1592_v2  ;;  %v5150_v41 = vadd.f32 %v4997_v5, %v436_v57 }
  0x9f   : > { %v916_v25 = vmul.f32 %v681_v24, %v538_v3  ;;  %4100 = vmatpush3.bf16.msra.mxu1 %v1421_v12  ;;  %v917_v32 = vmul.f32 %v686_v23, %v539_v63  ;;  %v5145_v3 = vadd.f32 %v4997_v5, %v433_v27  ;;  %v5153_v42 = vadd.f32 %v4997_v5, %v435_v61  ;;  %v378_v23 = vld [vmem:[%s4980_s16 + $0xc0] sm:$0xff] }
  0xa0   : > { %4237 = vmatprep.mubr.msk.bf16.mxu0 %vm1158_vm3, %v5129_v33  ;;  %4695 = vmatprep.subr.msk.bf16.mxu1 %vm1207_vm0, %v5125_v15  ;;  %v1040_v44 = vsel %vm1027_vm1, %v1038_v20, %v1039_v13  ;;  %v1597_v45 = vsel %vm1584_vm2, %v1595_v22, %v1596_v18  ;;  %v438_v27 = vmul.f32 %v4986_v62, %v377_v30  ;;  %v2589_v8 = vsel %vm1207_vm0, %v4886_v34, 0 }
  0xa1   : > { %v1041_v38 = vrot.slane %v916_v25, 1  ;;  %v1598_v39 = vrot.slane %v916_v25, 2  ;;  %v437_v46 = vmul.f32 %v4986_v62, %v376_v31  ;;  %v1043_v59 = vrot.slane %v917_v32, 1 }
  0xa2   : > { %v696_v63 = vpop.permute.xlu1 %695  ;;  %v691_v43 = vpop.permute.xlu0 %690  ;;  %v1600_v49 = vrot.slane %v917_v32, 2  ;;  %v5184_v34 = vadd.f32 %v4997_v5, %v438_v27 }
  0xa3   : > { %v1042_v52 = vsel %vm1027_vm1, %v1039_v13, %v1041_v38  ;;  %v1599_v53 = vsel %vm1584_vm2, %v1596_v18, %v1598_v39  ;;  %v919_v56 = vmul.f32 %v696_v63, %v541_v4  ;;  %v918_v58 = vmul.f32 %v691_v43, %v540_v6  ;;  %v379_v18 = vld [vmem:[%s4980_s16 + $0xc8] sm:$0xff] }
  0xa4   : > { %v5165_v0 = vpack.c.bf16 %v1042_v52, %v1040_v44  ;;  %v5167_v2 = vpack.c.bf16 %v1599_v53, %v1597_v45  ;;  %v5187_v22 = vadd.f32 %v4997_v5, %v437_v46  ;;  %v440_v63 = vmul.f32 %v4986_v62, %v379_v18  ;;  %v381_v53 = vld [vmem:[%s4980_s16 + $0xd8] sm:$0xff] }
  0xa5   : > { %v1046_v12 = vrot.slane %v919_v56, 1  ;;  %v1603_v57 = vrot.slane %v919_v56, 2  ;;  %v5171_v13 = vpack.c.bf16 %v918_v58, %v917_v32  ;;  %v1044_v61 = vrot.slane %v918_v58, 1 }
  0xa6   : > { %v1601_v4 = vrot.slane %v918_v58, 2  ;;  %v706_v6 = vpop.permute.xlu1 %705  ;;  %v701_v20 = vpop.permute.xlu0 %700  ;;  %4071 = vmatprep.mubr.msk.bf16.mxu1 %vm1158_vm3, %v5165_v0  ;;  %4238 = vmatmul.mubr.msk.bf16.vlgmr.msra.gmra.mrb[0].mxu0 %vm1158_vm3, %v5167_v2  ;;  %v551_v58 = vmax.f32 %v5150_v41, 0.0  ;;  %v5225_v18 = vadd.f32 %v4997_v5, %v440_v63 }
  0xa7   : > { %v921_v24 = vmul.f32 %v706_v6, %v543_v7  ;;  %v920_v25 = vmul.f32 %v701_v20, %v542_v10  ;;  %v1045_v30 = vsel %vm1027_vm1, %v1043_v59, %v1044_v61  ;;  %v1047_v31 = vsel %vm1027_vm1, %v1044_v61, %v1046_v12  ;;  %4270 = vmatpush3.bf16.msra.mxu0 %v2589_v8  ;;  %v380_v59 = vld [vmem:[%s4980_s16 + $0xd0] sm:$0x3]  ;;  %v383_v8 = vld [vmem:[%s4980_s16 + $0xe8] sm:$0x3] }
  0xa8   : > { %v5196_v32 = vpack.c.bf16 %v1047_v31, %v1045_v30  ;;  %v1602_v38 = vsel %vm1584_vm2, %v1600_v49, %v1601_v4  ;;  %v1604_v39 = vsel %vm1584_vm2, %v1601_v4, %v1603_v57  ;;  %4700 = vmatprep.subr.msk.bf16.mxu0 %vm1207_vm0, %v5177_v48  ;;  %v548_v7 = vmax.f32 %v5145_v3, 0.0  ;;  %v382_v4 = vld [vmem:[%s4980_s16 + $0xe0] sm:$0xff] }
  0xa9   : > { %v1049_v50 = vrot.slane %v921_v24, 1  ;;  %v5203_v54 = vpack.c.bf16 %v921_v24, %v920_v25  ;;  %v439_v10 = vmul.f32 %v4986_v62, %v378_v23  ;;  %v1606_v43 = vrot.slane %v921_v24, 2 }
  0xaa   : > { %v1048_v44 = vrot.slane %v920_v25, 1  ;;  %v1605_v45 = vrot.slane %v920_v25, 2  ;;  %v716_v27 = vpop.permute.xlu1 %715  ;;  %v711_v46 = vpop.permute.xlu0 %710  ;;  %4072 = vmatmul.mubr.msk.bf16.gmra.mrb[4].mxu1 %vm1158_vm3, %v5196_v32  ;;  %v5209_v52 = vpack.c.bf16 %v1604_v39, %v1602_v38  ;;  %v550_v3 = vmax.f32 %v5153_v42, 0.0 }
  0xab   : > { %v922_v56 = vmul.f32 %v711_v46, %v544_v28  ;;  %v923_v12 = vmul.f32 %v716_v27, %v545_v26  ;;  %v553_v57 = vmax.f32 %v5184_v34, 0.0  ;;  %v552_v61 = vmax.f32 %v5187_v22, 0.0  ;;  %v389_v34 = vld [vmem:[%s4980_s16 + $0x118] sm:$0x3] }
  0xac   : > { %4241 = vmatprep.mubr.msk.bf16.mxu0 %vm1158_vm3, %v5209_v52  ;;  %v5228_v49 = vadd.f32 %v4997_v5, %v439_v10  ;;  %v442_v42 = vmul.f32 %v4986_v62, %v381_v53  ;;  %v1050_v6 = vsel %vm1027_vm1, %v1048_v44, %v1049_v50  ;;  %v1607_v20 = vsel %vm1584_vm2, %v1605_v45, %v1606_v43 }
  0xad   : > { %v1051_v16 = vrot.slane %v922_v56, 1  ;;  %v1608_v28 = vrot.slane %v922_v56, 2  ;;  %v441_v23 = vmul.f32 %v4986_v62, %v380_v59  ;;  %v444_v24 = vmul.f32 %v4986_v62, %v383_v8  ;;  %v385_v56 = vld [vmem:[%s4980_s16 + $0xf8] sm:$0xff] }
  0xae   : > { %v726_v11 = vpop.permute.xlu1 %725  ;;  %v721_v26 = vpop.permute.xlu0 %720  ;;  %v1053_v39 = vrot.slane %v923_v12, 1  ;;  %v443_v44 = vmul.f32 %v4986_v62, %v382_v4  ;;  %v5254_v21 = vadd.f32 %v4997_v5, %v442_v42 }
  0xaf   : > { %v1052_v25 = vsel %vm1027_vm1, %v1049_v50, %v1051_v16  ;;  %v1609_v30 = vsel %vm1584_vm2, %v1606_v43, %v1608_v28  ;;  %v925_v31 = vmul.f32 %v726_v11, %v547_v29  ;;  %v924_v38 = vmul.f32 %v721_v26, %v546_v35 }
  0xb0   : > { %v5242_v63 = vpack.c.bf16 %v1052_v25, %v1050_v6  ;;  %v5244_v10 = vpack.c.bf16 %v1609_v30, %v1607_v20  ;;  %v1610_v43 = vrot.slane %v923_v12, 2  ;;  %v5257_v35 = vadd.f32 %v4997_v5, %v441_v23 }
  0xb1   : > { %v1056_v45 = vrot.slane %v925_v31, 1  ;;  %v1613_v27 = vrot.slane %v925_v31, 2  ;;  %v5247_v46 = vpack.c.bf16 %v924_v38, %v923_v12  ;;  %v1054_v50 = vrot.slane %v924_v38, 1 }
  0xb2   : > { %v1611_v53 = vrot.slane %v924_v38, 2  ;;  %v736_v17 = vpop.permute.xlu1 %735  ;;  %v731_v29 = vpop.permute.xlu0 %730  ;;  %4075 = vmatprep.mubr.msk.bf16.mxu1 %vm1158_vm3, %v5242_v63  ;;  %4242 = vmatmul.mubr.msk.bf16.gmra.mrb[4].mxu0 %vm1158_vm3, %v5244_v10  ;;  %v5269_v42 = vadd.f32 %v4997_v5, %v444_v24  ;;  %v5274_v51 = vadd.f32 %v4997_v5, %v443_v44  ;;  %v557_v44 = vmax.f32 %v5254_v21, 0.0 }
  0xb3   : > { %v927_v59 = vmul.f32 %v736_v17, %v549_v47  ;;  %v926_v8 = vmul.f32 %v731_v29, %v548_v7  ;;  %v1055_v12 = vsel %vm1027_vm1, %v1053_v39, %v1054_v50  ;;  %v1057_v16 = vsel %vm1027_vm1, %v1054_v50, %v1056_v45  ;;  %v384_v7 = vld [vmem:[%s4980_s16 + $0xf0] sm:$0xff]  ;;  %v386_v50 = vld [vmem:[%s4980_s16 + $0x100] sm:$0x3] }
  0xb4   : > { %v5264_v28 = vpack.c.bf16 %v1057_v16, %v1055_v12  ;;  %v1612_v4 = vsel %vm1584_vm2, %v1610_v43, %v1611_v53  ;;  %v1614_v11 = vsel %vm1584_vm2, %v1611_v53, %v1613_v27  ;;  %v446_v47 = vmul.f32 %v4986_v62, %v385_v56  ;;  %v387_v27 = vld [vmem:[%s4980_s16 + $0x108] sm:$0xff] }
  0xb5   : > { %v1059_v26 = vrot.slane %v927_v59, 1  ;;  %v5271_v6 = vpack.c.bf16 %v927_v59, %v926_v8  ;;  %v1616_v20 = vrot.slane %v927_v59, 2  ;;  %v1058_v23 = vrot.slane %v926_v8, 1 }
  0xb6   : > { %v1615_v25 = vrot.slane %v926_v8, 2  ;;  %v746_v30 = vpop.permute.xlu1 %745  ;;  %v741_v31 = vpop.permute.xlu0 %740  ;;  %4076 = vmatmul.mubr.msk.bf16.gmra.mrb[8].mxu1 %vm1158_vm3, %v5264_v28  ;;  %v5280_v24 = vpack.c.bf16 %v1614_v11, %v1612_v4  ;;  %v555_v39 = vmax.f32 %v5225_v18, 0.0  ;;  %v554_v45 = vmax.f32 %v5228_v49, 0.0 }
  0xb7   : > { %v928_v38 = vmul.f32 %v741_v31, %v550_v3  ;;  %v929_v43 = vmul.f32 %v746_v30, %v551_v58  ;;  %v556_v53 = vmax.f32 %v5257_v35, 0.0  ;;  %v559_v17 = vmax.f32 %v5269_v42, 0.0 }
  0xb8   : > { %4245 = vmatprep.mubr.msk.bf16.mxu0 %vm1158_vm3, %v5280_v24  ;;  %v445_v3 = vmul.f32 %v4986_v62, %v384_v7  ;;  %v558_v49 = vmax.f32 %v5274_v51, 0.0  ;;  %v5296_v56 = vadd.f32 %v4997_v5, %v446_v47  ;;  %v1060_v41 = vsel %vm1027_vm1, %v1058_v23, %v1059_v26 }
  0xb9   : > { %v1061_v29 = vrot.slane %v928_v38, 1  ;;  %v1618_v18 = vrot.slane %v928_v38, 2  ;;  %v1617_v58 = vsel %vm1584_vm2, %v1615_v25, %v1616_v20  ;;  %v448_v35 = vmul.f32 %v4986_v62, %v387_v27 }
  0xba   : > { %v756_v59 = vpop.permute.xlu1 %755  ;;  %v751_v8 = vpop.permute.xlu0 %750  ;;  %v447_v12 = vmul.f32 %v4986_v62, %v386_v50  ;;  %v1063_v7 = vrot.slane %v929_v43, 1  ;;  %v5313_v25 = vadd.f32 %v4997_v5, %v445_v3 }
  0xbb   : > { %v1062_v16 = vsel %vm1027_vm1, %v1059_v26, %v1061_v29  ;;  %v1619_v4 = vsel %vm1584_vm2, %v1616_v20, %v1618_v18  ;;  %v931_v11 = vmul.f32 %v756_v59, %v553_v57  ;;  %v930_v47 = vmul.f32 %v751_v8, %v552_v61  ;;  %v388_v29 = vld [vmem:[%s4980_s16 + $0x110] sm:$0xff]  ;;  %v391_v18 = vld [vmem:[%s4980_s16 + $0x128] sm:$0xff] }
  0xbc   : > { %v5308_v30 = vpack.c.bf16 %v1062_v16, %v1060_v41  ;;  %v5310_v23 = vpack.c.bf16 %v1619_v4, %v1617_v58  ;;  %v1620_v57 = vrot.slane %v929_v43, 2  ;;  %v5323_v50 = vadd.f32 %v4997_v5, %v448_v35 }
  0xbd   : > { %v1066_v31 = vrot.slane %v931_v11, 1  ;;  %v1623_v26 = vrot.slane %v931_v11, 2  ;;  %v5315_v38 = vpack.c.bf16 %v930_v47, %v929_v43  ;;  %v1064_v20 = vrot.slane %v930_v47, 1 }
  0xbe   : > { %6109 = vst [vmem:[#allocation3_spill] sm:$0xff] %v5308_v30  ;;  %v1621_v27 = vrot.slane %v930_v47, 2  ;;  %v766_v22 = vpop.permute.xlu1 %765  ;;  %v761_v61 = vpop.permute.xlu0 %760  ;;  %4079 = vmatprep.mubr.msk.bf16.mxu1 %vm1158_vm3, %v5308_v30  ;;  %4246 = vmatmul.mubr.msk.bf16.gmra.mrb[8].mxu0 %vm1158_vm3, %v5310_v23  ;;  %v5326_v3 = vadd.f32 %v4997_v5, %v447_v12  ;;  %v450_v35 = vmul.f32 %v4986_v62, %v389_v34  ;;  %v390_v47 = vld [vmem:[%s4980_s16 + $0x120] sm:$0xff] }
  0xbf   : > { %v933_v59 = vmul.f32 %v766_v22, %v555_v39  ;;  %v932_v43 = vmul.f32 %v761_v61, %v554_v45  ;;  %v1065_v8 = vsel %vm1027_vm1, %v1063_v7, %v1064_v20  ;;  %v1067_v41 = vsel %vm1027_vm1, %v1064_v20, %v1066_v31 }
  0xc0   : > { %v5332_v58 = vpack.c.bf16 %v1067_v41, %v1065_v8  ;;  %v1622_v16 = vsel %vm1584_vm2, %v1620_v57, %v1621_v27  ;;  %v1624_v4 = vsel %vm1584_vm2, %v1621_v27, %v1623_v26  ;;  %v449_v39 = vmul.f32 %v4986_v62, %v388_v29  ;;  %v393_v8 = vld [vmem:[%s4980_s16 + $0x138] sm:$0xff] }
  0xc1   : > { %v1069_v11 = vrot.slane %v933_v59, 1  ;;  %v5337_v12 = vpack.c.bf16 %v933_v59, %v932_v43  ;;  %v452_v45 = vmul.f32 %v4986_v62, %v391_v18  ;;  %v1626_v7 = vrot.slane %v933_v59, 2  ;;  %v392_v18 = vld [vmem:[%s4980_s16 + $0x130] sm:$0x3] }
  0xc2   : > { %6110 = vst [vmem:[#allocation4_spill] sm:$0xff] %v5332_v58  ;;  %v1068_v31 = vrot.slane %v932_v43, 1  ;;  %v1625_v20 = vrot.slane %v932_v43, 2  ;;  %v776_v22 = vpop.permute.xlu1 %775  ;;  %v771_v61 = vpop.permute.xlu0 %770  ;;  %4080 = vmatmul.mubr.msk.bf16.gmra.mrb[12].mxu1 %vm1158_vm3, %v5332_v58  ;;  %v5344_v26 = vpack.c.bf16 %v1624_v4, %v1622_v16  ;;  %v561_v57 = vmax.f32 %v5296_v56, 0.0 }
  0xc3   : > { %v934_v34 = vmul.f32 %v771_v61, %v556_v53  ;;  %v560_v27 = vmax.f32 %v5313_v25, 0.0  ;;  %v563_v29 = vmax.f32 %v5323_v50, 0.0  ;;  %v935_v59 = vmul.f32 %v776_v22, %v557_v44 }
  0xc4   : > { %6111 = vst [vmem:[#allocation5_spill] sm:$0xff] %v5344_v26  ;;  %4249 = vmatprep.mubr.msk.bf16.mxu0 %vm1158_vm3, %v5344_v26  ;;  %v562_v43 = vmax.f32 %v5326_v3, 0.0  ;;  %v5357_v41 = vadd.f32 %v4997_v5, %v450_v35  ;;  %v451_v53 = vmul.f32 %v4986_v62, %v390_v47  ;;  %v5361_v25 = vadd.f32 %v4997_v5, %v449_v39 }
  0xc5   : > { %v1071_v56 = vrot.slane %v934_v34, 1  ;;  %v1628_v16 = vrot.slane %v934_v34, 2  ;;  %v5364_v4 = vadd.f32 %v4997_v5, %v452_v45  ;;  %v1070_v22 = vsel %vm1027_vm1, %v1068_v31, %v1069_v11 }
  0xc6   : > { %v786_v21 = vpop.permute.xlu1 %785  ;;  %v781_v44 = vpop.permute.xlu0 %780  ;;  %v1627_v3 = vsel %vm1584_vm2, %v1625_v20, %v1626_v7  ;;  %v454_v35 = vmul.f32 %v4986_v62, %v393_v8  ;;  %v453_v61 = vmul.f32 %v4986_v62, %v392_v18  ;;  %v1073_v55 = vrot.slane %v935_v59, 1 }
  0xc7   : > { %v1072_v47 = vsel %vm1027_vm1, %v1069_v11, %v1071_v56  ;;  %v1629_v34 = vsel %vm1584_vm2, %v1626_v7, %v1628_v16  ;;  %v937_v39 = vmul.f32 %v786_v21, %v559_v17  ;;  %v936_v45 = vmul.f32 %v781_v44, %v558_v49  ;;  %v395_v56 = vld [vmem:[%s4980_s16 + $0x148] sm:$0x3]  ;;  %v394_v21 = vld [vmem:[%s4980_s16 + $0x140] sm:$0xff] }
  0xc8   : > { %v5376_v19 = vpack.c.bf16 %v1072_v47, %v1070_v22  ;;  %v5378_v31 = vpack.c.bf16 %v1629_v34, %v1627_v3  ;;  %v5381_v20 = vadd.f32 %v4997_v5, %v451_v53  ;;  %v1630_v42 = vrot.slane %v935_v59, 2 }
  0xc9   : > { %v1076_v8 = vrot.slane %v937_v39, 1  ;;  %v1633_v18 = vrot.slane %v937_v39, 2  ;;  %v5383_v11 = vpack.c.bf16 %v936_v45, %v935_v59  ;;  %v1074_v7 = vrot.slane %v936_v45, 1 }
  0xca   : > { %6112 = vst [vmem:[#allocation6_spill] sm:$0xff] %v5376_v19  ;;  %6113 = vst [vmem:[#allocation7_spill] sm:$0xff] %v5378_v31  ;;  %v1631_v17 = vrot.slane %v936_v45, 2  ;;  %v796_v16 = vpop.permute.xlu1 %795  ;;  %v791_v51 = vpop.permute.xlu0 %790  ;;  %4083 = vmatprep.mubr.msk.bf16.mxu1 %vm1158_vm3, %v5376_v19  ;;  %4250 = vmatmul.mubr.msk.bf16.gmra.mrb[12].mxu0 %vm1158_vm3, %v5378_v31  ;;  %v5391_v49 = vadd.f32 %v4997_v5, %v454_v35  ;;  %v5394_v53 = vadd.f32 %v4997_v5, %v453_v61 }
  0xcb   : > { %v939_v44 = vmul.f32 %v796_v16, %v561_v57  ;;  %v938_v22 = vmul.f32 %v791_v51, %v560_v27  ;;  %v1075_v59 = vsel %vm1027_vm1, %v1073_v55, %v1074_v7  ;;  %v1077_v3 = vsel %vm1027_vm1, %v1074_v7, %v1076_v8 }
  0xcc   : > { %v5399_v47 = vpack.c.bf16 %v1077_v3, %v1075_v59  ;;  %v1632_v34 = vsel %vm1584_vm2, %v1630_v42, %v1631_v17  ;;  %v1634_v39 = vsel %vm1584_vm2, %v1631_v17, %v1633_v18  ;;  %v456_v35 = vmul.f32 %v4986_v62, %v395_v56  ;;  %v397_v56 = vld [vmem:[%s4980_s16 + $0x158] sm:$0xff] }
  0xcd   : > { %v1079_v45 = vrot.slane %v939_v44, 1  ;;  %v5404_v61 = vpack.c.bf16 %v939_v44, %v938_v22  ;;  %v565_v57 = vmax.f32 %v5357_v41, 0.0  ;;  %v455_v55 = vmul.f32 %v4986_v62, %v394_v21  ;;  %v396_v21 = vld [vmem:[%s4980_s16 + $0x150] sm:$0xff] }
  0xce   : > { %6114 = vst [vmem:[#allocation8_spill] sm:$0xff] %v5399_v47  ;;  %v1636_v27 = vrot.slane %v939_v44, 2  ;;  %v1078_v8 = vrot.slane %v938_v22, 1  ;;  %v1635_v7 = vrot.slane %v938_v22, 2  ;;  %v806_v16 = vpop.permute.xlu1 %805  ;;  %v801_v51 = vpop.permute.xlu0 %800  ;;  %4084 = vmatmul.mubr.msk.bf16.gmra.mrb[16].mxu1 %vm1158_vm3, %v5399_v47  ;;  %v5410_v18 = vpack.c.bf16 %v1634_v39, %v1632_v34  ;;  %v399_v44 = vld [vmem:[%s4980_s16 + $0x168] sm:$0xff] }
  0xcf   : > { %v940_v42 = vmul.f32 %v801_v51, %v562_v43  ;;  %v564_v17 = vmax.f32 %v5361_v25, 0.0  ;;  %v567_v59 = vmax.f32 %v5364_v4, 0.0  ;;  %v566_v41 = vmax.f32 %v5381_v20, 0.0  ;;  %v398_v51 = vld [vmem:[%s4980_s16 + $0x160] sm:$0x3] }
  0xd0   : > { %6115 = vst [vmem:[#allocation9_spill] sm:$0xff] %v5410_v18  ;;  %v941_v22 = vmul.f32 %v806_v16, %v563_v29  ;;  %4253 = vmatprep.mubr.msk.bf16.mxu0 %vm1158_vm3, %v5410_v18  ;;  %v569_v3 = vmax.f32 %v5391_v49, 0.0  ;;  %v568_v34 = vmax.f32 %v5394_v53, 0.0  ;;  %v5425_v43 = vadd.f32 %v4997_v5, %v456_v35 }
  0xd1   : > { %v1081_v25 = vrot.slane %v940_v42, 1  ;;  %v1638_v39 = vrot.slane %v940_v42, 2  ;;  %v5428_v4 = vadd.f32 %v4997_v5, %v455_v55  ;;  %v458_v20 = vmul.f32 %v4986_v62, %v397_v56 }
  0xd2   : > { %v816_v50 = vpop.permute.xlu1 %815  ;;  %v811_v29 = vpop.permute.xlu0 %810  ;;  %v1080_v16 = vsel %vm1027_vm1, %v1078_v8, %v1079_v45  ;;  %v1637_v1 = vsel %vm1584_vm2, %v1635_v7, %v1636_v27  ;;  %v457_v49 = vmul.f32 %v4986_v62, %v396_v21  ;;  %v460_v53 = vmul.f32 %v4986_v62, %v399_v44 }
  0xd3   : > { %v1082_v35 = vsel %vm1027_vm1, %v1079_v45, %v1081_v25  ;;  %v1639_v42 = vsel %vm1584_vm2, %v1636_v27, %v1638_v39  ;;  %v943_v47 = vmul.f32 %v816_v50, %v565_v57  ;;  %v942_v55 = vmul.f32 %v811_v29, %v564_v17 }
  0xd4   : > { %v1083_v18 = vrot.slane %v941_v22, 1  ;;  %v5438_v56 = vpack.c.bf16 %v1082_v35, %v1080_v16  ;;  %v5440_v19 = vpack.c.bf16 %v1639_v42, %v1637_v1  ;;  %v459_v8 = vmul.f32 %v4986_v62, %v398_v51 }
  0xd5   : > { %v1086_v31 = vrot.slane %v943_v47, 1  ;;  %v1643_v7 = vrot.slane %v943_v47, 2  ;;  %v5443_v58 = vpack.c.bf16 %v942_v55, %v941_v22  ;;  %v1084_v21 = vrot.slane %v942_v55, 1  ;;  %v401_v47 = vld [vmem:[%s4980_s16 + $0x178] sm:$0x3] }
  0xd6   : > { %6116 = vst [vmem:[#allocation10_spill] sm:$0xff] %v5438_v56  ;;  %6117 = vst [vmem:[#allocation11_spill] sm:$0xff] %v5440_v19  ;;  %v1640_v44 = vrot.slane %v941_v22, 2  ;;  %v1641_v26 = vrot.slane %v942_v55, 2  ;;  %v826_v45 = vpop.permute.xlu1 %825  ;;  %v821_v25 = vpop.permute.xlu0 %820  ;;  %4087 = vmatprep.mubr.msk.bf16.mxu1 %vm1158_vm3, %v5438_v56  ;;  %4254 = vmatmul.mubr.msk.bf16.gmra.mrb[16].mxu0 %vm1158_vm3, %v5440_v19  ;;  %v5450_v1 = vadd.f32 %v4997_v5, %v458_v20 }
  0xd7   : > { %v5453_v57 = vadd.f32 %v4997_v5, %v457_v49  ;;  %v945_v27 = vmul.f32 %v826_v45, %v567_v59  ;;  %v944_v17 = vmul.f32 %v821_v25, %v566_v41  ;;  %v1085_v22 = vsel %vm1027_vm1, %v1083_v18, %v1084_v21 }
  0xd8   : > { %v1087_v39 = vsel %vm1027_vm1, %v1084_v21, %v1086_v31  ;;  %v1642_v50 = vsel %vm1584_vm2, %v1640_v44, %v1641_v26  ;;  %v1644_v29 = vsel %vm1584_vm2, %v1641_v26, %v1643_v7  ;;  %v5463_v20 = vadd.f32 %v4997_v5, %v460_v53  ;;  %v400_v53 = vld [vmem:[%s4980_s16 + $0x170] sm:$0xff]  ;;  %v403_v44 = vld [vmem:[%s4980_s16 + $0x188] sm:$0xff] }
  0xd9   : > { %v5458_v51 = vpack.c.bf16 %v1087_v39, %v1085_v22  ;;  %v1089_v16 = vrot.slane %v945_v27, 1  ;;  %v5465_v49 = vpack.c.bf16 %v945_v27, %v944_v17  ;;  %v5468_v59 = vadd.f32 %v4997_v5, %v459_v8 }
  0xda   : > { %v462_v18 = vmul.f32 %v4986_v62, %v401_v47  ;;  %v1646_v31 = vrot.slane %v945_v27, 2  ;;  %v1088_v41 = vrot.slane %v944_v17, 1  ;;  %v1645_v35 = vrot.slane %v944_v17, 2  ;;  %v836_v42 = vpop.permute.xlu1 %835  ;;  %v831_v55 = vpop.permute.xlu0 %830 }
  0xdb   : > { %6118 = vst [vmem:[#allocation12_spill] sm:$0xff] %v5458_v51  ;;  %4088 = vmatmul.mubr.msk.bf16.gmra.mrb[20].mxu1 %vm1158_vm3, %v5458_v51  ;;  %v5473_v26 = vpack.c.bf16 %v1644_v29, %v1642_v50  ;;  %v946_v7 = vmul.f32 %v831_v55, %v568_v34  ;;  %v571_v21 = vmax.f32 %v5425_v43, 0.0  ;;  %v570_v8 = vmax.f32 %v5428_v4, 0.0  ;;  %v402_v43 = vld [vmem:[%s4980_s16 + $0x180] sm:$0xff] }
  0xdc   : > { %v947_v45 = vmul.f32 %v836_v42, %v569_v3  ;;  %v573_v25 = vmax.f32 %v5450_v1, 0.0  ;;  %v572_v47 = vmax.f32 %v5453_v57, 0.0  ;;  %v575_v27 = vmax.f32 %v5463_v20, 0.0 }
  0xdd   : > { %6119 = vst [vmem:[#allocation13_spill] sm:$0xff] %v5473_v26  ;;  %4257 = vmatprep.mubr.msk.bf16.mxu0 %vm1158_vm3, %v5473_v26  ;;  %v1091_v17 = vrot.slane %v946_v7, 1  ;;  %v1648_v22 = vrot.slane %v946_v7, 2  ;;  %v574_v39 = vmax.f32 %v5468_v59, 0.0  ;;  %v461_v34 = vmul.f32 %v4986_v62, %v400_v53 }
  0xde   : > { %v846_v50 = vpop.permute.xlu1 %845  ;;  %v841_v4 = vpop.permute.xlu0 %840  ;;  %v1090_v3 = vsel %vm1027_vm1, %v1088_v41, %v1089_v16  ;;  %v1647_v29 = vsel %vm1584_vm2, %v1645_v35, %v1646_v31  ;;  %v5490_v1 = vadd.f32 %v4997_v5, %v462_v18  ;;  %v464_v57 = vmul.f32 %v4986_v62, %v403_v44  ;;  %v404_v44 = vld [vmem:[%s4980_s16 + $0x190] sm:$0x3] }
  0xdf   : > { %v1092_v20 = vsel %vm1027_vm1, %v1089_v16, %v1091_v17  ;;  %v1649_v42 = vsel %vm1584_vm2, %v1646_v31, %v1648_v22  ;;  %v949_v59 = vmul.f32 %v846_v50, %v571_v21  ;;  %v948_v55 = vmul.f32 %v841_v4, %v570_v8  ;;  %v405_v22 = vld [vmem:[%s4980_s16 + $0x198] sm:$0xff] }
  0xe0   : > { %v1093_v53 = vrot.slane %v947_v45, 1  ;;  %v5495_v7 = vpack.c.bf16 %v1092_v20, %v1090_v3  ;;  %v5497_v51 = vpack.c.bf16 %v1649_v42, %v1647_v29  ;;  %v463_v41 = vmul.f32 %v4986_v62, %v402_v43 }
  0xe1   : > { %v1096_v35 = vrot.slane %v949_v59, 1  ;;  %v1653_v26 = vrot.slane %v949_v59, 2  ;;  %v5500_v18 = vpack.c.bf16 %v948_v55, %v947_v45  ;;  %v1094_v56 = vrot.slane %v948_v55, 1 }
  0xe2   : > { %6120 = vst [vmem:[#allocation14_spill] sm:$0xff] %v5495_v7  ;;  %6121 = vst [vmem:[#allocation15_spill] sm:$0xff] %v5497_v51  ;;  %v1650_v19 = vrot.slane %v947_v45, 2  ;;  %v1651_v16 = vrot.slane %v948_v55, 2  ;;  %v856_v17 = vpop.permute.xlu1 %855  ;;  %v851_v31 = vpop.permute.xlu0 %850  ;;  %4091 = vmatprep.mubr.msk.bf16.mxu1 %vm1158_vm3, %v5495_v7  ;;  %4258 = vmatmul.mubr.msk.bf16.gmra.mrb[20].mxu0 %vm1158_vm3, %v5497_v51  ;;  %v522_v21 = vadd.f32 %v4997_v5, %v461_v34 }
  0xe3   : > { %v5509_v8 = vadd.f32 %v4997_v5, %v464_v57  ;;  %v951_v43 = vmul.f32 %v856_v17, %v573_v25  ;;  %v950_v50 = vmul.f32 %v851_v31, %v572_v47  ;;  %v1095_v4 = vsel %vm1027_vm1, %v1093_v53, %v1094_v56  ;;  %v407_v17 = vld [vmem:[%s4980_s16 + $0x1a8] sm:$0x3]  ;;  %v406_v31 = vld [vmem:[%s4980_s16 + $0x1a0] sm:$0xff] }
  0xe4   : > { %v1097_v45 = vsel %vm1027_vm1, %v1094_v56, %v1096_v35  ;;  %v1652_v29 = vsel %vm1584_vm2, %v1650_v19, %v1651_v16  ;;  %v1654_v20 = vsel %vm1584_vm2, %v1651_v16, %v1653_v26  ;;  %v465_v42 = vmul.f32 %v4986_v62, %v404_v44 }
  0xe5   : > { %v5514_v3 = vpack.c.bf16 %v1097_v45, %v1095_v4  ;;  %v1099_v34 = vrot.slane %v951_v43, 1  ;;  %v5519_v57 = vpack.c.bf16 %v951_v43, %v950_v50  ;;  %v524_v25 = vadd.f32 %v4997_v5, %v463_v41  ;;  %v4715_v5 = vld [vmem:[%s6070_s3] ss:$0 sm:$0xff] }
  0xe6   : > { %v466_v47 = vmul.f32 %v4986_v62, %v405_v22  ;;  %v1656_v59 = vrot.slane %v951_v43, 2  ;;  %v1098_v55 = vrot.slane %v950_v50, 1  ;;  %v1655_v56 = vrot.slane %v950_v50, 2  ;;  %v866_v53 = vpop.permute.xlu1 %865  ;;  %v861_v35 = vpop.permute.xlu0 %860 }
  0xe7   : > { %6122 = vst [vmem:[#allocation16_spill] sm:$0xff] %v5514_v3  ;;  %4092 = vmatmul.mubr.msk.bf16.gmra.mrb[24].mxu1 %vm1158_vm3, %v5514_v3  ;;  %v5525_v19 = vpack.c.bf16 %v1654_v20, %v1652_v29  ;;  %v952_v26 = vmul.f32 %v861_v35, %v574_v39  ;;  %v577_v44 = vmax.f32 %v5490_v1, 0.0  ;;  %v576_v16 = vmax.f32 %v522_v21, 0.0  ;;  %v4716_v29 = vld [vmem:[%s6069_s2] ss:$0 sm:$0xff] }
  0xe8   : > { %v953_v4 = vmul.f32 %v866_v53, %v575_v27  ;;  %v579_v62 = vmax.f32 %v5509_v8, 0.0  ;;  %v526_v41 = vadd.f32 %v4715_v5, %v465_v42  ;;  %v578_v50 = vmax.f32 %v524_v25, 0.0 }
  0xe9   : > { %6123 = vst [vmem:[#allocation17_spill] sm:$0xff] %v5525_v19  ;;  %4261 = vmatprep.mubr.msk.bf16.mxu0 %vm1158_vm3, %v5525_v19  ;;  %v1101_v22 = vrot.slane %v952_v26, 1  ;;  %v1658_v43 = vrot.slane %v952_v26, 2  ;;  %v527_v39 = vadd.f32 %v4715_v5, %v466_v47  ;;  %v1100_v21 = vsel %vm1027_vm1, %v1098_v55, %v1099_v34 }
  0xea   : > { %v876_v45 = vpop.permute.xlu1 %875  ;;  %v871_v1 = vpop.permute.xlu0 %870  ;;  %v1657_v27 = vsel %vm1584_vm2, %v1655_v56, %v1656_v59  ;;  %v468_v8 = vmul.f32 %v4716_v29, %v407_v17  ;;  %v467_v20 = vmul.f32 %v4716_v29, %v406_v31  ;;  %v1103_v25 = vrot.slane %v953_v4, 1 }
  0xeb   : > { %v1102_v53 = vsel %vm1027_vm1, %v1099_v34, %v1101_v22  ;;  %v1659_v42 = vsel %vm1584_vm2, %v1656_v59, %v1658_v43  ;;  %v955_v35 = vmul.f32 %v876_v45, %v577_v44  ;;  %v954_v26 = vmul.f32 %v871_v1, %v576_v16 }
  0xec   : > { %v5543_v47 = vpack.c.bf16 %v1102_v53, %v1100_v21  ;;  %v5545_v3 = vpack.c.bf16 %v1659_v42, %v1657_v27  ;;  %v580_v55 = vmax.f32 %v526_v41, 0.0  ;;  %v1660_v30 = vrot.slane %v953_v4, 2 }
  0xed   : > { %v1106_v19 = vrot.slane %v955_v35, 1  ;;  %v1663_v56 = vrot.slane %v955_v35, 2  ;;  %v5547_v7 = vpack.c.bf16 %v954_v26, %v953_v4  ;;  %v1104_v51 = vrot.slane %v954_v26, 1 }
  0xee   : > { %v1661_v17 = vrot.slane %v954_v26, 2  ;;  %v886_v31 = vpop.permute.xlu1 %885  ;;  %v881_v29 = vpop.permute.xlu0 %880  ;;  %4095 = vmatprep.mubr.msk.bf16.mxu1 %vm1158_vm3, %v5543_v47  ;;  %4262 = vmatmul.mubr.msk.bf16.gmra.mrb[24].mxu0 %vm1158_vm3, %v5545_v3  ;;  %v529_v34 = vadd.f32 %v4715_v5, %v468_v8  ;;  %v528_v59 = vadd.f32 %v4715_v5, %v467_v20  ;;  %v581_v27 = vmax.f32 %v527_v39, 0.0 }
  0xef   : > { %v5553_v44 = vmul.f32 %v886_v31, %v579_v62  ;;  %v5555_v16 = vmul.f32 %v881_v29, %v578_v50  ;;  %v1105_v41 = vsel %vm1027_vm1, %v1103_v25, %v1104_v51  ;;  %v1107_v22 = vsel %vm1027_vm1, %v1104_v51, %v1106_v19 }
  0xf0   : > { %v5559_v4 = vpack.c.bf16 %v1107_v22, %v1105_v41  ;;  %v1662_v43 = vsel %vm1584_vm2, %v1660_v30, %v1661_v17  ;;  %v1664_v45 = vsel %vm1584_vm2, %v1661_v17, %v1663_v56  ;;  %v6124_v30 = vpack.c.bf16 %v5067_v9, %v5058_v60 }
  0xf1   : > { %v2165_v1 = vrot.slane %v5553_v44, 1  ;;  %v2164_v21 = vrot.slane %v5555_v16, 1  ;;  %v2374_v5 = vrot.slane %v5553_v44, 2  ;;  %v2373_v62 = vrot.slane %v5555_v16, 2 }
  0xf2   : > { %v896_v50 = vpop.permute.xlu1 %895  ;;  %v891_v8 = vpop.permute.xlu0 %890  ;;  %4096 = vmatmul.mubr.msk.bf16.gmra.mrb[28].mxu1 %vm1158_vm3, %v5559_v4  ;;  %v5569_v51 = vpack.c.bf16 %v1664_v45, %v1662_v43  ;;  %v583_v20 = vmax.f32 %v529_v34, 0.0  ;;  %v582_v53 = vmax.f32 %v528_v59, 0.0  ;;  %v1764_v41 = vsel %vm1207_vm0, %v5125_v15, 0  ;;  %v3771_v45 = vld [vmem:[%s6071_s4 + $0xc] sm:$0xf] }
  0xf3   : > { %v958_v19 = vmul.f32 %v891_v8, %v580_v55  ;;  %4101 = vmatprep.mubr.msk.bf16.mxu1 %vm1158_vm3, %v6124_v30  ;;  %v2166_v42 = vsel %vm1027_vm1, %v2164_v21, %v2165_v1  ;;  %v5578_v26 = vmul.f32 %v896_v50, %v581_v27  ;;  %v2375_v55 = vsel %vm1584_vm2, %v2373_v62, %v2374_v5  ;;  %v3856_v62 = vld [vmem:[%s6071_s4 + $0x20] sm:$0xf]  ;;  %v6127_v8 = vld [vmem:[#allocation5_spill] sm:$0xff]  ;;  %v6129_v30 = vld [vmem:[#allocation7_spill] sm:$0xff] }
  0xf4   : > { %4265 = vmatprep.mubr.msk.bf16.mxu0 %vm1158_vm3, %v5569_v51  ;;  %v6125_v50 = vpack.c.bf16 %v5098_v37, %v5095_v36  ;;  %v3010_v36 = vsel %vm1207_vm0, %v3856_v62, 0  ;;  %v3363_v37 = vld [vmem:[%s6075_s8] sm:$0x3] }
  0xf5   : > { %v2167_v39 = vrot.slane %v958_v19, 1  ;;  %v2376_v35 = vrot.slane %v958_v19, 2  ;;  %v2996_v22 = vrot.slane %v5578_v26, 2  ;;  %v6128_v19 = vld [vmem:[#allocation4_spill] sm:$0xff] }
  0xf6   : > { %v906_v25 = vpop.permute.xlu1 %905  ;;  %v901_v56 = vpop.permute.xlu0 %900 }
  0xf7   : > { %v2168_v17 = vsel %vm1027_vm1, %v2165_v1, %v2167_v39  ;;  %v2377_v60 = vsel %vm1584_vm2, %v2374_v5, %v2376_v35  ;;  %v5583_v9 = vmul.f32 %v906_v25, %v583_v20  ;;  %v5585_v31 = vmul.f32 %v901_v56, %v582_v53  ;;  %v6130_v20 = vld [vmem:[#allocation6_spill] sm:$0xff]  ;;  %v6131_v53 = vld [vmem:[#allocation9_spill] sm:$0xff]  ;;  %v6133_v39 = vld [vmem:[#allocation11_spill] sm:$0xff] }
  0xf8   : > { %v5587_v29 = vpack.c.bf16 %v2377_v60, %v2375_v55  ;;  %v5589_v34 = vpack.c.bf16 %v2168_v17, %v2166_v42  ;;  %v2801_v5 = vsel %vm1207_vm0, %v5177_v48, 0  ;;  %v5672_v48 = vpack.c.bf16 %v5553_v44, %v5555_v16  ;;  %v3788_v16 = vld [vmem:[%s6071_s4 + $0x10] sm:$0xf]  ;;  %v6134_v35 = vld [vmem:[#allocation10_spill] sm:$0xff]  ;;  %v6135_v25 = vld [vmem:[#allocation13_spill] sm:$0xff] }
  0xf9   : > { %v2999_v59 = vrot.slane %v5583_v9, 2  ;;  %v2997_v43 = vrot.slane %v5585_v31, 2  ;;  %v2582_v27 = vpack.c.bf16 %v5585_v31, %v5578_v26  ;;  %v1966_v44 = vsel %vm1207_vm0, %v3771_v45, 0  ;;  %v6132_v42 = vld [vmem:[#allocation8_spill] sm:$0xff]  ;;  %v6137_v55 = vld [vmem:[#allocation15_spill] sm:$0xff]  ;;  %v6138_v17 = vld [vmem:[#allocation14_spill] sm:$0xff] }
  0xfa   : > { %4102 = vmatmul.mubr.msk.bf16.vlgmr.msra.gmra.mrb[0].mxu1 %vm1158_vm3, %v5100_v40  ;;  %4266 = vmatmul.mubr.msk.bf16.gmra.mrb[28].mxu0 %vm1158_vm3, %v5587_v29  ;;  %v6136_v56 = vld [vmem:[#allocation12_spill] sm:$0xff]  ;;  %v6139_v60 = vld [vmem:[#allocation17_spill] sm:$0xff] }
  0xfb   : > { %4105 = vmatprep.mubr.msk.bf16.mxu1 %vm1158_vm3, %v5118_v14  ;;  %4271 = vmatprep.mubr.msk.bf16.mxu0 %vm1158_vm3, %v5118_v14  ;;  %v5608_v15 = vsel %vm1584_vm2, %v2996_v22, %v2997_v43  ;;  %v5611_v1 = vsel %vm1584_vm2, %v2997_v43, %v2999_v59  ;;  %v6140_v59 = vld [vmem:[#allocation16_spill] sm:$0xff]  ;;  %v2788_v22 = vrot.slane %v5585_v31, 1  ;;  %v2787_v43 = vrot.slane %v5578_v26, 1 }
  0xfc   : > { %4134 = vmatpush3.bf16.msra.mxu1 %v1764_v41  ;;  %v3003_v21 = vpack.c.bf16 %v5611_v1, %v5608_v15  ;;  %v2790_v41 = vrot.slane %v5583_v9, 1  ;;  %v2178_v31 = vsel %vm1207_vm0, %v3788_v16, 0 }
  0xfd   : > { %4696 = vmatprep.subr.msk.bf16.mxu1 %vm1207_vm0, %v3771_v45  ;;  %v2789_v45 = vsel %vm1027_vm1, %v2787_v43, %v2788_v22  ;;  %v3218_v43 = vld [vmem:[%s5819_s21 + $0x68] sm:$0xff] }
  0xfe   : > { %v2791_v9 = vsel %vm1027_vm1, %v2788_v22, %v2790_v41  ;;  %v3215_v41 = vld [vmem:[%s5819_s21 + $0x50] sm:$0xff]  ;;  %v3217_v22 = vld [vmem:[%s5819_s21 + $0x60] sm:$0xff] }
 0x102   : > { %4106 = vmatmul.mubr.msk.bf16.gmra.mrb[4].mxu1 %vm1158_vm3, %v5171_v13  ;;  %4272 = vmatmul.mubr.msk.bf16.vlgmr.msra.gmra.mrb[0].mxu0 %vm1158_vm3, %v5171_v13 }
 0x103   : > { %4304 = vmatpush3.bf16.msra.mxu0 %v2801_v5  ;;  %4109 = vmatprep.mubr.msk.bf16.mxu1 %vm1158_vm3, %v5203_v54  ;;  %v2794_v5 = vpack.c.bf16 %v2791_v9, %v2789_v45 }
 0x104   : > { %4275 = vmatprep.mubr.msk.bf16.mxu0 %vm1158_vm3, %v5203_v54  ;;  %4701 = vmatprep.subr.msk.bf16.mxu0 %vm1207_vm0, %v3856_v62 }
 0x10a   : > { %4110 = vmatmul.mubr.msk.bf16.gmra.mrb[8].mxu1 %vm1158_vm3, %v5247_v46  ;;  %4276 = vmatmul.mubr.msk.bf16.gmra.mrb[4].mxu0 %vm1158_vm3, %v5247_v46 }
 0x10b   : > { %4113 = vmatprep.mubr.msk.bf16.mxu1 %vm1158_vm3, %v5271_v6  ;;  %4279 = vmatprep.mubr.msk.bf16.mxu0 %vm1158_vm3, %v5271_v6 }
 0x112   : > { %4114 = vmatmul.mubr.msk.bf16.gmra.mrb[12].mxu1 %vm1158_vm3, %v5315_v38  ;;  %4280 = vmatmul.mubr.msk.bf16.gmra.mrb[8].mxu0 %vm1158_vm3, %v5315_v38 }
 0x113   : > { %4117 = vmatprep.mubr.msk.bf16.mxu1 %vm1158_vm3, %v5337_v12  ;;  %4283 = vmatprep.mubr.msk.bf16.mxu0 %vm1158_vm3, %v5337_v12 }
 0x11a   : > { %4118 = vmatmul.mubr.msk.bf16.gmra.mrb[16].mxu1 %vm1158_vm3, %v5383_v11  ;;  %4284 = vmatmul.mubr.msk.bf16.gmra.mrb[12].mxu0 %vm1158_vm3, %v5383_v11 }
 0x11b   : > { %4121 = vmatprep.mubr.msk.bf16.mxu1 %vm1158_vm3, %v5404_v61  ;;  %4287 = vmatprep.mubr.msk.bf16.mxu0 %vm1158_vm3, %v5404_v61 }
 0x122   : > { %4122 = vmatmul.mubr.msk.bf16.gmra.mrb[20].mxu1 %vm1158_vm3, %v5443_v58  ;;  %4288 = vmatmul.mubr.msk.bf16.gmra.mrb[16].mxu0 %vm1158_vm3, %v5443_v58 }
 0x123   : > { %4125 = vmatprep.mubr.msk.bf16.mxu1 %vm1158_vm3, %v5465_v49  ;;  %4291 = vmatprep.mubr.msk.bf16.mxu0 %vm1158_vm3, %v5465_v49 }
 0x12a   : > { %4126 = vmatmul.mubr.msk.bf16.gmra.mrb[24].mxu1 %vm1158_vm3, %v5500_v18  ;;  %4292 = vmatmul.mubr.msk.bf16.gmra.mrb[20].mxu0 %vm1158_vm3, %v5500_v18 }
 0x12b   : > { %4129 = vmatprep.mubr.msk.bf16.mxu1 %vm1158_vm3, %v5519_v57  ;;  %4295 = vmatprep.mubr.msk.bf16.mxu0 %vm1158_vm3, %v5519_v57 }
 0x132   : > { %4130 = vmatmul.mubr.msk.bf16.gmra.mrb[28].mxu1 %vm1158_vm3, %v5547_v7  ;;  %4296 = vmatmul.mubr.msk.bf16.gmra.mrb[24].mxu0 %vm1158_vm3, %v5547_v7 }
 0x133   : > { %4135 = vmatprep.mubr.msk.bf16.mxu1 %vm1158_vm3, %v6125_v50  ;;  %4299 = vmatprep.mubr.msk.bf16.mxu0 %vm1158_vm3, %v5672_v48  ;;  %v3211_v50 = vld [vmem:[%s5819_s21 + $0x30] sm:$0xff] }
 0x13a   : > { %4136 = vmatmul.mubr.msk.bf16.vlgmr.msra.gmra.mrb[0].mxu1 %vm1158_vm3, %v5129_v33  ;;  %4300 = vmatmul.mubr.msk.bf16.gmra.mrb[28].mxu0 %vm1158_vm3, %v2582_v27  ;;  %v6126_v33 = vld [vmem:[#allocation3_spill] sm:$0xff]  ;;  %v3212_v27 = vld [vmem:[%s5819_s21 + $0x38] sm:$0xff] }
 0x13b   : > { %4139 = vmatprep.mubr.msk.bf16.mxu1 %vm1158_vm3, %v5167_v2  ;;  %4305 = vmatprep.mubr.msk.bf16.mxu0 %vm1158_vm3, %v5165_v0 }
 0x13c   : > { %4168 = vmatpush3.bf16.msra.mxu1 %v1966_v44  ;;  %v3213_v44 = vld [vmem:[%s5819_s21 + $0x40] sm:$0xff] }
 0x13d   : > { %4697 = vmatprep.subr.msk.bf16.mxu1 %vm1207_vm0, %v3788_v16 }
 0x142   : > { %4140 = vmatmul.mubr.msk.bf16.gmra.mrb[4].mxu1 %vm1158_vm3, %v5209_v52  ;;  %4306 = vmatmul.mubr.msk.bf16.vlgmr.msra.gmra.mrb[0].mxu0 %vm1158_vm3, %v5196_v32 }
 0x143   : > { %4338 = vmatpush3.bf16.msra.mxu0 %v3010_v36  ;;  %4143 = vmatprep.mubr.msk.bf16.mxu1 %vm1158_vm3, %v5244_v10 }
 0x144   : > { %4309 = vmatprep.mubr.msk.bf16.mxu0 %vm1158_vm3, %v5242_v63  ;;  %4702 = vmatprep.subr.msk.bf16.mxu0 %vm3413_vm4, %v3363_v37 }
 0x14a   : > { %4144 = vmatmul.mubr.msk.bf16.gmra.mrb[8].mxu1 %vm1158_vm3, %v5280_v24  ;;  %4310 = vmatmul.mubr.msk.bf16.gmra.mrb[4].mxu0 %vm1158_vm3, %v5264_v28 }
 0x14b   : > { %4147 = vmatprep.mubr.msk.bf16.mxu1 %vm1158_vm3, %v5310_v23  ;;  %4313 = vmatprep.mubr.msk.bf16.mxu0 %vm1158_vm3, %v6126_v33 }
 0x152   : > { %4148 = vmatmul.mubr.msk.bf16.gmra.mrb[12].mxu1 %vm1158_vm3, %v6127_v8  ;;  %4314 = vmatmul.mubr.msk.bf16.gmra.mrb[8].mxu0 %vm1158_vm3, %v6128_v19 }
 0x153   : > { %4151 = vmatprep.mubr.msk.bf16.mxu1 %vm1158_vm3, %v6129_v30  ;;  %4317 = vmatprep.mubr.msk.bf16.mxu0 %vm1158_vm3, %v6130_v20 }
 0x15a   : > { %4152 = vmatmul.mubr.msk.bf16.gmra.mrb[16].mxu1 %vm1158_vm3, %v6131_v53  ;;  %4318 = vmatmul.mubr.msk.bf16.gmra.mrb[12].mxu0 %vm1158_vm3, %v6132_v42 }
 0x15b   : > { %4155 = vmatprep.mubr.msk.bf16.mxu1 %vm1158_vm3, %v6133_v39  ;;  %4321 = vmatprep.mubr.msk.bf16.mxu0 %vm1158_vm3, %v6134_v35 }
 0x162   : > { %4156 = vmatmul.mubr.msk.bf16.gmra.mrb[20].mxu1 %vm1158_vm3, %v6135_v25  ;;  %4322 = vmatmul.mubr.msk.bf16.gmra.mrb[16].mxu0 %vm1158_vm3, %v6136_v56 }
 0x163   : > { %4159 = vmatprep.mubr.msk.bf16.mxu1 %vm1158_vm3, %v6137_v55  ;;  %4325 = vmatprep.mubr.msk.bf16.mxu0 %vm1158_vm3, %v6138_v17 }
 0x16a   : > { %4160 = vmatmul.mubr.msk.bf16.gmra.mrb[24].mxu1 %vm1158_vm3, %v6139_v60  ;;  %4326 = vmatmul.mubr.msk.bf16.gmra.mrb[20].mxu0 %vm1158_vm3, %v6140_v59 }
 0x16b   : > { %4163 = vmatprep.mubr.msk.bf16.mxu1 %vm1158_vm3, %v5545_v3  ;;  %4329 = vmatprep.mubr.msk.bf16.mxu0 %vm1158_vm3, %v5543_v47 }
 0x172   : > { %4164 = vmatmul.mubr.msk.bf16.gmra.mrb[28].mxu1 %vm1158_vm3, %v5569_v51  ;;  %4330 = vmatmul.mubr.msk.bf16.gmra.mrb[24].mxu0 %vm1158_vm3, %v5559_v4 }
 0x173   : > { %4169 = vmatprep.mubr.msk.bf16.mxu1 %vm1158_vm3, %v5100_v40  ;;  %4333 = vmatprep.mubr.msk.bf16.mxu0 %vm1158_vm3, %v5589_v34  ;;  %v3415_v40 = vsel %vm3413_vm4, %v3363_v37, 0 }
 0x17a   : > { %4170 = vmatmul.mubr.msk.bf16.vlgmr.msra.gmra.mrb[0].mxu1 %vm1158_vm3, %v5118_v14  ;;  %4334 = vmatmul.mubr.msk.bf16.gmra.mrb[28].mxu0 %vm1158_vm3, %v2794_v5  ;;  %v3205_v14 = vld [vmem:[%s5819_s21] sm:$0xff] }
 0x17b   : > { %4173 = vmatprep.mubr.msk.bf16.mxu1 %vm1158_vm3, %v5171_v13  ;;  %4339 = vmatprep.mubr.msk.bf16.mxu0 %vm1158_vm3, %v5167_v2  ;;  %v3206_v2 = vld [vmem:[%s5819_s21 + $0x8] sm:$0xff]  ;;  %v5826_v13 = vld [vmem:[%s6073_s6] ss:$0 sm:$0xff] }
 0x17c   : > { %4202 = vmatpush3.bf16.msra.mxu1 %v2178_v31  ;;  %v3250_v37 = vmul.f32 %v5826_v13, %v3211_v50  ;;  %v3252_v15 = vmul.f32 %v5826_v13, %v3213_v44  ;;  %v3254_v5 = vmul.f32 %v5826_v13, %v3215_v41  ;;  %v3223_v44 = vld [vmem:[%s5819_s21 + $0x90] sm:$0xff] }
 0x17d   : > { %v3227_v41 = vld [vmem:[%s5819_s21 + $0xb0] sm:$0xff] }
 0x182   : > { %4174 = vmatmul.mubr.msk.bf16.gmra.mrb[4].mxu1 %vm1158_vm3, %v5203_v54  ;;  %4340 = vmatmul.mubr.msk.bf16.vlgmr.msra.gmra.mrb[0].mxu0 %vm1158_vm3, %v5209_v52  ;;  %v3244_v54 = vmul.f32 %v5826_v13, %v3205_v14  ;;  %v3245_v52 = vmul.f32 %v5826_v13, %v3206_v2  ;;  %v3257_v2 = vmul.f32 %v5826_v13, %v3218_v43 }
 0x183   : > { %4372 = vmatpush3.bf16.msra.mxu0 %v3415_v40  ;;  %4177 = vmatprep.mubr.msk.bf16.mxu1 %vm1158_vm3, %v5247_v46 }
 0x184   : > { %4343 = vmatprep.mubr.msk.bf16.mxu0 %vm1158_vm3, %v5244_v10  ;;  %v5841_v10 = vld [vmem:[%s6074_s7] ss:$0 sm:$0xff] }
 0x185   : > { %v3283_v46 = vadd.f32 %v5841_v10, %v3244_v54 }
 0x18a   : > { %4178 = vmatmul.mubr.msk.bf16.gmra.mrb[8].mxu1 %vm1158_vm3, %v5271_v6  ;;  %4344 = vmatmul.mubr.msk.bf16.gmra.mrb[4].mxu0 %vm1158_vm3, %v5280_v24  ;;  %v3284_v6 = vadd.f32 %v5841_v10, %v3245_v52  ;;  %v3207_v24 = vld [vmem:[%s5819_s21 + $0x10] sm:$0xff]  ;;  %v3293_v52 = vadd.f32 %v5841_v10, %v3254_v5 }
 0x18b   : > { %4181 = vmatprep.mubr.msk.bf16.mxu1 %vm1158_vm3, %v5315_v38  ;;  %4347 = vmatprep.mubr.msk.bf16.mxu0 %vm1158_vm3, %v5310_v23  ;;  %v3208_v23 = vld [vmem:[%s5819_s21 + $0x18] sm:$0xff]  ;;  %v3209_v38 = vld [vmem:[%s5819_s21 + $0x20] sm:$0xff] }
 0x192   : > { %4182 = vmatmul.mubr.msk.bf16.gmra.mrb[12].mxu1 %vm1158_vm3, %v5337_v12  ;;  %4348 = vmatmul.mubr.msk.bf16.gmra.mrb[8].mxu0 %vm1158_vm3, %v6127_v8  ;;  %v3246_v12 = vmul.f32 %v5826_v13, %v3207_v24  ;;  %v3251_v8 = vmul.f32 %v5826_v13, %v3212_v27 }
 0x193   : > { %4185 = vmatprep.mubr.msk.bf16.mxu1 %vm1158_vm3, %v5383_v11  ;;  %4351 = vmatprep.mubr.msk.bf16.mxu0 %vm1158_vm3, %v6129_v30  ;;  %v3247_v11 = vmul.f32 %v5826_v13, %v3208_v23  ;;  %v3296_v23 = vadd.f32 %v5841_v10, %v3257_v2 }
 0x19a   : > { %4186 = vmatmul.mubr.msk.bf16.gmra.mrb[16].mxu1 %vm1158_vm3, %v5404_v61  ;;  %4352 = vmatmul.mubr.msk.bf16.gmra.mrb[12].mxu0 %vm1158_vm3, %v6131_v53  ;;  %v6141_v61 = vld [vmem:[#allocation2_spill] sm:$0xff]  ;;  %v3289_v53 = vadd.f32 %v5841_v10, %v3250_v37 }
 0x19b   : > { %4189 = vmatprep.mubr.msk.bf16.mxu1 %vm1158_vm3, %v5443_v58  ;;  %4355 = vmatprep.mubr.msk.bf16.mxu0 %vm1158_vm3, %v6133_v39  ;;  %v3210_v58 = vld [vmem:[%s5819_s21 + $0x28] sm:$0xff]  ;;  %v3290_v39 = vadd.f32 %v5841_v10, %v3251_v8  ;;  %v3262_v8 = vmul.f32 %v5826_v13, %v3223_v44 }
 0x19c   : > { %v3321_v45 = vmax.f32 %v3289_v53, 0.0 }
 0x19d   : > { %v3322_v9 = vmax.f32 %v3290_v39, 0.0  ;;  %v3301_v53 = vadd.f32 %v5841_v10, %v3262_v8 }
 0x19f   : > { %v3350_v54 = vpack.c.bf16 %v3322_v9, %v3321_v45  ;;  %v3333_v43 = vmax.f32 %v3301_v53, 0.0  ;;  %v3266_v9 = vmul.f32 %v5826_v13, %v3227_v41 }
 0x1a1   : > { %v3305_v2 = vadd.f32 %v5841_v10, %v3266_v9 }
 0x1a2   : > { %4190 = vmatmul.mubr.msk.bf16.gmra.mrb[20].mxu1 %vm1158_vm3, %v5465_v49  ;;  %4356 = vmatmul.mubr.msk.bf16.gmra.mrb[16].mxu0 %vm1158_vm3, %v6135_v25  ;;  %v3315_v49 = vmax.f32 %v3283_v46, 0.0 }
 0x1a3   : > { %4193 = vmatprep.mubr.msk.bf16.mxu1 %vm1158_vm3, %v5500_v18  ;;  %4359 = vmatprep.mubr.msk.bf16.mxu0 %vm1158_vm3, %v6137_v55  ;;  %v3248_v18 = vmul.f32 %v5826_v13, %v3209_v38  ;;  %v3291_v55 = vadd.f32 %v5841_v10, %v3252_v15  ;;  %v3219_v38 = vld [vmem:[%s5819_s21 + $0x70] sm:$0xff] }
 0x1a5   : > { %v3287_v62 = vadd.f32 %v5841_v10, %v3248_v18  ;;  %v3323_v40 = vmax.f32 %v3291_v55, 0.0 }
 0x1aa   : > { %4194 = vmatmul.mubr.msk.bf16.gmra.mrb[24].mxu1 %vm1158_vm3, %v5519_v57  ;;  %4360 = vmatmul.mubr.msk.bf16.gmra.mrb[20].mxu0 %vm1158_vm3, %v6139_v60  ;;  %v3285_v57 = vadd.f32 %v5841_v10, %v3246_v12  ;;  %v3222_v12 = vld [vmem:[%s5819_s21 + $0x88] sm:$0xff] }
 0x1ab   : > { %4197 = vmatprep.mubr.msk.bf16.mxu1 %vm1158_vm3, %v5547_v7  ;;  %4363 = vmatprep.mubr.msk.bf16.mxu0 %vm1158_vm3, %v5545_v3  ;;  %v3316_v7 = vmax.f32 %v3284_v6, 0.0  ;;  %v3249_v3 = vmul.f32 %v5826_v13, %v3210_v58  ;;  %v3221_v58 = vld [vmem:[%s5819_s21 + $0x80] sm:$0xff] }
 0x1ac   : > { %v3317_v16 = vmax.f32 %v3285_v57, 0.0  ;;  %v3261_v57 = vmul.f32 %v5826_v13, %v3222_v12 }
 0x1ad   : > { %v3347_v26 = vpack.c.bf16 %v3316_v7, %v3315_v49  ;;  %v3258_v49 = vmul.f32 %v5826_v13, %v3219_v38  ;;  %v3234_v38 = vld [vmem:[%s5819_s21 + $0xe8] sm:$0xff] }
 0x1ae   : > { %v3300_v27 = vadd.f32 %v5841_v10, %v3261_v57 }
 0x1b0   : > { %v3332_v15 = vmax.f32 %v3300_v27, 0.0 }
 0x1b2   : > { %4198 = vmatmul.mubr.msk.bf16.gmra.mrb[28].mxu1 %vm1158_vm3, %v5672_v48  ;;  %4364 = vmatmul.mubr.msk.bf16.gmra.mrb[24].mxu0 %vm1158_vm3, %v5569_v51  ;;  %v3286_v51 = vadd.f32 %v5841_v10, %v3247_v11  ;;  %v3288_v48 = vadd.f32 %v5841_v10, %v3249_v3  ;;  %v3325_v11 = vmax.f32 %v3293_v52, 0.0  ;;  %v3328_v3 = vmax.f32 %v3296_v23, 0.0  ;;  %v3233_v23 = vld [vmem:[%s5819_s21 + $0xe0] sm:$0xff] }
 0x1b3   : > { %4203 = vmatprep.mubr.msk.bf16.mxu1 %vm1158_vm3, %v6141_v61  ;;  %4367 = vmatprep.mubr.msk.bf16.mxu0 %vm1158_vm3, %v5587_v29  ;;  %v3214_v29 = vld [vmem:[%s5819_s21 + $0x48] sm:$0xff] }
 0x1b4   : > { %v3318_v36 = vmax.f32 %v3286_v51, 0.0  ;;  %v3320_v30 = vmax.f32 %v3288_v48, 0.0  ;;  %v3253_v1 = vmul.f32 %v5826_v13, %v3214_v29  ;;  %v3225_v29 = vld [vmem:[%s5819_s21 + $0xa0] sm:$0xff] }
 0x1b6   : > { %v3292_v60 = vadd.f32 %v5841_v10, %v3253_v1 }
 0x1b8   : > { %v3324_v14 = vmax.f32 %v3292_v60, 0.0 }
 0x1ba   : > { %4204 = vmatmul.mubr.msk.bf16.vlgmr.msra.gmra.mrb[0].mxu1 %vm1158_vm3, %v5165_v0  ;;  %4368 = vmatmul.mubr.msk.bf16.gmra.mrb[28].mxu0 %vm1158_vm3, %v3003_v21  ;;  %v3319_v0 = vmax.f32 %v3287_v62, 0.0  ;;  %v3348_v21 = vpack.c.bf16 %v3318_v36, %v3317_v16  ;;  %v3351_v6 = vpack.c.bf16 %v3324_v14, %v3323_v40  ;;  %v3226_v16 = vld [vmem:[%s5819_s21 + $0xa8] sm:$0xff] }
 0x1bb   : > { %4207 = vmatprep.mubr.msk.bf16.mxu1 %vm1158_vm3, %v5196_v32  ;;  %4373 = vmatprep.mubr.msk.bf16.mxu0 %vm3364_vm5, %v3347_v26  ;;  %v3216_v32 = vld [vmem:[%s5819_s21 + $0x58] sm:$0xff]  ;;  %v3297_v26 = vadd.f32 %v5841_v10, %v3258_v49  ;;  %v3265_v1 = vmul.f32 %v5826_v13, %v3226_v16 }
 0x1bc   : > { %v3349_v25 = vpack.c.bf16 %v3320_v30, %v3319_v0  ;;  %v3255_v31 = vmul.f32 %v5826_v13, %v3216_v32  ;;  %v3229_v32 = vld [vmem:[%s5819_s21 + $0xc0] sm:$0xff] }
 0x1bd   : > { %v3329_v36 = vmax.f32 %v3297_v26, 0.0  ;;  %v3304_v60 = vadd.f32 %v5841_v10, %v3265_v1 }
 0x1be   : > { %v3294_v46 = vadd.f32 %v5841_v10, %v3255_v31 }
 0x1bf   : > { %v3336_v40 = vmax.f32 %v3304_v60, 0.0 }
 0x1c0   : > { %v3326_v61 = vmax.f32 %v3294_v46, 0.0 }
 0x1c2   : > { %4208 = vmatmul.mubr.msk.bf16.gmra.mrb[4].mxu1 %vm1158_vm3, %v5242_v63  ;;  %4374 = vmatmul.mubr.msk.bf16.vlgmr.msra.gmra.mrb[0].mxu0 %vm3364_vm5, %v3348_v21  ;;  %v3256_v63 = vmul.f32 %v5826_v13, %v3217_v22  ;;  %v3352_v51 = vpack.c.bf16 %v3326_v61, %v3325_v11  ;;  %v3230_v22 = vld [vmem:[%s5819_s21 + $0xc8] sm:$0xff] }
 0x1c3   : > { %4211 = vmatprep.mubr.msk.bf16.mxu1 %vm1158_vm3, %v5264_v28  ;;  %4377 = vmatprep.mubr.msk.bf16.mxu0 %vm3364_vm5, %v3349_v25  ;;  %v3220_v28 = vld [vmem:[%s5819_s21 + $0x78] sm:$0xff]  ;;  %v3269_v14 = vmul.f32 %v5826_v13, %v3230_v22 }
 0x1c4   : > { %v3295_v24 = vadd.f32 %v5841_v10, %v3256_v63  ;;  %v3259_v7 = vmul.f32 %v5826_v13, %v3220_v28  ;;  %v3337_v28 = vmax.f32 %v3305_v2, 0.0 }
 0x1c6   : > { %v3327_v18 = vmax.f32 %v3295_v24, 0.0  ;;  %v3298_v62 = vadd.f32 %v5841_v10, %v3259_v7  ;;  %v3231_v24 = vld [vmem:[%s5819_s21 + $0xd0] sm:$0xff]  ;;  %v3272_v7 = vmul.f32 %v5826_v13, %v3233_v23 }
 0x1c7   : > { %v3270_v12 = vmul.f32 %v5826_v13, %v3231_v24 }
 0x1c8   : > { %v3353_v48 = vpack.c.bf16 %v3328_v3, %v3327_v18  ;;  %v3330_v37 = vmax.f32 %v3298_v62, 0.0  ;;  %v3235_v62 = vld [vmem:[%s5819_s21 + $0xf0] sm:$0xff] }
 0x1c9   : > { %v3309_v3 = vadd.f32 %v5841_v10, %v3270_v12  ;;  %v3274_v27 = vmul.f32 %v5826_v13, %v3235_v62 }
 0x1ca   : > { %4212 = vmatmul.mubr.msk.bf16.gmra.mrb[8].mxu1 %vm1158_vm3, %v6126_v33  ;;  %4378 = vmatmul.mubr.msk.bf16.gmra.mrb[4].mxu0 %vm3364_vm5, %v3350_v54  ;;  %v3260_v33 = vmul.f32 %v5826_v13, %v3221_v58  ;;  %v3354_v21 = vpack.c.bf16 %v3330_v37, %v3329_v36 }
 0x1cb   : > { %4215 = vmatprep.mubr.msk.bf16.mxu1 %vm1158_vm3, %v6128_v19  ;;  %4381 = vmatprep.mubr.msk.bf16.mxu0 %vm3364_vm5, %v3351_v6  ;;  %v3224_v19 = vld [vmem:[%s5819_s21 + $0x98] sm:$0xff]  ;;  %v3308_v6 = vadd.f32 %v5841_v10, %v3269_v14  ;;  %v3313_v36 = vadd.f32 %v5841_v10, %v3274_v27 }
 0x1cc   : > { %v3299_v50 = vadd.f32 %v5841_v10, %v3260_v33  ;;  %v3263_v0 = vmul.f32 %v5826_v13, %v3224_v19 }
 0x1cd   : > { %v3340_v49 = vmax.f32 %v3308_v6, 0.0 }
 0x1ce   : > { %v3331_v30 = vmax.f32 %v3299_v50, 0.0  ;;  %v3302_v39 = vadd.f32 %v5841_v10, %v3263_v0 }
 0x1d0   : > { %v3355_v25 = vpack.c.bf16 %v3332_v15, %v3331_v30  ;;  %v3334_v45 = vmax.f32 %v3302_v39, 0.0 }
 0x1d2   : > { %4216 = vmatmul.mubr.msk.bf16.gmra.mrb[12].mxu1 %vm1158_vm3, %v6130_v20  ;;  %4382 = vmatmul.mubr.msk.bf16.gmra.mrb[8].mxu0 %vm3364_vm5, %v3352_v51  ;;  %v3264_v20 = vmul.f32 %v5826_v13, %v3225_v29  ;;  %v3356_v63 = vpack.c.bf16 %v3334_v45, %v3333_v43  ;;  %v3311_v51 = vadd.f32 %v5841_v10, %v3272_v7 }
 0x1d3   : > { %4219 = vmatprep.mubr.msk.bf16.mxu1 %vm1158_vm3, %v6132_v42  ;;  %4385 = vmatprep.mubr.msk.bf16.mxu0 %vm3364_vm5, %v3353_v48  ;;  %v3228_v42 = vld [vmem:[%s5819_s21 + $0xb8] sm:$0xff]  ;;  %v3341_v48 = vmax.f32 %v3309_v3, 0.0 }
 0x1d4   : > { %v3303_v55 = vadd.f32 %v5841_v10, %v3264_v20  ;;  %v3267_v5 = vmul.f32 %v5826_v13, %v3228_v42  ;;  %v3343_v19 = vmax.f32 %v3311_v51, 0.0 }
 0x1d6   : > { %v3335_v31 = vmax.f32 %v3303_v55, 0.0  ;;  %v3306_v54 = vadd.f32 %v5841_v10, %v3267_v5 }
 0x1d8   : > { %v3357_v52 = vpack.c.bf16 %v3336_v40, %v3335_v31  ;;  %v3338_v58 = vmax.f32 %v3306_v54, 0.0 }
 0x1da   : > { %4220 = vmatmul.mubr.msk.bf16.gmra.mrb[16].mxu1 %vm1158_vm3, %v6134_v35  ;;  %4386 = vmatmul.mubr.msk.bf16.gmra.mrb[12].mxu0 %vm3364_vm5, %v3354_v21  ;;  %v3268_v35 = vmul.f32 %v5826_v13, %v3229_v32  ;;  %v3358_v18 = vpack.c.bf16 %v3338_v58, %v3337_v28 }
 0x1db   : > { %4223 = vmatprep.mubr.msk.bf16.mxu1 %vm1158_vm3, %v6136_v56  ;;  %4389 = vmatprep.mubr.msk.bf16.mxu0 %vm3364_vm5, %v3355_v25  ;;  %v3232_v56 = vld [vmem:[%s5819_s21 + $0xd8] sm:$0xff] }
 0x1dc   : > { %v3307_v46 = vadd.f32 %v5841_v10, %v3268_v35  ;;  %v3271_v11 = vmul.f32 %v5826_v13, %v3232_v56 }
 0x1de   : > { %v3339_v61 = vmax.f32 %v3307_v46, 0.0  ;;  %v3310_v33 = vadd.f32 %v5841_v10, %v3271_v11 }
 0x1e0   : > { %v3359_v57 = vpack.c.bf16 %v3340_v49, %v3339_v61  ;;  %v3342_v50 = vmax.f32 %v3310_v33, 0.0 }
 0x1e2   : > { %4224 = vmatmul.mubr.msk.bf16.gmra.mrb[20].mxu1 %vm1158_vm3, %v6138_v17  ;;  %4390 = vmatmul.mubr.msk.bf16.gmra.mrb[16].mxu0 %vm3364_vm5, %v3356_v63  ;;  %v3273_v17 = vmul.f32 %v5826_v13, %v3234_v38  ;;  %v3360_v16 = vpack.c.bf16 %v3342_v50, %v3341_v48 }
 0x1e3   : > { %4227 = vmatprep.mubr.msk.bf16.mxu1 %vm1158_vm3, %v6140_v59  ;;  %4393 = vmatprep.mubr.msk.bf16.mxu0 %vm3364_vm5, %v3357_v52  ;;  %v3236_v59 = vld [vmem:[%s5819_s21 + $0xf8] sm:$0xff] }
 0x1e4   : > { %v3312_v26 = vadd.f32 %v5841_v10, %v3273_v17  ;;  %v3275_v44 = vmul.f32 %v5826_v13, %v3236_v59  ;;  %v3345_v13 = vmax.f32 %v3313_v36, 0.0 }
 0x1e6   : > { %v3344_v29 = vmax.f32 %v3312_v26, 0.0 }
 0x1e8   : > { %v3361_v37 = vpack.c.bf16 %v3344_v29, %v3343_v19 }
 0x1ea   : > { %4228 = vmatmul.mubr.msk.bf16.gmra.mrb[24].mxu1 %vm1158_vm3, %v5543_v47  ;;  %4394 = vmatmul.mubr.msk.bf16.gmra.mrb[20].mxu0 %vm3364_vm5, %v3358_v18  ;;  %v3314_v47 = vadd.f32 %v5841_v10, %v3275_v44 }
 0x1eb   : > { %4231 = vmatprep.mubr.msk.bf16.mxu1 %vm1158_vm3, %v5559_v4  ;;  %4397 = vmatprep.mubr.msk.bf16.mxu0 %vm3364_vm5, %v3359_v57 }
 0x1ec   : > { %v3346_v8 = vmax.f32 %v3314_v47, 0.0 }
 0x1ee   : > { %v3362_v4 = vpack.c.bf16 %v3346_v8, %v3345_v13 }
 0x1f2   : > { %4232 = vmatmul.mubr.msk.bf16.gmra.mrb[28].mxu1 %vm1158_vm3, %v5589_v34  ;;  %4398 = vmatmul.mubr.msk.bf16.gmra.mrb[24].mxu0 %vm3364_vm5, %v3360_v16 }
 0x1f3   : > { %4401 = vmatprep.mubr.msk.bf16.mxu0 %vm3364_vm5, %v3361_v37 }
 0x1fa   : > { %4402 = vmatmul.mubr.msk.bf16.gmra.mrb[28].mxu0 %vm3364_vm5, %v3362_v4 }
 0x28d   : > { %v4205_v0 = vpop.f32.mrb[0].mxu1 }
 0x28e   : > { %v2214_v30 = vpop.f32.mrb[1].mxu1 }
 0x28f   : > { %v4206_v15 = vpop.f32.mrb[2].mxu1 }
 0x290   : > { %v2217_v20 = vpop.f32.mrb[3].mxu1 }
 0x295   : > { %v4209_v1 = vpop.f32.mrb[4].mxu1  ;;  %v4375_v34 = vpop.f32.mrb[0].mxu0 }
 0x296   : > { %v4405_v10 = vadd.f32 %v4375_v34, %v4205_v0  ;;  %v2230_v21 = vpop.f32.mrb[5].mxu1  ;;  %v3451_v53 = vpop.f32.mrb[1].mxu0 }
 0x297   : > { %v4406_v39 = vadd.f32 %v3451_v53, %v2214_v30  ;;  %v4210_v25 = vpop.f32.mrb[6].mxu1  ;;  %v4376_v55 = vpop.f32.mrb[2].mxu0 }
 0x298   : > { %3612 = vst.msk [vmem:[%s5998_s28 + $0x10] sm:$0xff] %vm1158_vm3, %v4405_v10  ;;  %v4407_v60 = vadd.f32 %v4376_v55, %v4206_v15  ;;  %v2233_v41 = vpop.f32.mrb[7].mxu1  ;;  %v3454_v42 = vpop.f32.mrb[3].mxu0 }
 0x299   : > { %3610 = vst.msk [vmem:[%s5998_s28] sm:$0xff] %vm1158_vm3, %v4406_v39  ;;  %v4408_v32 = vadd.f32 %v3454_v42, %v2217_v20 }
 0x29a   : > { %3613 = vst.msk [vmem:[%s5998_s28 + $0x18] sm:$0xff] %vm1158_vm3, %v4407_v60 }
 0x29b   : > { %3611 = vst.msk [vmem:[%s5998_s28 + $0x8] sm:$0xff] %vm1158_vm3, %v4408_v32 }
 0x29d   : > { %v4213_v22 = vpop.f32.mrb[8].mxu1  ;;  %v4379_v43 = vpop.f32.mrb[4].mxu0 }
 0x29e   : > { %v4409_v45 = vadd.f32 %v4379_v43, %v4209_v1  ;;  %v2246_v9 = vpop.f32.mrb[9].mxu1  ;;  %v3467_v5 = vpop.f32.mrb[5].mxu0 }
 0x29f   : > { %v4410_v31 = vadd.f32 %v3467_v5, %v2230_v21  ;;  %v4214_v40 = vpop.f32.mrb[10].mxu1  ;;  %v4380_v35 = vpop.f32.mrb[6].mxu0 }
 0x2a0   : > { %3616 = vst.msk [vmem:[%s5998_s28 + $0x30] sm:$0xff] %vm1158_vm3, %v4409_v45  ;;  %v4411_v14 = vadd.f32 %v4380_v35, %v4210_v25  ;;  %v2249_v63 = vpop.f32.mrb[11].mxu1  ;;  %v3470_v2 = vpop.f32.mrb[7].mxu0 }
 0x2a1   : > { %3614 = vst.msk [vmem:[%s5998_s28 + $0x20] sm:$0xff] %vm1158_vm3, %v4410_v31  ;;  %v4412_v54 = vadd.f32 %v3470_v2, %v2233_v41 }
 0x2a2   : > { %3617 = vst.msk [vmem:[%s5998_s28 + $0x38] sm:$0xff] %vm1158_vm3, %v4411_v14 }
 0x2a3   : > { %3615 = vst.msk [vmem:[%s5998_s28 + $0x28] sm:$0xff] %vm1158_vm3, %v4412_v54 }
 0x2a5   : > { %v4217_v52 = vpop.f32.mrb[12].mxu1  ;;  %v4383_v46 = vpop.f32.mrb[8].mxu0 }
 0x2a6   : > { %v4413_v6 = vadd.f32 %v4383_v46, %v4213_v22  ;;  %v2262_v24 = vpop.f32.mrb[13].mxu1  ;;  %v3483_v56 = vpop.f32.mrb[9].mxu0 }
 0x2a7   : > { %v4414_v23 = vadd.f32 %v3483_v56, %v2246_v9  ;;  %v4218_v38 = vpop.f32.mrb[14].mxu1  ;;  %v4384_v28 = vpop.f32.mrb[10].mxu0 }
 0x2a8   : > { %3620 = vst.msk [vmem:[%s5998_s28 + $0x50] sm:$0xff] %vm1158_vm3, %v4413_v6  ;;  %v4415_v58 = vadd.f32 %v4384_v28, %v4214_v40  ;;  %v2265_v12 = vpop.f32.mrb[15].mxu1  ;;  %v3486_v11 = vpop.f32.mrb[11].mxu0 }
 0x2a9   : > { %3618 = vst.msk [vmem:[%s5998_s28 + $0x40] sm:$0xff] %vm1158_vm3, %v4414_v23  ;;  %v4416_v61 = vadd.f32 %v3486_v11, %v2249_v63 }
 0x2aa   : > { %3621 = vst.msk [vmem:[%s5998_s28 + $0x58] sm:$0xff] %vm1158_vm3, %v4415_v58 }
 0x2ab   : > { %3619 = vst.msk [vmem:[%s5998_s28 + $0x48] sm:$0xff] %vm1158_vm3, %v4416_v61 }
 0x2ad   : > { %v4221_v49 = vpop.f32.mrb[16].mxu1  ;;  %v4387_v7 = vpop.f32.mrb[12].mxu0 }
 0x2ae   : > { %v4417_v17 = vadd.f32 %v4387_v7, %v4217_v52  ;;  %v2278_v18 = vpop.f32.mrb[17].mxu1  ;;  %v3499_v3 = vpop.f32.mrb[13].mxu0 }
 0x2af   : > { %v4418_v33 = vadd.f32 %v3499_v3, %v2262_v24  ;;  %v4222_v57 = vpop.f32.mrb[18].mxu1  ;;  %v4388_v51 = vpop.f32.mrb[14].mxu0 }
 0x2b0   : > { %3624 = vst.msk [vmem:[%s5998_s28 + $0x70] sm:$0xff] %vm1158_vm3, %v4417_v17  ;;  %v4419_v26 = vadd.f32 %v4388_v51, %v4218_v38  ;;  %v2281_v62 = vpop.f32.mrb[19].mxu1  ;;  %v3502_v59 = vpop.f32.mrb[15].mxu0 }
 0x2b1   : > { %3622 = vst.msk [vmem:[%s5998_s28 + $0x60] sm:$0xff] %vm1158_vm3, %v4418_v33  ;;  %v4420_v48 = vadd.f32 %v3502_v59, %v2265_v12 }
 0x2b2   : > { %3625 = vst.msk [vmem:[%s5998_s28 + $0x78] sm:$0xff] %vm1158_vm3, %v4419_v26 }
 0x2b3   : > { %3623 = vst.msk [vmem:[%s5998_s28 + $0x68] sm:$0xff] %vm1158_vm3, %v4420_v48 }
 0x2b5   : > { %v4225_v50 = vpop.f32.mrb[20].mxu1  ;;  %v4391_v27 = vpop.f32.mrb[16].mxu0 }
 0x2b6   : > { %v4421_v44 = vadd.f32 %v4391_v27, %v4221_v49  ;;  %v2294_v19 = vpop.f32.mrb[21].mxu1  ;;  %v3515_v29 = vpop.f32.mrb[17].mxu0 }
 0x2b7   : > { %v4422_v16 = vadd.f32 %v3515_v29, %v2278_v18  ;;  %v4226_v36 = vpop.f32.mrb[22].mxu1  ;;  %v4392_v47 = vpop.f32.mrb[18].mxu0 }
 0x2b8   : > { %3628 = vst.msk [vmem:[%s5998_s28 + $0x90] sm:$0xff] %vm1158_vm3, %v4421_v44  ;;  %v4423_v37 = vadd.f32 %v4392_v47, %v4222_v57  ;;  %v2297_v13 = vpop.f32.mrb[23].mxu1  ;;  %v3518_v8 = vpop.f32.mrb[19].mxu0 }
 0x2b9   : > { %3626 = vst.msk [vmem:[%s5998_s28 + $0x80] sm:$0xff] %vm1158_vm3, %v4422_v16  ;;  %v4424_v4 = vadd.f32 %v3518_v8, %v2281_v62 }
 0x2ba   : > { %3629 = vst.msk [vmem:[%s5998_s28 + $0x98] sm:$0xff] %vm1158_vm3, %v4423_v37 }
 0x2bb   : > { %3627 = vst.msk [vmem:[%s5998_s28 + $0x88] sm:$0xff] %vm1158_vm3, %v4424_v4 }
 0x2bd   : > { %v4229_v0 = vpop.f32.mrb[24].mxu1  ;;  %v4395_v30 = vpop.f32.mrb[20].mxu0 }
 0x2be   : > { %v4425_v15 = vadd.f32 %v4395_v30, %v4225_v50  ;;  %v2310_v20 = vpop.f32.mrb[25].mxu1  ;;  %v3531_v1 = vpop.f32.mrb[21].mxu0 }
 0x2bf   : > { %v4426_v34 = vadd.f32 %v3531_v1, %v2294_v19  ;;  %v4230_v10 = vpop.f32.mrb[26].mxu1  ;;  %v4396_v21 = vpop.f32.mrb[22].mxu0 }
 0x2c0   : > { %3632 = vst.msk [vmem:[%s5998_s28 + $0xb0] sm:$0xff] %vm1158_vm3, %v4425_v15  ;;  %v4427_v53 = vadd.f32 %v4396_v21, %v4226_v36  ;;  %v2313_v39 = vpop.f32.mrb[27].mxu1  ;;  %v3534_v25 = vpop.f32.mrb[23].mxu0 }
 0x2c1   : > { %3630 = vst.msk [vmem:[%s5998_s28 + $0xa0] sm:$0xff] %vm1158_vm3, %v4426_v34  ;;  %v4428_v55 = vadd.f32 %v3534_v25, %v2297_v13 }
 0x2c2   : > { %3633 = vst.msk [vmem:[%s5998_s28 + $0xb8] sm:$0xff] %vm1158_vm3, %v4427_v53 }
 0x2c3   : > { %3631 = vst.msk [vmem:[%s5998_s28 + $0xa8] sm:$0xff] %vm1158_vm3, %v4428_v55 }
 0x2c5   : > { %v4233_v60 = vpop.f32.mrb[28].mxu1  ;;  %v4399_v41 = vpop.f32.mrb[24].mxu0 }
 0x2c6   : > { %v4429_v42 = vadd.f32 %v4399_v41, %v4229_v0  ;;  %v2326_v32 = vpop.f32.mrb[29].mxu1  ;;  %v3547_v22 = vpop.f32.mrb[25].mxu0 }
 0x2c7   : > { %v4430_v43 = vadd.f32 %v3547_v22, %v2310_v20  ;;  %v4234_v45 = vpop.f32.mrb[30].mxu1  ;;  %v4400_v9 = vpop.f32.mrb[26].mxu0 }
 0x2c8   : > { %3636 = vst.msk [vmem:[%s5998_s28 + $0xd0] sm:$0xff] %vm1158_vm3, %v4429_v42  ;;  %v4431_v5 = vadd.f32 %v4400_v9, %v4230_v10  ;;  %v2329_v31 = vpop.f32.mrb[31].mxu1  ;;  %v3550_v40 = vpop.f32.mrb[27].mxu0 }
 0x2c9   : > { %3634 = vst.msk [vmem:[%s5998_s28 + $0xc0] sm:$0xff] %vm1158_vm3, %v4430_v43  ;;  %v4432_v35 = vadd.f32 %v3550_v40, %v2313_v39 }
 0x2ca   : > { %3637 = vst.msk [vmem:[%s5998_s28 + $0xd8] sm:$0xff] %vm1158_vm3, %v4431_v5 }
 0x2cb   : > { %3635 = vst.msk [vmem:[%s5998_s28 + $0xc8] sm:$0xff] %vm1158_vm3, %v4432_v35 }
 0x2cd   : > { %v4403_v14 = vpop.f32.mrb[28].mxu0 }
 0x2ce   : > { %v4433_v63 = vadd.f32 %v4403_v14, %v4233_v60  ;;  %v3563_v2 = vpop.f32.mrb[29].mxu0 }
 0x2cf   : > { %v4434_v54 = vadd.f32 %v3563_v2, %v2326_v32  ;;  %v4404_v52 = vpop.f32.mrb[30].mxu0 }
 0x2d0   : > { %3640 = vst.msk [vmem:[%s5998_s28 + $0xf0] sm:$0xff] %vm1158_vm3, %v4433_v63  ;;  %v4435_v46 = vadd.f32 %v4404_v52, %v4234_v45  ;;  %v3566_v6 = vpop.f32.mrb[31].mxu0 }
 0x2d1   : > { %3638 = vst.msk [vmem:[%s5998_s28 + $0xe0] sm:$0xff] %vm1158_vm3, %v4434_v54  ;;  %v4436_v24 = vadd.f32 %v3566_v6, %v2329_v31 }
 0x2d2   : > { %3641 = vst.msk [vmem:[%s5998_s28 + $0xf8] sm:$0xff] %vm1158_vm3, %v4435_v46 }
 0x2d3   : > { %3639 = vst.msk [vmem:[%s5998_s28 + $0xe8] sm:$0xff] %vm1158_vm3, %v4436_v24 }
 0x2d4 PF: > { %s19_s30 = sadd.s32 1, %s4723_s30  }
 0x2d5   : > { %p16_p4 = scmp.ge.s32.totalorder %s19_s30, 4  }
 0x2d7   :  { %18 = sbr.rel (!%p16_p4) target bundleno = 1 (0x1), region = 97 }

</bundles_post_ra>
